<compile_context>
chip_gen: v7x
topology: tpu7x:2x2x1
jax: 0.10.0
libtpu: 0.0.40
codegen_flags: <defaults>
</compile_context>

<pallas_src>
import jax
import jax.numpy as jnp
from jax.experimental import pallas as pl
from jax.experimental.pallas import tpu as pltpu

# ------------------------------------------------------------------ constants
NCOMPS = 15
BASE_NEURONS = [512, 512, 512]
CENTER_IDX = 0
N_JOINTS = 16
N_VERTS = 778
POSE_DIM = NCOMPS + 3                  # use_pca=True -> 18
SHAPE_DIM = 10
FULL_POSE_DIM = N_JOINTS * 3           # 48
POSE_FEAT_DIM = (N_JOINTS - 1) * 9     # 135
HEAD_COLS = 128                        # internal head-matmul width
MISC_COLS = 256                        # lane-dense misc output width
V_PAD = 896                            # 778 padded to 7*128 (lane axis)
POS_COLS = 3 * V_PAD                   # 2688 coordinate-major vertex columns
BLEND_COLS = POS_COLS + 128            # 2816 = 22*128 (verts | 48 joint coords | pad)
ACT_DIM = 160                          # blend K: 10 shape + 144 rot entries + 6 pad

# misc output column layout
FP_OFF = 0                             # full_pose (48)
SHAPE_OFF = 48                         # shape (10)
PCAS_OFF = 58                          # pcas (18)
ROT_OFF = 76                           # 144 rotation-matrix entries (entry-major)

# MANO kinematic tree: parent of each joint (root parent clamped to 0)
PARENTS_SAFE = jnp.array([0, 0, 1, 2, 0, 4, 5, 0, 7, 8, 0, 10, 11, 0, 13, 14],
                         dtype=jnp.int32)
# depth buckets of the tree (5 finger chains of length 3 hanging off the root)
LEVEL1 = jnp.array([1, 4, 7, 10, 13], dtype=jnp.int32)
LEVEL2 = jnp.array([2, 5, 8, 11, 14], dtype=jnp.int32)
LEVEL3 = jnp.array([3, 6, 9, 12, 15], dtype=jnp.int32)
# joint j -> its position in [root, level1, level2, level3] concatenation order
INV_ORDER = jnp.array([0, 1, 6, 11, 2, 7, 12, 3, 8, 13, 4, 9, 14, 5, 10, 15],
                      dtype=jnp.int32)
TIP_VERT_IDS = jnp.array([745, 317, 445, 556, 673], dtype=jnp.int32)
JOINT_REORDER = jnp.array([0, 13, 14, 15, 16, 1, 2, 3, 17, 4, 5, 6, 18,
                           10, 11, 12, 19, 7, 8, 9, 20], dtype=jnp.int32)


def _fullspec(shape):
    nd = len(shape)
    return pl.BlockSpec(shape, lambda i, nd=nd: (0,) * nd)


# ------------------------------------------------------------ Pallas kernel A
# Fused: MLP head (Linear+ReLU x2 + lane-dense head matmul) + in-kernel Rodrigues
# + blend-shape / joint-regression matmul.  big_dirs streamed manually from HBM.
def _head_blend_kernel(x_ref, w1_ref, b1_ref, w2_ref, b2_ref, wh_ref, bh_ref,
                       tmpl_ref, dirs_hbm, misc_ref, blend_ref,
                       dirs_vmem, dirs_sem):
    # Start streaming the 0.9 MiB blend weight now; it overlaps the MLP matmuls
    # and the rodrigues transcendentals below (hidden weight DMA, review item 1/2).
    dirs_cp = pltpu.make_async_copy(dirs_hbm, dirs_vmem, dirs_sem)
    dirs_cp.start()

    x = x_ref[...]
    h = jnp.dot(x.astype(jnp.bfloat16), w1_ref[...],
                preferred_element_type=jnp.float32) + b1_ref[...]
    h = jnp.maximum(h, 0.0)
    h = jnp.dot(h.astype(jnp.bfloat16), w2_ref[...],
                preferred_element_type=jnp.float32) + b2_ref[...]
    h = jnp.maximum(h, 0.0)
    head = jnp.dot(h.astype(jnp.bfloat16), wh_ref[...],
                   preferred_element_type=jnp.float32) + bh_ref[...]
    # head cols: [full_pose 48 | shape 10 | pcas 18 | rx 16 | ry 16 | rz 16 | pad 4]

    # ---- Rodrigues, coordinate-major (all (B,16) vregs; EUP/VPU work) ----
    rx = head[:, 76:92]
    ry = head[:, 92:108]
    rz = head[:, 108:124]
    ang = jnp.sqrt(rx * rx + ry * ry + rz * rz + 1e-12)
    inv = 1.0 / ang
    ax, ay, az = rx * inv, ry * inv, rz * inv
    c = jnp.cos(ang)
    s = jnp.sin(ang)
    t = 1.0 - c
    r00 = c + t * ax * ax
    r01 = t * ax * ay - s * az
    r02 = t * ax * az + s * ay
    r10 = t * ay * ax + s * az
    r11 = c + t * ay * ay
    r12 = t * ay * az - s * ax
    r20 = t * az * ax - s * ay
    r21 = t * az * ay + s * ax
    r22 = c + t * az * az
    rot = jnp.concatenate([r00, r01, r02, r10, r11, r12, r20, r21, r22],
                          axis=1)                              # (B, 144) entry-major

    bsz = head.shape[0]
    misc_ref[...] = jnp.concatenate(
        [head[:, :ROT_OFF], rot,
         jnp.zeros((bsz, MISC_COLS - ROT_OFF - 9 * N_JOINTS), jnp.float32)],
        axis=1)                                                # (B, 256)

    # blend activations: [shape 10 | rot entries 144 | zero pad 6]  (K padded to 160;
    # the (R - I) identity term is folded into the template at init).
    acts = jnp.concatenate(
        [head[:, SHAPE_OFF:PCAS_OFF], rot,
         jnp.zeros((bsz, ACT_DIM - SHAPE_DIM - 9 * N_JOINTS), jnp.float32)],
        axis=1)                                                # (B, 160)

    dirs_cp.wait()
    blend_ref[...] = tmpl_ref[...] + jnp.dot(
        acts.astype(jnp.bfloat16), dirs_vmem[...],
        preferred_element_type=jnp.float32)                    # (B, 2816)


def head_blend(x, p):
    # TODO(synk): add a 'parallel' batch grid dimension (block ~128-256 rows, capped
    # lower on v7x's 64 MiB VMEM) before B grows large; grid=(1,) is right at B=2.
    B = x.shape[0]
    dense_args = (x, p["w1"], p["b1"], p["w2"], p["b2"],
                  p["w_head"], p["b_head"], p["template"])
    in_specs = [_fullspec(a.shape) for a in dense_args]
    in_specs.append(pl.BlockSpec(memory_space=pl.ANY))         # big_dirs stays in HBM
    return pl.pallas_call(
        _head_blend_kernel,
        grid=(1,),
        in_specs=in_specs,
        out_specs=(_fullspec((B, MISC_COLS)), _fullspec((B, BLEND_COLS))),
        out_shape=(jax.ShapeDtypeStruct((B, MISC_COLS), jnp.float32),
                   jax.ShapeDtypeStruct((B, BLEND_COLS), jnp.float32)),
        scratch_shapes=[pltpu.VMEM((ACT_DIM, BLEND_COLS), jnp.bfloat16),
                        pltpu.SemaphoreType.DMA],
        compiler_params=pltpu.CompilerParams(
            dimension_semantics=("arbitrary",)),
    )(*dense_args, p["big_dirs"])


# ------------------------------------------------------------ Pallas kernel B
# Linear blend skinning on the MXU, vertices on lanes:
#   Q[b, c*16+j, v] = pos_h[b, c, v] * w[j, v]   (pos_h = [x, y, z, 1])
#   out[b, m, v]    = sum_{c,j} a_flat[b, m, c*16+j] * Q[b, c*16+j, v]
def _skin_kernel(a_ref, pos_ref, w_ref, out_ref):
    w = w_ref[...]                                      # (16, V_PAD) f32
    pos = pos_ref[...]                                  # (Bc, 3, V_PAD)
    a = a_ref[...]                                      # (Bc, 3, 64)
    bc = pos.shape[0]
    wb = jnp.broadcast_to(w[None], (bc, N_JOINTS, V_PAD))
    q = jnp.concatenate([pos[:, 0:1, :] * wb,
                         pos[:, 1:2, :] * wb,
                         pos[:, 2:3, :] * wb,
                         wb], axis=1)                   # (Bc, 64, V_PAD)
    out_ref[...] = jnp.einsum('bmk,bkv->bmv', a, q,
                              preferred_element_type=jnp.float32)


def skin_vertices(a_flat, pos_cm, w_lbs):
    B = a_flat.shape[0]
    # <=2 grid steps: no per-batch step overhead on single-TC v5e/v6e, and at B>=2
    # both v7x TensorCores still get a step ("parallel" batch axis).
    nblk = min(B, 2)
    bc = pl.cdiv(B, nblk)
    nblk = pl.cdiv(B, bc)
    return pl.pallas_call(
        _skin_kernel,
        grid=(nblk,),
        in_specs=[
            pl.BlockSpec((bc, 3, 4 * N_JOINTS), lambda i: (i, 0, 0)),
            pl.BlockSpec((bc, 3, V_PAD), lambda i: (i, 0, 0)),
            pl.BlockSpec((N_JOINTS, V_PAD), lambda i: (0, 0)),
        ],
        out_specs=pl.BlockSpec((bc, 3, V_PAD), lambda i: (i, 0, 0)),
        out_shape=jax.ShapeDtypeStruct((B, 3, V_PAD), jnp.float32),
        compiler_params=pltpu.CompilerParams(
            dimension_semantics=("parallel",)),
    )(a_flat, pos_cm, w_lbs)


# ----------------------------------------------------------------- JAX glue
def lbs_and_joints(rot_mats, blend_out, params):
    """Kinematic chain (depth-bucketed) + Pallas LBS + joint assembly."""
    B = rot_mats.shape[0]
    pos_cm = blend_out[:, :POS_COLS].reshape(B, 3, V_PAD)          # posed rest verts
    J = blend_out[:, POS_COLS:POS_COLS + FULL_POSE_DIM].reshape(B, N_JOINTS, 3)

    # local joint transforms
    rel_J = J - J[:, PARENTS_SAFE]
    rel_J = rel_J.at[:, 0].set(J[:, 0])
    T = jnp.concatenate([rot_mats, rel_J[..., None]], axis=-1)     # (B,16,3,4)
    bottom = jnp.broadcast_to(jnp.array([0., 0., 0., 1.], jnp.float32),
                              (B, N_JOINTS, 1, 4))
    T = jnp.concatenate([T, bottom], axis=2)                       # (B,16,4,4)

    # depth-bucketed chain: 3 batched 4x4 composes instead of 15 serial ones
    G0 = T[:, 0]                                                   # (B,4,4)
    G1 = jnp.einsum('bmn,bjnk->bjmk', G0, T[:, LEVEL1])            # (B,5,4,4)
    G2 = jnp.einsum('bjmn,bjnk->bjmk', G1, T[:, LEVEL2])
    G3 = jnp.einsum('bjmn,bjnk->bjmk', G2, T[:, LEVEL3])
    G = jnp.concatenate([G0[:, None], G1, G2, G3], axis=1)[:, INV_ORDER]

    posed_joints = G[:, :, :3, 3]                                  # (B,16,3)

    # remove rest-pose contribution: A = G with last column minus G @ [J;0]
    corr = jnp.einsum('bjmn,bjn->bjm', G[:, :, :, :3], J)          # (B,16,4)
    A = G.at[:, :, :, 3].add(-corr)

    # a_flat[b, m, c*16 + j] = A[b, j, m, c]  (matches the Q layout in kernel B)
    a_flat = A[:, :, :3, :].transpose(0, 2, 3, 1).reshape(B, 3, 4 * N_JOINTS)

    verts_cm = skin_vertices(a_flat, pos_cm, params["w_lbs"])      # (B,3,V_PAD)

    verts = jnp.swapaxes(verts_cm[:, :, :N_VERTS], 1, 2)           # (B,778,3)
    tips = jnp.swapaxes(verts_cm[:, :, TIP_VERT_IDS], 1, 2)        # (B,5,3)
    jtr = jnp.concatenate([posed_joints, tips], axis=1)[:, JOINT_REORDER]

    # to millimeters, then center at center_idx (manopth convention)
    verts = verts * 1000.0
    jtr = jtr * 1000.0
    rot_center = jtr[:, CENTER_IDX]
    center = jtr[:, CENTER_IDX:CENTER_IDX + 1]
    jtr = jtr - center
    verts = verts - center

    # TODO(synk): exact definitions of `poses`/`global_trans`/`rot_center` in the
    # modified ManoLayer are unavailable; returning the posed root transform and
    # the uncentered root joint respectively (full_pose is returned by the caller).
    global_trans = G[:, 0]
    return verts, jtr, global_trans, rot_center


def mano_head_forward(inp, params):
    """Full ManoHead.forward (use_pca=True, use_shape=True, depth=False)."""
    B = inp.shape[0]

    # Fused Pallas kernel A: MLP head + rodrigues + blend shapes / joint regression
    misc, blend_out = head_blend(inp, params)
    full_pose = misc[:, FP_OFF:FP_OFF + FULL_POSE_DIM]              # (B, 48)
    shape = misc[:, SHAPE_OFF:SHAPE_OFF + SHAPE_DIM]                # (B, 10)
    pcas = misc[:, PCAS_OFF:PCAS_OFF + POSE_DIM]                    # (B, 18)
    rot_mats = (misc[:, ROT_OFF:ROT_OFF + 9 * N_JOINTS]
                .reshape(B, 3, 3, N_JOINTS).transpose(0, 3, 1, 2))  # (B,16,3,3)

    verts, joints, global_trans, rot_center = lbs_and_joints(
        rot_mats, blend_out, params)              # Pallas kernel B inside

    valid_idx = jnp.ones((B, 1), dtype=jnp.int32)
    results = {
        "verts": verts, "joints": joints, "shape": shape, "pcas": pcas,
        "pose": full_pose, "global_trans": global_trans, "rot_center": rot_center,
        "scale_trans": None,                      # depth=False
        "vis": valid_idx, "mean_pose": params["hands_mean"],
    }
    return results


# ------------------------------------------------------------ parameter init
def init_params(key):
    keys = jax.random.split(key, 12)

    def linear(k, fan_in, fan_out):
        bound = 1.0 / jnp.sqrt(jnp.float32(fan_in))
        kw, kb = jax.random.split(k)
        w = jax.random.uniform(kw, (fan_in, fan_out), jnp.float32, -bound, bound)
        b = jax.random.uniform(kb, (1, fan_out), jnp.float32, -bound, bound)
        return w, b

    w1, b1 = linear(keys[0], BASE_NEURONS[0], BASE_NEURONS[1])
    w2, b2 = linear(keys[1], BASE_NEURONS[1], BASE_NEURONS[2])
    wp, bp = linear(keys[2], BASE_NEURONS[2], POSE_DIM)
    ws, bs = linear(keys[3], BASE_NEURONS[2], SHAPE_DIM)

    # synthetic MANO assets in natural layouts (real assets would be repacked
    # identically once at load time)
    hands_components = 0.1 * jax.random.normal(keys[4], (NCOMPS, 45), jnp.float32)
    hands_mean = 0.1 * jax.random.normal(keys[5], (45,), jnp.float32)
    v_template = 0.1 * jax.random.normal(keys[6], (N_VERTS, 3), jnp.float32)
    shapedirs = 0.01 * jax.random.normal(keys[7], (SHAPE_DIM, N_VERTS, 3), jnp.float32)
    posedirs = 0.001 * jax.random.normal(keys[8], (POSE_FEAT_DIM, N_VERTS, 3), jnp.float32)
    jr = jax.random.uniform(keys[9], (N_JOINTS, N_VERTS), jnp.float32, 0.0, 1.0)
    J_regressor = jr / jnp.sum(jr, axis=1, keepdims=True)
    lw = jax.random.uniform(keys[10], (N_VERTS, N_JOINTS), jnp.float32, 0.0, 1.0)
    lbs_weights = lw / jnp.sum(lw, axis=1, keepdims=True)

    # ---- fused head weight ----
    # full-pose regressor: PCA expanded, hands_mean folded into the bias
    w_fp = jnp.concatenate([wp[:, :3], wp[:, 3:] @ hands_components], axis=1)  # (512,48)
    b_fp = jnp.concatenate(
        [bp[:, :3], hands_mean[None, :] + bp[:, 3:] @ hands_components], axis=1)
    # coordinate-major permutation for the in-kernel rodrigues: col k*16+j <- j*3+k
    perm = jnp.array([j * 3 + k for k in range(3) for j in range(N_JOINTS)],
                     dtype=jnp.int32)

    w_head = jnp.zeros((BASE_NEURONS[2], HEAD_COLS), jnp.float32)
    w_head = w_head.at[:, 0:48].set(w_fp)
    w_head = w_head.at[:, 48:58].set(ws)
    w_head = w_head.at[:, 58:76].set(wp)
    w_head = w_head.at[:, 76:124].set(w_fp[:, perm])
    b_head = jnp.zeros((1, HEAD_COLS), jnp.float32)
    b_head = b_head.at[:, 0:48].set(b_fp)
    b_head = b_head.at[:, 48:58].set(bs)
    b_head = b_head.at[:, 58:76].set(bp)
    b_head = b_head.at[:, 76:124].set(b_fp[:, perm])

    # ---- fused blend dirs (coordinate-major, lane padded) + joint regressor ----
    def to_cm(dirs_v3):  # (..., V, 3) -> (..., 3*V_PAD), col = m*V_PAD + v
        d = jnp.swapaxes(dirs_v3, -1, -2)
        pad = [(0, 0)] * (d.ndim - 1) + [(0, V_PAD - N_VERTS)]
        d = jnp.pad(d, pad)
        return d.reshape(d.shape[:-2] + (POS_COLS,))

    shapedirs_cm = to_cm(shapedirs)                                 # (10, 2688)
    posedirs_cm = to_cm(posedirs)                                   # (135, 2688)
    v_template_cm = to_cm(v_template)                               # (2688,)
    jdirs = jnp.einsum('jv,svk->sjk', J_regressor, shapedirs).reshape(SHAPE_DIM, 48)
    j0 = jnp.einsum('jv,vk->jk', J_regressor, v_template).reshape(48)

    # posedirs rows reordered entry-major: new row e*16 + j <- old row (j-1)*9 + e
    pose_rows = jnp.zeros((9 * N_JOINTS, POS_COLS), jnp.float32)
    for e in range(9):
        pose_rows = pose_rows.at[e * N_JOINTS + 1: e * N_JOINTS + N_JOINTS].set(
            posedirs_cm[e::9])
    # fold the (R - I) identity term into the template:  -I @ posedirs
    ident_corr = (posedirs_cm[0::9].sum(0) + posedirs_cm[4::9].sum(0)
                  + posedirs_cm[8::9].sum(0))

    big_dirs = jnp.zeros((ACT_DIM, BLEND_COLS), jnp.float32)        # K padded to 160
    big_dirs = big_dirs.at[:SHAPE_DIM, :POS_COLS].set(shapedirs_cm)
    big_dirs = big_dirs.at[:SHAPE_DIM, POS_COLS:POS_COLS + 48].set(jdirs)
    big_dirs = big_dirs.at[SHAPE_DIM:SHAPE_DIM + 9 * N_JOINTS, :POS_COLS].set(pose_rows)

    template = jnp.zeros((1, BLEND_COLS), jnp.float32)
    template = template.at[0, :POS_COLS].set(v_template_cm - ident_corr)
    template = template.at[0, POS_COLS:POS_COLS + 48].set(j0)

    # ---- skinning weights, joints on sublanes, lanes = padded vertices ----
    w_lbs = jnp.pad(lbs_weights.T, ((0, 0), (0, V_PAD - N_VERTS)))  # (16, 896) f32

    # Weights kept bf16 to halve the (DMA-bound) weight traffic; activations,
    # biases, template and the LBS path stay f32 (accumulation is f32 throughout).
    return {
        "w1": w1.astype(jnp.bfloat16), "b1": b1,
        "w2": w2.astype(jnp.bfloat16), "b2": b2,
        "w_head": w_head.astype(jnp.bfloat16), "b_head": b_head,
        "big_dirs": big_dirs.astype(jnp.bfloat16), "template": template,
        "w_lbs": w_lbs, "hands_mean": hands_mean,
    }


# --------------------------------------------------------------------- main
if __name__ == "__main__":
    key = jax.random.PRNGKey(0)
    k_param, k_x = jax.random.split(key)
    params = init_params(k_param)

    B = 2
    x = jax.random.normal(k_x, (B, BASE_NEURONS[0]), jnp.float32)   # (2, 512)

    forward = jax.jit(mano_head_forward)
    results = forward(x, params)
    jax.block_until_ready(results["verts"])
    jax.block_until_ready(results["joints"])

    assert results["verts"].shape == (B, N_VERTS, 3)
    assert results["joints"].shape == (B, 21, 3)
    assert results["shape"].shape == (B, SHAPE_DIM)
    assert results["pcas"].shape == (B, POSE_DIM)
    assert results["pose"].shape == (B, FULL_POSE_DIM)
    assert results["global_trans"].shape == (B, 4, 4)
    assert results["rot_center"].shape == (B, 3)
    assert results["vis"].shape == (B, 1)
    assert results["mean_pose"].shape == (45,)
    print("KERNEL_OK")
</pallas_src>

<mosaic_0001>
module attributes {stable_mosaic.version = 11 : i64} {
  func.func @_head_blend_kernel(%arg0: i32, %arg1: memref<2x512xf32, #tpu.memory_space<vmem>>, %arg2: memref<512x512xbf16, #tpu.memory_space<vmem>>, %arg3: memref<1x512xf32, #tpu.memory_space<vmem>>, %arg4: memref<512x512xbf16, #tpu.memory_space<vmem>>, %arg5: memref<1x512xf32, #tpu.memory_space<vmem>>, %arg6: memref<512x128xbf16, #tpu.memory_space<vmem>>, %arg7: memref<1x128xf32, #tpu.memory_space<vmem>>, %arg8: memref<1x2816xf32, #tpu.memory_space<vmem>>, %arg9: memref<160x2816xbf16, #tpu.memory_space<any>>, %arg10: memref<2x256xf32, #tpu.memory_space<vmem>>, %arg11: memref<2x2816xf32, #tpu.memory_space<vmem>>, %arg12: memref<160x2816xbf16, #tpu.memory_space<vmem>>, %arg13: memref<!tpu.dma_semaphore, #tpu.memory_space<semaphore_mem>>) attributes {dimension_semantics = [#tpu.dimension_semantics<arbitrary>], iteration_bounds = array<i64: 1>, scalar_prefetch = 0 : i64, scratch_operands = 2 : i64, tpu.core_type = #tpu.core_type<tc>, window_params = [{pipeline_mode = #tpu.pipeline_mode<synchronous>, transform_indices = @transform_0, window_bounds = array<i64: 2, 512>}, {pipeline_mode = #tpu.pipeline_mode<synchronous>, transform_indices = @transform_1, window_bounds = array<i64: 512, 512>}, {pipeline_mode = #tpu.pipeline_mode<synchronous>, transform_indices = @transform_2, window_bounds = array<i64: 1, 512>}, {pipeline_mode = #tpu.pipeline_mode<synchronous>, transform_indices = @transform_3, window_bounds = array<i64: 512, 512>}, {pipeline_mode = #tpu.pipeline_mode<synchronous>, transform_indices = @transform_4, window_bounds = array<i64: 1, 512>}, {pipeline_mode = #tpu.pipeline_mode<synchronous>, transform_indices = @transform_5, window_bounds = array<i64: 512, 128>}, {pipeline_mode = #tpu.pipeline_mode<synchronous>, transform_indices = @transform_6, window_bounds = array<i64: 1, 128>}, {pipeline_mode = #tpu.pipeline_mode<synchronous>, transform_indices = @transform_7, window_bounds = array<i64: 1, 2816>}, {}, {pipeline_mode = #tpu.pipeline_mode<synchronous>, transform_indices = @transform_9, window_bounds = array<i64: 2, 256>}, {pipeline_mode = #tpu.pipeline_mode<synchronous>, transform_indices = @transform_10, window_bounds = array<i64: 2, 2816>}]} {
    tpu.enqueue_dma source(%arg9 : memref<160x2816xbf16, #tpu.memory_space<any>>) target(%arg12 : memref<160x2816xbf16, #tpu.memory_space<vmem>>) target_semaphore(%arg13 : memref<!tpu.dma_semaphore, #tpu.memory_space<semaphore_mem>>)
    %c0 = arith.constant 0 : index
    %c0_0 = arith.constant 0 : index
    %0 = vector.load %arg1[%c0, %c0_0] : memref<2x512xf32, #tpu.memory_space<vmem>>, vector<2x512xf32>
    %1 = arith.truncf %0 : vector<2x512xf32> to vector<2x512xbf16>
    %c0_1 = arith.constant 0 : index
    %c0_2 = arith.constant 0 : index
    %2 = vector.load %arg2[%c0_1, %c0_2] : memref<512x512xbf16, #tpu.memory_space<vmem>>, vector<512x512xbf16>
    %cst = arith.constant dense<0.000000e+00> : vector<2x512xf32>
    %3 = tpu.matmul %1, %2, %cst {dimension_numbers = #tpu.dot_dimension_numbers<[1], [0], [0], [1], [0, 0, 1, 1], [], []>} : vector<2x512xbf16>, vector<512x512xbf16>, vector<2x512xf32> -> vector<2x512xf32>
    %c0_3 = arith.constant 0 : index
    %c0_4 = arith.constant 0 : index
    %4 = vector.load %arg3[%c0_3, %c0_4] : memref<1x512xf32, #tpu.memory_space<vmem>>, vector<1x512xf32>
    %5 = vector.broadcast %4 : vector<1x512xf32> to vector<2x512xf32>
    %6 = arith.addf %3, %5 : vector<2x512xf32>
    %cst_5 = arith.constant 0.000000e+00 : f32
    %7 = vector.broadcast %cst_5 : f32 to vector<2x512xf32>
    %8 = arith.maximumf %6, %7 : vector<2x512xf32>
    %9 = arith.truncf %8 : vector<2x512xf32> to vector<2x512xbf16>
    %c0_6 = arith.constant 0 : index
    %c0_7 = arith.constant 0 : index
    %10 = vector.load %arg4[%c0_6, %c0_7] : memref<512x512xbf16, #tpu.memory_space<vmem>>, vector<512x512xbf16>
    %cst_8 = arith.constant dense<0.000000e+00> : vector<2x512xf32>
    %11 = tpu.matmul %9, %10, %cst_8 {dimension_numbers = #tpu.dot_dimension_numbers<[1], [0], [0], [1], [0, 0, 1, 1], [], []>} : vector<2x512xbf16>, vector<512x512xbf16>, vector<2x512xf32> -> vector<2x512xf32>
    %c0_9 = arith.constant 0 : index
    %c0_10 = arith.constant 0 : index
    %12 = vector.load %arg5[%c0_9, %c0_10] : memref<1x512xf32, #tpu.memory_space<vmem>>, vector<1x512xf32>
    %13 = vector.broadcast %12 : vector<1x512xf32> to vector<2x512xf32>
    %14 = arith.addf %11, %13 : vector<2x512xf32>
    %cst_11 = arith.constant 0.000000e+00 : f32
    %15 = vector.broadcast %cst_11 : f32 to vector<2x512xf32>
    %16 = arith.maximumf %14, %15 : vector<2x512xf32>
    %17 = arith.truncf %16 : vector<2x512xf32> to vector<2x512xbf16>
    %c0_12 = arith.constant 0 : index
    %c0_13 = arith.constant 0 : index
    %18 = vector.load %arg6[%c0_12, %c0_13] : memref<512x128xbf16, #tpu.memory_space<vmem>>, vector<512x128xbf16>
    %cst_14 = arith.constant dense<0.000000e+00> : vector<2x128xf32>
    %19 = tpu.matmul %17, %18, %cst_14 {dimension_numbers = #tpu.dot_dimension_numbers<[1], [0], [0], [1], [0, 0, 1, 1], [], []>} : vector<2x512xbf16>, vector<512x128xbf16>, vector<2x128xf32> -> vector<2x128xf32>
    %c0_15 = arith.constant 0 : index
    %c0_16 = arith.constant 0 : index
    %20 = vector.load %arg7[%c0_15, %c0_16] : memref<1x128xf32, #tpu.memory_space<vmem>>, vector<1x128xf32>
    %21 = vector.broadcast %20 : vector<1x128xf32> to vector<2x128xf32>
    %22 = arith.addf %19, %21 : vector<2x128xf32>
    %23 = vector.extract_strided_slice %22 {offsets = [0, 76], sizes = [2, 16], strides = [1, 1]} : vector<2x128xf32> to vector<2x16xf32>
    %24 = vector.extract_strided_slice %22 {offsets = [0, 92], sizes = [2, 16], strides = [1, 1]} : vector<2x128xf32> to vector<2x16xf32>
    %25 = vector.extract_strided_slice %22 {offsets = [0, 108], sizes = [2, 16], strides = [1, 1]} : vector<2x128xf32> to vector<2x16xf32>
    %26 = arith.mulf %23, %23 : vector<2x16xf32>
    %27 = arith.mulf %24, %24 : vector<2x16xf32>
    %28 = arith.addf %26, %27 : vector<2x16xf32>
    %29 = arith.mulf %25, %25 : vector<2x16xf32>
    %30 = arith.addf %28, %29 : vector<2x16xf32>
    %cst_17 = arith.constant 9.99999996E-13 : f32
    %31 = vector.broadcast %cst_17 : f32 to vector<2x16xf32>
    %32 = arith.addf %30, %31 : vector<2x16xf32>
    %33 = math.sqrt %32 : vector<2x16xf32>
    %cst_18 = arith.constant 1.000000e+00 : f32
    %34 = vector.broadcast %cst_18 : f32 to vector<2x16xf32>
    %35 = arith.divf %34, %33 : vector<2x16xf32>
    %36 = arith.mulf %23, %35 : vector<2x16xf32>
    %37 = arith.mulf %24, %35 : vector<2x16xf32>
    %38 = arith.mulf %25, %35 : vector<2x16xf32>
    %39 = math.cos %33 : vector<2x16xf32>
    %40 = math.sin %33 : vector<2x16xf32>
    %cst_19 = arith.constant 1.000000e+00 : f32
    %41 = vector.broadcast %cst_19 : f32 to vector<2x16xf32>
    %42 = arith.subf %41, %39 : vector<2x16xf32>
    %43 = arith.mulf %42, %36 : vector<2x16xf32>
    %44 = arith.mulf %43, %36 : vector<2x16xf32>
    %45 = arith.addf %39, %44 : vector<2x16xf32>
    %46 = arith.mulf %42, %36 : vector<2x16xf32>
    %47 = arith.mulf %46, %37 : vector<2x16xf32>
    %48 = arith.mulf %40, %38 : vector<2x16xf32>
    %49 = arith.subf %47, %48 : vector<2x16xf32>
    %50 = arith.mulf %42, %36 : vector<2x16xf32>
    %51 = arith.mulf %50, %38 : vector<2x16xf32>
    %52 = arith.mulf %40, %37 : vector<2x16xf32>
    %53 = arith.addf %51, %52 : vector<2x16xf32>
    %54 = arith.mulf %42, %37 : vector<2x16xf32>
    %55 = arith.mulf %54, %36 : vector<2x16xf32>
    %56 = arith.mulf %40, %38 : vector<2x16xf32>
    %57 = arith.addf %55, %56 : vector<2x16xf32>
    %58 = arith.mulf %42, %37 : vector<2x16xf32>
    %59 = arith.mulf %58, %37 : vector<2x16xf32>
    %60 = arith.addf %39, %59 : vector<2x16xf32>
    %61 = arith.mulf %42, %37 : vector<2x16xf32>
    %62 = arith.mulf %61, %38 : vector<2x16xf32>
    %63 = arith.mulf %40, %36 : vector<2x16xf32>
    %64 = arith.subf %62, %63 : vector<2x16xf32>
    %65 = arith.mulf %42, %38 : vector<2x16xf32>
    %66 = arith.mulf %65, %36 : vector<2x16xf32>
    %67 = arith.mulf %40, %37 : vector<2x16xf32>
    %68 = arith.subf %66, %67 : vector<2x16xf32>
    %69 = arith.mulf %42, %38 : vector<2x16xf32>
    %70 = arith.mulf %69, %37 : vector<2x16xf32>
    %71 = arith.mulf %40, %36 : vector<2x16xf32>
    %72 = arith.addf %70, %71 : vector<2x16xf32>
    %73 = arith.mulf %42, %38 : vector<2x16xf32>
    %74 = arith.mulf %73, %38 : vector<2x16xf32>
    %75 = arith.addf %39, %74 : vector<2x16xf32>
    %76 = tpu.concatenate %45, %49, %53, %57, %60, %64, %68, %72, %75 in 1 : vector<2x16xf32>, vector<2x16xf32>, vector<2x16xf32>, vector<2x16xf32>, vector<2x16xf32>, vector<2x16xf32>, vector<2x16xf32>, vector<2x16xf32>, vector<2x16xf32> -> vector<2x144xf32>
    %77 = vector.extract_strided_slice %22 {offsets = [0, 0], sizes = [2, 76], strides = [1, 1]} : vector<2x128xf32> to vector<2x76xf32>
    %cst_20 = arith.constant 0.000000e+00 : f32
    %78 = vector.broadcast %cst_20 : f32 to vector<2x36xf32>
    %79 = tpu.concatenate %77, %76, %78 in 1 : vector<2x76xf32>, vector<2x144xf32>, vector<2x36xf32> -> vector<2x256xf32>
    %c0_21 = arith.constant 0 : index
    %c0_22 = arith.constant 0 : index
    %80 = vector.load %arg10[%c0_21, %c0_22] : memref<2x256xf32, #tpu.memory_space<vmem>>, vector<2x256xf32>
    tpu.vector_store %arg10[%c0_21, %c0_22], %79 {strides = array<i32>} : memref<2x256xf32, #tpu.memory_space<vmem>>, vector<2x256xf32>,
    %81 = vector.extract_strided_slice %22 {offsets = [0, 48], sizes = [2, 10], strides = [1, 1]} : vector<2x128xf32> to vector<2x10xf32>
    %cst_23 = arith.constant 0.000000e+00 : f32
    %82 = vector.broadcast %cst_23 : f32 to vector<2x6xf32>
    %83 = tpu.concatenate %81, %76, %82 in 1 : vector<2x10xf32>, vector<2x144xf32>, vector<2x6xf32> -> vector<2x160xf32>
    tpu.wait_dma2 semaphore(%arg13 : memref<!tpu.dma_semaphore, #tpu.memory_space<semaphore_mem>>) src(%arg9 : memref<160x2816xbf16, #tpu.memory_space<any>>) dst(%arg12 : memref<160x2816xbf16, #tpu.memory_space<vmem>>)
    %c0_24 = arith.constant 0 : index
    %c0_25 = arith.constant 0 : index
    %84 = vector.load %arg8[%c0_24, %c0_25] : memref<1x2816xf32, #tpu.memory_space<vmem>>, vector<1x2816xf32>
    %85 = arith.truncf %83 : vector<2x160xf32> to vector<2x160xbf16>
    %c0_26 = arith.constant 0 : index
    %c0_27 = arith.constant 0 : index
    %86 = vector.load %arg12[%c0_26, %c0_27] : memref<160x2816xbf16, #tpu.memory_space<vmem>>, vector<160x2816xbf16>
    %cst_28 = arith.constant dense<0.000000e+00> : vector<2x2816xf32>
    %87 = tpu.matmul %85, %86, %cst_28 {dimension_numbers = #tpu.dot_dimension_numbers<[1], [0], [0], [1], [0, 0, 1, 1], [], []>} : vector<2x160xbf16>, vector<160x2816xbf16>, vector<2x2816xf32> -> vector<2x2816xf32>
    %88 = vector.broadcast %84 : vector<1x2816xf32> to vector<2x2816xf32>
    %89 = arith.addf %88, %87 : vector<2x2816xf32>
    %c0_29 = arith.constant 0 : index
    %c0_30 = arith.constant 0 : index
    %90 = vector.load %arg11[%c0_29, %c0_30] : memref<2x2816xf32, #tpu.memory_space<vmem>>, vector<2x2816xf32>
    tpu.vector_store %arg11[%c0_29, %c0_30], %89 {strides = array<i32>} : memref<2x2816xf32, #tpu.memory_space<vmem>>, vector<2x2816xf32>,
    return
  }
  func.func @transform_0(%arg0: i32) -> (i32, i32) {
    %c0_i32 = arith.constant 0 : i32
    %c0_i32_0 = arith.constant 0 : i32
    %c0_i32_1 = arith.constant 0 : i32
    return %c0_i32, %c0_i32_0 : i32, i32
  }
  func.func @transform_1(%arg0: i32) -> (i32, i32) {
    %c0_i32 = arith.constant 0 : i32
    %c0_i32_0 = arith.constant 0 : i32
    %c0_i32_1 = arith.constant 0 : i32
    return %c0_i32, %c0_i32_0 : i32, i32
  }
  func.func @transform_2(%arg0: i32) -> (i32, i32) {
    %c0_i32 = arith.constant 0 : i32
    %c0_i32_0 = arith.constant 0 : i32
    %c0_i32_1 = arith.constant 0 : i32
    return %c0_i32, %c0_i32_0 : i32, i32
  }
  func.func @transform_3(%arg0: i32) -> (i32, i32) {
    %c0_i32 = arith.constant 0 : i32
    %c0_i32_0 = arith.constant 0 : i32
    %c0_i32_1 = arith.constant 0 : i32
    return %c0_i32, %c0_i32_0 : i32, i32
  }
  func.func @transform_4(%arg0: i32) -> (i32, i32) {
    %c0_i32 = arith.constant 0 : i32
    %c0_i32_0 = arith.constant 0 : i32
    %c0_i32_1 = arith.constant 0 : i32
    return %c0_i32, %c0_i32_0 : i32, i32
  }
  func.func @transform_5(%arg0: i32) -> (i32, i32) {
    %c0_i32 = arith.constant 0 : i32
    %c0_i32_0 = arith.constant 0 : i32
    %c0_i32_1 = arith.constant 0 : i32
    return %c0_i32, %c0_i32_0 : i32, i32
  }
  func.func @transform_6(%arg0: i32) -> (i32, i32) {
    %c0_i32 = arith.constant 0 : i32
    %c0_i32_0 = arith.constant 0 : i32
    %c0_i32_1 = arith.constant 0 : i32
    return %c0_i32, %c0_i32_0 : i32, i32
  }
  func.func @transform_7(%arg0: i32) -> (i32, i32) {
    %c0_i32 = arith.constant 0 : i32
    %c0_i32_0 = arith.constant 0 : i32
    %c0_i32_1 = arith.constant 0 : i32
    return %c0_i32, %c0_i32_0 : i32, i32
  }
  func.func @transform_9(%arg0: i32) -> (i32, i32) {
    %c0_i32 = arith.constant 0 : i32
    %c0_i32_0 = arith.constant 0 : i32
    %c0_i32_1 = arith.constant 0 : i32
    return %c0_i32, %c0_i32_0 : i32, i32
  }
  func.func @transform_10(%arg0: i32) -> (i32, i32) {
    %c0_i32 = arith.constant 0 : i32
    %c0_i32_0 = arith.constant 0 : i32
    %c0_i32_1 = arith.constant 0 : i32
    return %c0_i32, %c0_i32_0 : i32, i32
  }
}

module attributes {stable_mosaic.version = 11 : i64} {
  func.func @_skin_kernel(%arg0: i32, %arg1: memref<1x3x64xf32, #tpu.memory_space<vmem>>, %arg2: memref<1x3x896xf32, #tpu.memory_space<vmem>>, %arg3: memref<16x896xf32, #tpu.memory_space<vmem>>, %arg4: memref<1x3x896xf32, #tpu.memory_space<vmem>>) attributes {dimension_semantics = [#tpu.dimension_semantics<parallel>], iteration_bounds = array<i64: 2>, scalar_prefetch = 0 : i64, scratch_operands = 0 : i64, tpu.core_type = #tpu.core_type<tc>, window_params = [{transform_indices = @transform_0, window_bounds = array<i64: 1, 3, 64>}, {transform_indices = @transform_1, window_bounds = array<i64: 1, 3, 896>}, {pipeline_mode = #tpu.pipeline_mode<synchronous>, transform_indices = @transform_2, window_bounds = array<i64: 16, 896>}, {transform_indices = @transform_3, window_bounds = array<i64: 1, 3, 896>}]} {
    %c0 = arith.constant 0 : index
    %c0_0 = arith.constant 0 : index
    %0 = vector.load %arg3[%c0, %c0_0] : memref<16x896xf32, #tpu.memory_space<vmem>>, vector<16x896xf32>
    %c0_1 = arith.constant 0 : index
    %c0_2 = arith.constant 0 : index
    %c0_3 = arith.constant 0 : index
    %1 = vector.load %arg2[%c0_1, %c0_2, %c0_3] : memref<1x3x896xf32, #tpu.memory_space<vmem>>, vector<1x3x896xf32>
    %c0_4 = arith.constant 0 : index
    %c0_5 = arith.constant 0 : index
    %c0_6 = arith.constant 0 : index
    %2 = vector.load %arg1[%c0_4, %c0_5, %c0_6] : memref<1x3x64xf32, #tpu.memory_space<vmem>>, vector<1x3x64xf32>
    %3 = vector.shape_cast %0 : vector<16x896xf32> to vector<1x16x896xf32>
    %4 = vector.extract_strided_slice %1 {offsets = [0, 0, 0], sizes = [1, 1, 896], strides = [1, 1, 1]} : vector<1x3x896xf32> to vector<1x1x896xf32>
    %5 = vector.broadcast %4 : vector<1x1x896xf32> to vector<1x16x896xf32>
    %6 = arith.mulf %5, %3 : vector<1x16x896xf32>
    %7 = vector.extract_strided_slice %1 {offsets = [0, 1, 0], sizes = [1, 1, 896], strides = [1, 1, 1]} : vector<1x3x896xf32> to vector<1x1x896xf32>
    %8 = vector.broadcast %7 : vector<1x1x896xf32> to vector<1x16x896xf32>
    %9 = arith.mulf %8, %3 : vector<1x16x896xf32>
    %10 = vector.extract_strided_slice %1 {offsets = [0, 2, 0], sizes = [1, 1, 896], strides = [1, 1, 1]} : vector<1x3x896xf32> to vector<1x1x896xf32>
    %11 = vector.broadcast %10 : vector<1x1x896xf32> to vector<1x16x896xf32>
    %12 = arith.mulf %11, %3 : vector<1x16x896xf32>
    %13 = tpu.concatenate %6, %9, %12, %3 in 1 : vector<1x16x896xf32>, vector<1x16x896xf32>, vector<1x16x896xf32>, vector<1x16x896xf32> -> vector<1x64x896xf32>
    "tpu.trace_start"() <{level = 10 : i32, message = "bmk,bkv->bmv"}> : () -> ()
    %cst = arith.constant dense<0.000000e+00> : vector<1x3x896xf32>
    %14 = tpu.matmul %2, %13, %cst {dimension_numbers = #tpu.dot_dimension_numbers<[2], [1], [1], [2], [0, 0, 0, 1, 1, 2], [0], [0]>} : vector<1x3x64xf32>, vector<1x64x896xf32>, vector<1x3x896xf32> -> vector<1x3x896xf32>
    "tpu.trace_stop"() : () -> ()
    %c0_7 = arith.constant 0 : index
    %c0_8 = arith.constant 0 : index
    %c0_9 = arith.constant 0 : index
    %15 = vector.load %arg4[%c0_7, %c0_8, %c0_9] : memref<1x3x896xf32, #tpu.memory_space<vmem>>, vector<1x3x896xf32>
    tpu.vector_store %arg4[%c0_7, %c0_8, %c0_9], %14 {strides = array<i32>} : memref<1x3x896xf32, #tpu.memory_space<vmem>>, vector<1x3x896xf32>,
    return
  }
  func.func @transform_0(%arg0: i32) -> (i32, i32, i32) {
    %c0_i32 = arith.constant 0 : i32
    %c0_i32_0 = arith.constant 0 : i32
    %c0_i32_1 = arith.constant 0 : i32
    return %arg0, %c0_i32, %c0_i32_0 : i32, i32, i32
  }
  func.func @transform_1(%arg0: i32) -> (i32, i32, i32) {
    %c0_i32 = arith.constant 0 : i32
    %c0_i32_0 = arith.constant 0 : i32
    %c0_i32_1 = arith.constant 0 : i32
    return %arg0, %c0_i32, %c0_i32_0 : i32, i32, i32
  }
  func.func @transform_2(%arg0: i32) -> (i32, i32) {
    %c0_i32 = arith.constant 0 : i32
    %c0_i32_0 = arith.constant 0 : i32
    %c0_i32_1 = arith.constant 0 : i32
    return %c0_i32, %c0_i32_0 : i32, i32
  }
  func.func @transform_3(%arg0: i32) -> (i32, i32, i32) {
    %c0_i32 = arith.constant 0 : i32
    %c0_i32_0 = arith.constant 0 : i32
    %c0_i32_1 = arith.constant 0 : i32
    return %arg0, %c0_i32, %c0_i32_0 : i32, i32, i32
  }
}

</mosaic_0001>

<bundles_post_ra>
// kernel: sub.6
= control target key start
LH: loop header
LB: loop body
LE: loop exit
PB: predicated region body
PF: predicated region fallthrough
CT: control target
= control target key end

     0   :  { %s56_s0 = inlined_call_operand.vmem [shape: f32[2,16,3,1], index: 0, kind: input, shape index: {}]   ;;  %s57_s1 = inlined_call_operand.vmem [shape: f32[2,16,3,1], index: 1, kind: input, shape index: {}]   ;;  %s58_s2 = inlined_call_operand.vmem [shape: f32[2,16,3,1], index: 2, kind: output, shape index: {}]  }
   0x1   :  { %v3_v0 = vld [vmem:[%s56_s0] sm:$0x7]  ;;  %v20_v2 = vld [vmem:[%s56_s0 + $0x4] sm:$0x7] }
   0x2   :  { %v4_v1 = vld [vmem:[%s57_s1] sm:$0x7]  ;;  %v21_v4 = vld [vmem:[%s57_s1 + $0x4] sm:$0x7] }
   0x3   :  { %v7_v3 = vsub.f32 %v3_v0, %v4_v1  ;;  %v16_v5 = vsub.f32 %v20_v2, %v21_v4 }
   0x5   :  { %9 = vst [vmem:[%s58_s2] sm:$0xf] %v7_v3  ;;  %22 = vst [vmem:[%s58_s2 + $0x4] sm:$0xf] %v16_v5 }

// kernel: mano_head_forward.2
= control target key start
LH: loop header
LB: loop body
LE: loop exit
PB: predicated region body
PF: predicated region fallthrough
CT: control target
= control target key end

     0   :  { %16 = vsyncpa [#allocation5], 0  ;;  %s4990_s0 = inlined_call_operand.vmem [shape: f32[2,512], index: 0, kind: input, shape index: {}]   ;;  %s4991_s1 = inlined_call_operand.hbm [shape: bf16[512,512], index: 1, kind: input, shape index: {}]   ;;  %s4992_s2 = inlined_call_operand.vmem [shape: f32[1,512], index: 2, kind: input, shape index: {}]   ;;  %s4993_s3 = inlined_call_operand.hbm [shape: bf16[512,512], index: 3, kind: input, shape index: {}]   ;;  %s4994_s4 = inlined_call_operand.vmem [shape: f32[1,512], index: 4, kind: input, shape index: {}]   ;;  %s4995_s5 = inlined_call_operand.hbm [shape: bf16[512,128], index: 5, kind: input, shape index: {}]   ;;  %s4996_s6 = inlined_call_operand.vmem [shape: f32[1,128], index: 6, kind: input, shape index: {}]   ;;  %s4997_s7 = inlined_call_operand.vmem [shape: f32[1,2816], index: 7, kind: input, shape index: {}]   ;;  %s4998_s8 = inlined_call_operand.hbm [shape: bf16[160,2816], index: 8, kind: input, shape index: {}]   ;;  %s4999_s9 = inlined_call_operand.vmem [shape: f32[2,256], index: 9, kind: output, shape index: {0}]   ;;  %s5000_s10 = inlined_call_operand.vmem [shape: f32[2,2816], index: 10, kind: output, shape index: {1}]  }
   0x1   :  { %17 = vsyncpa [#allocation7], 0  ;;  %s4644_s13 = smov [#allocation6]   ;;  %s4645_s15 = smov [#allocation4]  }
   0x2   :  { %s39_s14 = sshll.u32 %s4644_s13, 4  ;;  %s25_s16 = sshll.u32 %s4645_s15, 4  ;;  %s40_s14 = int_to_ptr.vmem [resolvable:$true] %s39_s14  ;;  %s4734_s16 = int_to_ptr.vmem [resolvable:$true] %s25_s16 }
   0x3   :  { %s4572_s19 = scalar_lea.hbm %s4993_s3, 16384 }
   0x4   :  { %p4573_p0 = scmp.ne.s32.totalorder %s4993_s3, %s4572_s19  ;;  %p4576_p1 = scmp.lt.u32.totalorder %s4572_s19, %s4993_s3 }
   0x6   :  { %p4578_p2 = pnand %p4576_p1, %p4573_p0 }
   0x8   :  { %4581 = shalt.err (!%p4578_p2)
}
   0x9   :  { %s4582_s24 = scalar_lea.vmem %s40_s14, 16384  ;;  %p4587_p4 = scmp.lt.s32.totalorder %s40_s14, %s40_s14 }
   0xa   :  { %p4583_p3 = scmp.ne.s32.totalorder %s40_s14, %s4582_s24  ;;  %p4588_p5 = scmp.lt.s32.totalorder %s4582_s24, %s4582_s24 }
   0xc   :  { %p4589_p6 = por %p4588_p5, %p4587_p4 }
   0xe   :  { %p4590_p7 = pnand %p4589_p6, %p4583_p3 }
  0x10   :  { %4593 = shalt.err (!%p4590_p7)
}
  0x11   :  { %s4646_s25 = smov 256   ;;  %s4647_s26 = smov 16  }
  0x12   :  { %45 = dma.hbm_to_vmem [thread:$0]  %s4993_s3, 16384, %s40_s14, [#allocation7], %s4646_s25, %s4646_s25, %s4647_s26  }
  0x13   :  { %s4594_s11 = scalar_lea.hbm %s4991_s1, 16384 }
  0x14   :  { %p4595_p8 = scmp.ne.s32.totalorder %s4991_s1, %s4594_s11  ;;  %p4598_p9 = scmp.lt.u32.totalorder %s4594_s11, %s4991_s1 }
  0x16   :  { %p4600_p10 = pnand %p4598_p9, %p4595_p8 }
  0x18   :  { %4603 = shalt.err (!%p4600_p10)
}
  0x19   :  { %s4604_s18 = scalar_lea.vmem %s4734_s16, 16384  ;;  %p4609_p12 = scmp.lt.s32.totalorder %s4734_s16, %s4734_s16 }
  0x1a   :  { %p4605_p11 = scmp.ne.s32.totalorder %s4734_s16, %s4604_s18  ;;  %p4610_p13 = scmp.lt.s32.totalorder %s4604_s18, %s4604_s18 }
  0x1c   :  { %p4611_p0 = por %p4610_p13, %p4609_p12 }
  0x1e   :  { %p4612_p1 = pnand %p4611_p0, %p4605_p11 }
  0x20   :  { %4615 = shalt.err (!%p4612_p1)
}
  0x21   :  { %31 = dma.hbm_to_vmem [thread:$0]  %s4991_s1, 16384, %s4734_s16, [#allocation5], %s4646_s25, %s4646_s25, %s4647_s26  }
  0x22   :  { %s4648_s19 = smov [#allocation8]   ;;  %s4616_s23 = scalar_lea.hbm %s4995_s5, 4096 }
  0x23   :  { %s53_s20 = sshll.u32 %s4648_s19, 4  ;;  %p4617_p2 = scmp.ne.s32.totalorder %s4995_s5, %s4616_s23  ;;  %s54_s20 = int_to_ptr.vmem [resolvable:$true] %s53_s20 }
  0x24   :  { %p4620_p3 = scmp.lt.u32.totalorder %s4616_s23, %s4995_s5 }
  0x26   :  { %p4622_p4 = pnand %p4620_p3, %p4617_p2 }
  0x28   :  { %4625 = shalt.err (!%p4622_p4)
}
  0x29   :  { %s4626_s30 = scalar_lea.vmem %s54_s20, 4096  ;;  %p4631_p6 = scmp.lt.s32.totalorder %s54_s20, %s54_s20 }
  0x2a   :  { %p4627_p5 = scmp.ne.s32.totalorder %s54_s20, %s4626_s30  ;;  %p4632_p7 = scmp.lt.s32.totalorder %s4626_s30, %s4626_s30 }
  0x2c   :  { %p4633_p8 = por %p4632_p7, %p4631_p6 }
  0x2e   :  { %p4634_p9 = pnand %p4633_p8, %p4627_p5 }
  0x30   :  { %4637 = shalt.err (!%p4634_p9)
}
  0x31   :  { %s4649_s1 = smov 64   ;;  %s4650_s16 = smov 4  }
  0x32   :  { %59 = dma.hbm_to_vmem [thread:$0]  %s4995_s5, 4096, %s54_s20, [#allocation7], %s4649_s1, %s4649_s1, %s4650_s16  }
  0x33   :  { %4638 = dma.done.wait [#allocation5], 16384  }
  0x34   :  { %4639 = vsyncadd [#allocation5], 4294950912 }
  0x35   :  { %4640 = dma.done.wait [#allocation7], 20480  }
  0x36   :  { %4641 = vsyncadd [#allocation7], 4294946816  ;;  %s78_s12 = sld [smem:[#allocation0]]   ;;  %s4651_s13 = smov 2816   ;;  %v4659_v36 = vmov 1983009808   ;;  %v115_v38 = vlaneseq }
  0x37   :  { %90 = sst [smem:[#allocation10]] %s4651_s13  ;;  %s4652_s15 = smov 22   ;;  %v113_v37 = vunpack.c.l.s4 %v4659_v36 }
  0x38   :  { %92 = sst [smem:[#allocation10 + $0x1]] %s4651_s13  ;;  %s4653_s17 = smov 128   ;;  %v4784_v43 = vshrl.u32 %v115_v38, 7 }
  0x39   :  { %94 = sst [smem:[#allocation10 + $0x2]] %s4652_s15  ;;  %s4654_s18 = smov 2   ;;  %v114_v42 = vunpack.c.0.s8 %v113_v37 }
  0x3a   :  { %96 = sst [smem:[#allocation10 + $0x3]] %s4649_s1  ;;  %s4655_s3 = smov [#allocation2]  }
  0x3b   :  { %98 = sst [smem:[#allocation10 + $0x4]] %s4653_s17  ;;  %s86_s14 = sshll.u32 %s4655_s3, 4  ;;  %v4787_v49 = vsub.s32 %v114_v42, %v4784_v43  ;;  %s87_s14 = int_to_ptr.vmem [resolvable:$true] %s86_s14 }
  0x3c   :  { %100 = sst [smem:[#allocation10 + $0x5]] %s4654_s18  ;;  %s3722_s19 = sshll.u32 %s78_s12, 26 }
  0x3d   :  { %s4656_s21 = smov 1408   ;;  %s3723_s5 = sadd.s32 134217728, %s3722_s19 }
  0x3e   :  { %102 = sst [smem:[#allocation10 + $0x6]] %s4656_s21  ;;  %s4657_s20 = smov [#allocation3]  }
  0x3f   :  { %104 = sst [smem:[#allocation10 + $0x7]] %s4649_s1  ;;  %s4658_s22 = smov [#allocation9]  }
  0x40   :  { %106 = sst [smem:[#allocation10 + $0x8]] %s4650_s16  ;;  %s4660_s1 = smov 112  }
  0x41   :  { %108 = dma.general %s4998_s8, 28160, %s87_s14, %s4657_s20, %s4658_s22, [#allocation10], %s3723_s5, 0  }
  0x42   :  { %v4147_v0 = vld [vmem:[#allocation4 + $0x4] ss:$16 sps:$4 sm:$0xff]   ;;  %v4149_v1 = vld [vmem:[#allocation4 + $0xc] ss:$16 sps:$4 sm:$0xff]   ;;  %v4151_v2 = vld [vmem:[#allocation4] ss:$16 sps:$4 sm:$0xff]  }
  0x43   :  { %926 = vmatprep.subr.bf16.mxu0 %v4147_v0  ;;  %v4152_v3 = vld [vmem:[#allocation4 + $0x8] ss:$16 sps:$4 sm:$0xff]   ;;  %1008 = vmatprep.subr.bf16.mxu1 %v4149_v1  ;;  %v4153_v4 = vld [vmem:[#allocation4 + $0x24] ss:$16 sps:$4 sm:$0xff]   ;;  %v4155_v5 = vld [vmem:[#allocation4 + $0x2c] ss:$16 sps:$4 sm:$0xff]  }
  0x44   :  { %927 = vmatpush1.bf16.msra.mxu0 %v4151_v2  ;;  %1009 = vmatpush1.bf16.msra.mxu1 %v4152_v3  ;;  %v4157_v6 = vld [vmem:[#allocation4 + $0x20] ss:$16 sps:$4 sm:$0xff]   ;;  %v4158_v7 = vld [vmem:[#allocation4 + $0x28] ss:$16 sps:$4 sm:$0xff]   ;;  %v4159_v8 = vld [vmem:[#allocation4 + $0x44] ss:$16 sps:$4 sm:$0xff]  }
  0x45   :  { %928 = vmatprep.subr.bf16.mxu0 %v4153_v4  ;;  %1010 = vmatprep.subr.bf16.mxu1 %v4155_v5  ;;  %v4161_v9 = vld [vmem:[#allocation4 + $0x4c] ss:$16 sps:$4 sm:$0xff]   ;;  %v4163_v10 = vld [vmem:[#allocation4 + $0x40] ss:$16 sps:$4 sm:$0xff]   ;;  %v4164_v11 = vld [vmem:[#allocation4 + $0x48] ss:$16 sps:$4 sm:$0xff]  }
  0x46   :  { %v4165_v12 = vld [vmem:[#allocation4 + $0x64] ss:$16 sps:$4 sm:$0xff]   ;;  %v4167_v13 = vld [vmem:[#allocation4 + $0x6c] ss:$16 sps:$4 sm:$0xff]   ;;  %v4169_v14 = vld [vmem:[#allocation4 + $0x60] ss:$16 sps:$4 sm:$0xff]  }
  0x47   :  { %v4170_v15 = vld [vmem:[#allocation4 + $0x68] ss:$16 sps:$4 sm:$0xff]   ;;  %v4171_v16 = vld [vmem:[#allocation4 + $0x84] ss:$16 sps:$4 sm:$0xff]   ;;  %v4173_v17 = vld [vmem:[#allocation4 + $0x8c] ss:$16 sps:$4 sm:$0xff]  }
  0x48   :  { %929 = vmatpush1.bf16.msra.mxu0 %v4157_v6  ;;  %1011 = vmatpush1.bf16.msra.mxu1 %v4158_v7  ;;  %v4175_v18 = vld [vmem:[#allocation4 + $0x80] ss:$16 sps:$4 sm:$0xff]   ;;  %v4176_v19 = vld [vmem:[#allocation4 + $0x88] ss:$16 sps:$4 sm:$0xff]   ;;  %v4177_v20 = vld [vmem:[#allocation4 + $0xa4] ss:$16 sps:$4 sm:$0xff]  }
  0x49   :  { %930 = vmatprep.subr.bf16.mxu0 %v4159_v8  ;;  %1012 = vmatprep.subr.bf16.mxu1 %v4161_v9  ;;  %v4179_v21 = vld [vmem:[#allocation4 + $0xac] ss:$16 sps:$4 sm:$0xff]   ;;  %v4181_v22 = vld [vmem:[#allocation4 + $0xa0] ss:$16 sps:$4 sm:$0xff]   ;;  %v4182_v23 = vld [vmem:[#allocation4 + $0xa8] ss:$16 sps:$4 sm:$0xff]  }
  0x4a   :  { %v4183_v24 = vld [vmem:[#allocation4 + $0xc4] ss:$16 sps:$4 sm:$0xff]   ;;  %v4185_v25 = vld [vmem:[#allocation4 + $0xcc] ss:$16 sps:$4 sm:$0xff]   ;;  %v4187_v26 = vld [vmem:[#allocation4 + $0xc0] ss:$16 sps:$4 sm:$0xff]  }
  0x4b   :  { %v4188_v27 = vld [vmem:[#allocation4 + $0xc8] ss:$16 sps:$4 sm:$0xff]   ;;  %v4189_v28 = vld [vmem:[#allocation4 + $0xe4] ss:$16 sps:$4 sm:$0xff]   ;;  %v4191_v29 = vld [vmem:[#allocation4 + $0xec] ss:$16 sps:$4 sm:$0xff]  }
  0x4c   :  { %931 = vmatpush1.bf16.msra.mxu0 %v4163_v10  ;;  %1013 = vmatpush1.bf16.msra.mxu1 %v4164_v11  ;;  %v4193_v30 = vld [vmem:[#allocation4 + $0xe0] ss:$16 sps:$4 sm:$0xff]   ;;  %v4194_v31 = vld [vmem:[#allocation4 + $0xe8] ss:$16 sps:$4 sm:$0xff]   ;;  %v4195_v32 = vld [vmem:[#allocation4 + $0x104] ss:$16 sps:$4 sm:$0xff]  }
  0x4d   :  { %932 = vmatprep.subr.bf16.mxu0 %v4165_v12  ;;  %1014 = vmatprep.subr.bf16.mxu1 %v4167_v13  ;;  %v4197_v33 = vld [vmem:[#allocation4 + $0x10c] ss:$16 sps:$4 sm:$0xff]   ;;  %v4199_v34 = vld [vmem:[#allocation4 + $0x100] ss:$16 sps:$4 sm:$0xff]   ;;  %v4200_v35 = vld [vmem:[#allocation4 + $0x108] ss:$16 sps:$4 sm:$0xff]  }
  0x4e   :  { %v4201_v39 = vld [vmem:[#allocation4 + $0x124] ss:$16 sps:$4 sm:$0xff]   ;;  %v4203_v40 = vld [vmem:[#allocation4 + $0x12c] ss:$16 sps:$4 sm:$0xff]   ;;  %v4205_v41 = vld [vmem:[#allocation4 + $0x120] ss:$16 sps:$4 sm:$0xff]  }
  0x4f   :  { %v4206_v44 = vld [vmem:[#allocation4 + $0x128] ss:$16 sps:$4 sm:$0xff]   ;;  %v4207_v45 = vld [vmem:[#allocation4 + $0x144] ss:$16 sps:$4 sm:$0xff]   ;;  %v4209_v46 = vld [vmem:[#allocation4 + $0x14c] ss:$16 sps:$4 sm:$0xff]  }
  0x50   :  { %933 = vmatpush1.bf16.msra.mxu0 %v4169_v14  ;;  %1015 = vmatpush1.bf16.msra.mxu1 %v4170_v15  ;;  %v4211_v47 = vld [vmem:[#allocation4 + $0x140] ss:$16 sps:$4 sm:$0xff]   ;;  %v4212_v48 = vld [vmem:[#allocation4 + $0x148] ss:$16 sps:$4 sm:$0xff]   ;;  %v4213_v50 = vld [vmem:[#allocation4 + $0x164] ss:$16 sps:$4 sm:$0xff]  }
  0x51   :  { %934 = vmatprep.subr.bf16.mxu0 %v4171_v16  ;;  %1016 = vmatprep.subr.bf16.mxu1 %v4173_v17  ;;  %v4215_v51 = vld [vmem:[#allocation4 + $0x16c] ss:$16 sps:$4 sm:$0xff]   ;;  %v109_v52 = vld [vmem:[%s4990_s0] sm:$0xff]  ;;  %v4218_v55 = vld [vmem:[#allocation4 + $0x168] ss:$16 sps:$4 sm:$0xff]   ;;  %s4661_s25 = smov 96  }
  0x52   :  { %v4217_v53 = vld [vmem:[#allocation4 + $0x160] ss:$16 sps:$4 sm:$0xff]   ;;  %v118_v54 = vrot.slane %v109_v52, %v4787_v49  ;;  %v4219_v56 = vld [vmem:[#allocation4 + $0x184] ss:$16 sps:$4 sm:$0xff]   ;;  %v4221_v57 = vld [vmem:[#allocation4 + $0x18c] ss:$16 sps:$4 sm:$0xff]   ;;  %v111_v4 = vcombine.high %v109_v52, %v109_v52 }
  0x53   :  { %v4223_v59 = vld [vmem:[#allocation4 + $0x180] ss:$16 sps:$4 sm:$0xff]   ;;  %v4224_v61 = vld [vmem:[#allocation4 + $0x188] ss:$16 sps:$4 sm:$0xff]   ;;  %v4225_v62 = vld [vmem:[#allocation4 + $0x1a4] ss:$16 sps:$4 sm:$0xff]  }
  0x54   :  { %935 = vmatpush1.bf16.msra.mxu0 %v4175_v18  ;;  %1017 = vmatpush1.bf16.msra.mxu1 %v4176_v19  ;;  %v126_v58 = vcombine.high %v118_v54, %v118_v54  ;;  %v4227_v63 = vld [vmem:[#allocation4 + $0x1ac] ss:$16 sps:$4 sm:$0xff]   ;;  %v4229_v0 = vld [vmem:[#allocation4 + $0x1a0] ss:$16 sps:$4 sm:$0xff]   ;;  %v4230_v1 = vld [vmem:[#allocation4 + $0x1a8] ss:$16 sps:$4 sm:$0xff]   ;;  %v4794_v9 = vrot.slane %v111_v4, %v4787_v49  ;;  %v132_v16 = vpack.c.bf16 %v118_v54, %v118_v54 }
  0x55   :  { %936 = vmatprep.subr.bf16.mxu0 %v4177_v20  ;;  %1018 = vmatprep.subr.bf16.mxu1 %v4179_v21  ;;  %v4231_v2 = vld [vmem:[#allocation4 + $0x1c4] ss:$16 sps:$4 sm:$0xff]   ;;  %v4233_v3 = vld [vmem:[#allocation4 + $0x1cc] ss:$16 sps:$4 sm:$0xff]   ;;  %v4235_v5 = vld [vmem:[#allocation4 + $0x1c0] ss:$16 sps:$4 sm:$0xff]  }
  0x56   :  { %v133_v60 = vpack.c.bf16 %v126_v58, %v126_v58  ;;  %v4236_v6 = vld [vmem:[#allocation4 + $0x1c8] ss:$16 sps:$4 sm:$0xff]   ;;  %v4237_v7 = vld [vmem:[#allocation4 + $0x1e4] ss:$16 sps:$4 sm:$0xff]   ;;  %v4239_v8 = vld [vmem:[#allocation4 + $0x1ec] ss:$16 sps:$4 sm:$0xff]   ;;  %v127_v14 = vcombine.high %v4794_v9, %v4794_v9 }
  0x57   :  { %v4241_v10 = vld [vmem:[#allocation4 + $0x1e0] ss:$16 sps:$4 sm:$0xff]   ;;  %v4242_v11 = vld [vmem:[#allocation4 + $0x1e8] ss:$16 sps:$4 sm:$0xff]   ;;  %v4246_v12 = vld [vmem:[#allocation4 + $0x204] ss:$16 sps:$4 sm:$0xff]  }
  0x58   :  { %937 = vmatpush1.bf16.msra.mxu0 %v4181_v22  ;;  %1019 = vmatpush1.bf16.msra.mxu1 %v4182_v23  ;;  %v4249_v13 = vld [vmem:[#allocation4 + $0x20c] ss:$16 sps:$4 sm:$0xff]   ;;  %v4244_v15 = vld [vmem:[#allocation4 + $0x200] ss:$16 sps:$4 sm:$0xff]   ;;  %v4247_v17 = vld [vmem:[#allocation4 + $0x208] ss:$16 sps:$4 sm:$0xff]   ;;  %v135_v20 = vpack.c.bf16 %v127_v14, %v127_v14 }
  0x59   :  { %938 = vmatprep.subr.bf16.mxu0 %v4183_v24  ;;  %1020 = vmatprep.subr.bf16.mxu1 %v4185_v25  ;;  %v4252_v18 = vld [vmem:[#allocation4 + $0x224] ss:$16 sps:$4 sm:$0xff]   ;;  %v4255_v19 = vld [vmem:[#allocation4 + $0x22c] ss:$16 sps:$4 sm:$0xff]   ;;  %v4250_v21 = vld [vmem:[#allocation4 + $0x220] ss:$16 sps:$4 sm:$0xff]  }
  0x5a   :  { %958 = vmatprep.mubr.bf16.mxu0 %v133_v60  ;;  %1040 = vmatprep.mubr.bf16.mxu1 %v133_v60  ;;  %v4253_v22 = vld [vmem:[#allocation4 + $0x228] ss:$16 sps:$4 sm:$0xff]   ;;  %v4258_v23 = vld [vmem:[#allocation4 + $0x244] ss:$16 sps:$4 sm:$0xff]   ;;  %v4261_v24 = vld [vmem:[#allocation4 + $0x24c] ss:$16 sps:$4 sm:$0xff]  }
  0x5b   :  { %v4256_v25 = vld [vmem:[#allocation4 + $0x240] ss:$16 sps:$4 sm:$0xff]   ;;  %v4279_v36 = vld [vmem:[#allocation4 + $0x2ac] ss:$16 sps:$4 sm:$0xff]   ;;  %v4277_v38 = vld [vmem:[#allocation4 + $0x2a8] ss:$16 sps:$4 sm:$0xff]  }
  0x5c   :  { %939 = vmatpush1.bf16.msra.mxu0 %v4187_v26  ;;  %1021 = vmatpush1.bf16.msra.mxu1 %v4188_v27  ;;  %v4259_v26 = vld [vmem:[#allocation4 + $0x248] ss:$16 sps:$4 sm:$0xff]   ;;  %v4264_v27 = vld [vmem:[#allocation4 + $0x264] ss:$16 sps:$4 sm:$0xff]   ;;  %v4274_v37 = vld [vmem:[#allocation4 + $0x2a0] ss:$16 sps:$4 sm:$0xff]  }
  0x5d   :  { %940 = vmatprep.subr.bf16.mxu0 %v4189_v28  ;;  %1022 = vmatprep.subr.bf16.mxu1 %v4191_v29  ;;  %v4267_v28 = vld [vmem:[#allocation4 + $0x26c] ss:$16 sps:$4 sm:$0xff]   ;;  %v4262_v29 = vld [vmem:[#allocation4 + $0x260] ss:$16 sps:$4 sm:$0xff]   ;;  %v4283_v42 = vld [vmem:[#allocation4 + $0x2c8] ss:$16 sps:$4 sm:$0xff]  }
  0x5e   :  { %v4295_v52 = vld [vmem:[#allocation4 + $0x308] ss:$16 sps:$4 sm:$0xff]   ;;  %v4303_v54 = vld [vmem:[#allocation4 + $0x32c] ss:$16 sps:$4 sm:$0xff]   ;;  %v4336_v14 = vld [vmem:[#allocation4 + $0x3e4] ss:$16 sps:$4 sm:$0xff]  }
  0x5f   :  { %v4309_v58 = vld [vmem:[#allocation4 + $0x34c] ss:$16 sps:$4 sm:$0xff]   ;;  %v4307_v60 = vld [vmem:[#allocation4 + $0x348] ss:$16 sps:$4 sm:$0xff]   ;;  %s4670_s11 = smov 68   ;;  %s4671_s12 = smov 84  }
  0x60   :  { %941 = vmatpush1.bf16.msra.mxu0 %v4193_v30  ;;  %1023 = vmatpush1.bf16.msra.mxu1 %v4194_v31  ;;  %v4265_v30 = vld [vmem:[#allocation4 + $0x268] ss:$16 sps:$4 sm:$0xff]   ;;  %v4270_v31 = vld [vmem:[#allocation4 + $0x284] ss:$16 sps:$4 sm:$0xff]   ;;  %s4672_s13 = smov 100   ;;  %s4673_s15 = smov 116  }
  0x61   :  { %942 = vmatprep.subr.bf16.mxu0 %v4195_v32  ;;  %1024 = vmatprep.subr.bf16.mxu1 %v4197_v33  ;;  %v4273_v32 = vld [vmem:[#allocation4 + $0x28c] ss:$16 sps:$4 sm:$0xff]   ;;  %v4268_v33 = vld [vmem:[#allocation4 + $0x280] ss:$16 sps:$4 sm:$0xff]   ;;  %v4319_v4 = vld [vmem:[#allocation4 + $0x388] ss:$16 sps:$4 sm:$0xff]  }
  0x62   :  { %s4674_s17 = smov 20   ;;  %s4675_s18 = smov 36  }
  0x63   :  { %s4677_s3 = smov 80   ;;  %s4678_s14 = smov 10  }
  0x64   :  { %943 = vmatpush1.bf16.msra.mxu0 %v4199_v34  ;;  %1025 = vmatpush1.bf16.msra.mxu1 %v4200_v35  ;;  %v4271_v34 = vld [vmem:[#allocation4 + $0x288] ss:$16 sps:$4 sm:$0xff]   ;;  %v4276_v35 = vld [vmem:[#allocation4 + $0x2a4] ss:$16 sps:$4 sm:$0xff]  }
  0x65   :  { %944 = vmatprep.subr.bf16.mxu0 %v4201_v39  ;;  %1026 = vmatprep.subr.bf16.mxu1 %v4203_v40  ;;  %v4282_v39 = vld [vmem:[#allocation4 + $0x2c4] ss:$16 sps:$4 sm:$0xff]   ;;  %v4285_v40 = vld [vmem:[#allocation4 + $0x2cc] ss:$16 sps:$4 sm:$0xff]  }
  0x68   :  { %945 = vmatpush1.bf16.msra.mxu0 %v4205_v41  ;;  %1027 = vmatpush1.bf16.msra.mxu1 %v4206_v44  ;;  %v4280_v41 = vld [vmem:[#allocation4 + $0x2c0] ss:$16 sps:$4 sm:$0xff]   ;;  %v4288_v44 = vld [vmem:[#allocation4 + $0x2e4] ss:$16 sps:$4 sm:$0xff]  }
  0x69   :  { %946 = vmatprep.subr.bf16.mxu0 %v4207_v45  ;;  %1028 = vmatprep.subr.bf16.mxu1 %v4209_v46  ;;  %v4291_v45 = vld [vmem:[#allocation4 + $0x2ec] ss:$16 sps:$4 sm:$0xff]   ;;  %v4286_v46 = vld [vmem:[#allocation4 + $0x2e0] ss:$16 sps:$4 sm:$0xff]  }
  0x6c   :  { %947 = vmatpush1.bf16.msra.mxu0 %v4211_v47  ;;  %1029 = vmatpush1.bf16.msra.mxu1 %v4212_v48  ;;  %v4289_v47 = vld [vmem:[#allocation4 + $0x2e8] ss:$16 sps:$4 sm:$0xff]   ;;  %v4294_v48 = vld [vmem:[#allocation4 + $0x304] ss:$16 sps:$4 sm:$0xff]  }
  0x6d   :  { %948 = vmatprep.subr.bf16.mxu0 %v4213_v50  ;;  %1030 = vmatprep.subr.bf16.mxu1 %v4215_v51  ;;  %v4297_v50 = vld [vmem:[#allocation4 + $0x30c] ss:$16 sps:$4 sm:$0xff]   ;;  %v4292_v51 = vld [vmem:[#allocation4 + $0x300] ss:$16 sps:$4 sm:$0xff]  }
  0x70   :  { %949 = vmatpush1.bf16.msra.mxu0 %v4217_v53  ;;  %1031 = vmatpush1.bf16.msra.mxu1 %v4218_v55  ;;  %v4300_v53 = vld [vmem:[#allocation4 + $0x324] ss:$16 sps:$4 sm:$0xff]   ;;  %v4298_v55 = vld [vmem:[#allocation4 + $0x320] ss:$16 sps:$4 sm:$0xff]  }
  0x71   :  { %950 = vmatprep.subr.bf16.mxu0 %v4219_v56  ;;  %1032 = vmatprep.subr.bf16.mxu1 %v4221_v57  ;;  %v4301_v56 = vld [vmem:[#allocation4 + $0x328] ss:$16 sps:$4 sm:$0xff]   ;;  %v4306_v57 = vld [vmem:[#allocation4 + $0x344] ss:$16 sps:$4 sm:$0xff]  }
  0x74   :  { %951 = vmatpush1.bf16.msra.mxu0 %v4223_v59  ;;  %1033 = vmatpush1.bf16.msra.mxu1 %v4224_v61  ;;  %v4304_v59 = vld [vmem:[#allocation4 + $0x340] ss:$16 sps:$4 sm:$0xff]   ;;  %v4312_v61 = vld [vmem:[#allocation4 + $0x364] ss:$16 sps:$4 sm:$0xff]  }
  0x75   :  { %952 = vmatprep.subr.bf16.mxu0 %v4225_v62  ;;  %1034 = vmatprep.subr.bf16.mxu1 %v4227_v63  ;;  %v4315_v62 = vld [vmem:[#allocation4 + $0x36c] ss:$16 sps:$4 sm:$0xff]   ;;  %v4310_v63 = vld [vmem:[#allocation4 + $0x360] ss:$16 sps:$4 sm:$0xff]  }
  0x78   :  { %953 = vmatpush1.bf16.msra.mxu0 %v4229_v0  ;;  %1035 = vmatpush1.bf16.msra.mxu1 %v4230_v1  ;;  %v4313_v0 = vld [vmem:[#allocation4 + $0x368] ss:$16 sps:$4 sm:$0xff]   ;;  %v4318_v1 = vld [vmem:[#allocation4 + $0x384] ss:$16 sps:$4 sm:$0xff]  }
  0x79   :  { %954 = vmatprep.subr.bf16.mxu0 %v4231_v2  ;;  %1036 = vmatprep.subr.bf16.mxu1 %v4233_v3  ;;  %v4321_v2 = vld [vmem:[#allocation4 + $0x38c] ss:$16 sps:$4 sm:$0xff]   ;;  %v4316_v3 = vld [vmem:[#allocation4 + $0x380] ss:$16 sps:$4 sm:$0xff]  }
  0x7c   :  { %955 = vmatpush1.bf16.msra.mxu0 %v4235_v5  ;;  %1037 = vmatpush1.bf16.msra.mxu1 %v4236_v6  ;;  %v4324_v5 = vld [vmem:[#allocation4 + $0x3a4] ss:$16 sps:$4 sm:$0xff]   ;;  %v4327_v6 = vld [vmem:[#allocation4 + $0x3ac] ss:$16 sps:$4 sm:$0xff]  }
  0x7d   :  { %956 = vmatprep.subr.bf16.mxu0 %v4237_v7  ;;  %1038 = vmatprep.subr.bf16.mxu1 %v4239_v8  ;;  %v4322_v7 = vld [vmem:[#allocation4 + $0x3a0] ss:$16 sps:$4 sm:$0xff]   ;;  %v4325_v8 = vld [vmem:[#allocation4 + $0x3a8] ss:$16 sps:$4 sm:$0xff]  }
  0x80   :  { %957 = vmatpush1.bf16.msra.mxu0 %v4241_v10  ;;  %1039 = vmatpush1.bf16.msra.mxu1 %v4242_v11  ;;  %v4330_v10 = vld [vmem:[#allocation4 + $0x3c4] ss:$16 sps:$4 sm:$0xff]   ;;  %v4333_v11 = vld [vmem:[#allocation4 + $0x3cc] ss:$16 sps:$4 sm:$0xff]  }
  0x81   :  { %967 = vmatprep.subr.bf16.mxu0 %v4246_v12  ;;  %1049 = vmatprep.subr.bf16.mxu1 %v4249_v13  ;;  %v4328_v12 = vld [vmem:[#allocation4 + $0x3c0] ss:$16 sps:$4 sm:$0xff]   ;;  %v4331_v13 = vld [vmem:[#allocation4 + $0x3c8] ss:$16 sps:$4 sm:$0xff]  }
  0x83   :  { %959 = vmatmul.mubr.bf16.vlgmr.msra.gmra.mrb[0].mxu0 %v132_v16  ;;  %1041 = vmatmul.mubr.bf16.vlgmr.msra.gmra.mrb[0].mxu1 %v132_v16  ;;  %v4334_v16 = vld [vmem:[#allocation4 + $0x3e0] ss:$16 sps:$4 sm:$0xff]  }
  0x84   :  { %968 = vmatpush1.bf16.msra.mxu0 %v4244_v15  ;;  %1050 = vmatpush1.bf16.msra.mxu1 %v4247_v17  ;;  %v4339_v15 = vld [vmem:[#allocation4 + $0x3ec] ss:$16 sps:$4 sm:$0xff]   ;;  %v4337_v17 = vld [vmem:[#allocation4 + $0x3e8] ss:$16 sps:$4 sm:$0xff]  }
  0x85   :  { %969 = vmatprep.subr.bf16.mxu0 %v4252_v18  ;;  %1051 = vmatprep.subr.bf16.mxu1 %v4255_v19  ;;  %v4342_v18 = vld [vmem:[#allocation6 + $0x4] ss:$16 sps:$4 sm:$0xff]   ;;  %v4345_v19 = vld [vmem:[#allocation6 + $0xc] ss:$16 sps:$4 sm:$0xff]  }
  0x86   :  { %999 = vmatprep.mubr.bf16.mxu0 %v135_v20  ;;  %1081 = vmatprep.mubr.bf16.mxu1 %v135_v20  ;;  %v4340_v20 = vld [vmem:[#allocation6] ss:$16 sps:$4 sm:$0xff]  }
  0x88   :  { %970 = vmatpush1.bf16.msra.mxu0 %v4250_v21  ;;  %1052 = vmatpush1.bf16.msra.mxu1 %v4253_v22  ;;  %v4343_v21 = vld [vmem:[#allocation6 + $0x8] ss:$16 sps:$4 sm:$0xff]   ;;  %v134_v22 = vpack.c.bf16 %v4794_v9, %v4794_v9  ;;  %v4363_v9 = vld [vmem:[#allocation6 + $0x6c] ss:$16 sps:$4 sm:$0xff]  }
  0x89   :  { %971 = vmatprep.subr.bf16.mxu0 %v4258_v23  ;;  %1053 = vmatprep.subr.bf16.mxu1 %v4261_v24  ;;  %v4348_v23 = vld [vmem:[#allocation6 + $0x24] ss:$16 sps:$4 sm:$0xff]   ;;  %v4351_v24 = vld [vmem:[#allocation6 + $0x2c] ss:$16 sps:$4 sm:$0xff]  }
  0x8c   :  { %972 = vmatpush1.bf16.msra.mxu0 %v4256_v25  ;;  %1054 = vmatpush1.bf16.msra.mxu1 %v4259_v26  ;;  %v4346_v25 = vld [vmem:[#allocation6 + $0x20] ss:$16 sps:$4 sm:$0xff]   ;;  %v4349_v26 = vld [vmem:[#allocation6 + $0x28] ss:$16 sps:$4 sm:$0xff]  }
  0x8d   :  { %973 = vmatprep.subr.bf16.mxu0 %v4264_v27  ;;  %1055 = vmatprep.subr.bf16.mxu1 %v4267_v28  ;;  %v4354_v27 = vld [vmem:[#allocation6 + $0x44] ss:$16 sps:$4 sm:$0xff]   ;;  %v4357_v28 = vld [vmem:[#allocation6 + $0x4c] ss:$16 sps:$4 sm:$0xff]  }
  0x90   :  { %974 = vmatpush1.bf16.msra.mxu0 %v4262_v29  ;;  %1056 = vmatpush1.bf16.msra.mxu1 %v4265_v30  ;;  %v4352_v29 = vld [vmem:[#allocation6 + $0x40] ss:$16 sps:$4 sm:$0xff]   ;;  %v4355_v30 = vld [vmem:[#allocation6 + $0x48] ss:$16 sps:$4 sm:$0xff]  }
  0x91   :  { %975 = vmatprep.subr.bf16.mxu0 %v4270_v31  ;;  %1057 = vmatprep.subr.bf16.mxu1 %v4273_v32  ;;  %v4360_v31 = vld [vmem:[#allocation6 + $0x64] ss:$16 sps:$4 sm:$0xff]   ;;  %v4358_v32 = vld [vmem:[#allocation6 + $0x60] ss:$16 sps:$4 sm:$0xff]  }
  0x94   :  { %976 = vmatpush1.bf16.msra.mxu0 %v4268_v33  ;;  %1058 = vmatpush1.bf16.msra.mxu1 %v4271_v34  ;;  %v4361_v33 = vld [vmem:[#allocation6 + $0x68] ss:$16 sps:$4 sm:$0xff]   ;;  %v4366_v34 = vld [vmem:[#allocation6 + $0x84] ss:$16 sps:$4 sm:$0xff]  }
  0x95   :  { %977 = vmatprep.subr.bf16.mxu0 %v4276_v35  ;;  %1059 = vmatprep.subr.bf16.mxu1 %v4279_v36  ;;  %v4369_v35 = vld [vmem:[#allocation6 + $0x8c] ss:$16 sps:$4 sm:$0xff]   ;;  %v4364_v36 = vld [vmem:[#allocation6 + $0x80] ss:$16 sps:$4 sm:$0xff]  }
  0x98   :  { %978 = vmatpush1.bf16.msra.mxu0 %v4274_v37  ;;  %1060 = vmatpush1.bf16.msra.mxu1 %v4277_v38  ;;  %v4367_v37 = vld [vmem:[#allocation6 + $0x88] ss:$16 sps:$4 sm:$0xff]   ;;  %v4372_v38 = vld [vmem:[#allocation6 + $0xa4] ss:$16 sps:$4 sm:$0xff]  }
  0x99   :  { %979 = vmatprep.subr.bf16.mxu0 %v4282_v39  ;;  %1061 = vmatprep.subr.bf16.mxu1 %v4285_v40  ;;  %v4375_v39 = vld [vmem:[#allocation6 + $0xac] ss:$16 sps:$4 sm:$0xff]   ;;  %v4370_v40 = vld [vmem:[#allocation6 + $0xa0] ss:$16 sps:$4 sm:$0xff]  }
  0x9c   :  { %980 = vmatpush1.bf16.msra.mxu0 %v4280_v41  ;;  %1062 = vmatpush1.bf16.msra.mxu1 %v4283_v42  ;;  %v4373_v41 = vld [vmem:[#allocation6 + $0xa8] ss:$16 sps:$4 sm:$0xff]   ;;  %v4378_v42 = vld [vmem:[#allocation6 + $0xc4] ss:$16 sps:$4 sm:$0xff]  }
  0x9d   :  { %981 = vmatprep.subr.bf16.mxu0 %v4288_v44  ;;  %1063 = vmatprep.subr.bf16.mxu1 %v4291_v45  ;;  %v4381_v44 = vld [vmem:[#allocation6 + $0xcc] ss:$16 sps:$4 sm:$0xff]   ;;  %v4376_v45 = vld [vmem:[#allocation6 + $0xc0] ss:$16 sps:$4 sm:$0xff]  }
  0xa0   :  { %982 = vmatpush1.bf16.msra.mxu0 %v4286_v46  ;;  %1064 = vmatpush1.bf16.msra.mxu1 %v4289_v47  ;;  %v4379_v46 = vld [vmem:[#allocation6 + $0xc8] ss:$16 sps:$4 sm:$0xff]   ;;  %v4384_v47 = vld [vmem:[#allocation6 + $0xe4] ss:$16 sps:$4 sm:$0xff]  }
  0xa1   :  { %983 = vmatprep.subr.bf16.mxu0 %v4294_v48  ;;  %1065 = vmatprep.subr.bf16.mxu1 %v4297_v50  ;;  %v4387_v48 = vld [vmem:[#allocation6 + $0xec] ss:$16 sps:$4 sm:$0xff]   ;;  %v4382_v50 = vld [vmem:[#allocation6 + $0xe0] ss:$16 sps:$4 sm:$0xff]  }
  0xa4   :  { %984 = vmatpush1.bf16.msra.mxu0 %v4292_v51  ;;  %1066 = vmatpush1.bf16.msra.mxu1 %v4295_v52  ;;  %v4385_v51 = vld [vmem:[#allocation6 + $0xe8] ss:$16 sps:$4 sm:$0xff]   ;;  %v4390_v52 = vld [vmem:[#allocation6 + $0x104] ss:$16 sps:$4 sm:$0xff]  }
  0xa5   :  { %985 = vmatprep.subr.bf16.mxu0 %v4300_v53  ;;  %1067 = vmatprep.subr.bf16.mxu1 %v4303_v54  ;;  %v4393_v53 = vld [vmem:[#allocation6 + $0x10c] ss:$16 sps:$4 sm:$0xff]   ;;  %v4388_v54 = vld [vmem:[#allocation6 + $0x100] ss:$16 sps:$4 sm:$0xff]  }
  0xa8   :  { %986 = vmatpush1.bf16.msra.mxu0 %v4298_v55  ;;  %1068 = vmatpush1.bf16.msra.mxu1 %v4301_v56  ;;  %v4391_v55 = vld [vmem:[#allocation6 + $0x108] ss:$16 sps:$4 sm:$0xff]   ;;  %v4396_v56 = vld [vmem:[#allocation6 + $0x124] ss:$16 sps:$4 sm:$0xff]  }
  0xa9   :  { %987 = vmatprep.subr.bf16.mxu0 %v4306_v57  ;;  %1069 = vmatprep.subr.bf16.mxu1 %v4309_v58  ;;  %v4399_v57 = vld [vmem:[#allocation6 + $0x12c] ss:$16 sps:$4 sm:$0xff]   ;;  %v4394_v58 = vld [vmem:[#allocation6 + $0x120] ss:$16 sps:$4 sm:$0xff]  }
  0xac   :  { %988 = vmatpush1.bf16.msra.mxu0 %v4304_v59  ;;  %1070 = vmatpush1.bf16.msra.mxu1 %v4307_v60  ;;  %v4397_v59 = vld [vmem:[#allocation6 + $0x128] ss:$16 sps:$4 sm:$0xff]   ;;  %v4402_v60 = vld [vmem:[#allocation6 + $0x144] ss:$16 sps:$4 sm:$0xff]  }
  0xad   :  { %989 = vmatprep.subr.bf16.mxu0 %v4312_v61  ;;  %1071 = vmatprep.subr.bf16.mxu1 %v4315_v62  ;;  %v4405_v61 = vld [vmem:[#allocation6 + $0x14c] ss:$16 sps:$4 sm:$0xff]   ;;  %v4400_v62 = vld [vmem:[#allocation6 + $0x140] ss:$16 sps:$4 sm:$0xff]  }
  0xb0   :  { %990 = vmatpush1.bf16.msra.mxu0 %v4310_v63  ;;  %1072 = vmatpush1.bf16.msra.mxu1 %v4313_v0  ;;  %v4403_v63 = vld [vmem:[#allocation6 + $0x148] ss:$16 sps:$4 sm:$0xff]   ;;  %v4408_v0 = vld [vmem:[#allocation6 + $0x164] ss:$16 sps:$4 sm:$0xff]  }
  0xb1   :  { %991 = vmatprep.subr.bf16.mxu0 %v4318_v1  ;;  %1073 = vmatprep.subr.bf16.mxu1 %v4321_v2  ;;  %v4411_v1 = vld [vmem:[#allocation6 + $0x16c] ss:$16 sps:$4 sm:$0xff]   ;;  %v4406_v2 = vld [vmem:[#allocation6 + $0x160] ss:$16 sps:$4 sm:$0xff]  }
  0xb4   :  { %992 = vmatpush1.bf16.msra.mxu0 %v4316_v3  ;;  %1074 = vmatpush1.bf16.msra.mxu1 %v4319_v4  ;;  %v4409_v3 = vld [vmem:[#allocation6 + $0x168] ss:$16 sps:$4 sm:$0xff]   ;;  %v4414_v4 = vld [vmem:[#allocation6 + $0x184] ss:$16 sps:$4 sm:$0xff]  }
  0xb5   :  { %993 = vmatprep.subr.bf16.mxu0 %v4324_v5  ;;  %1075 = vmatprep.subr.bf16.mxu1 %v4327_v6  ;;  %v4417_v5 = vld [vmem:[#allocation6 + $0x18c] ss:$16 sps:$4 sm:$0xff]   ;;  %v4412_v6 = vld [vmem:[#allocation6 + $0x180] ss:$16 sps:$4 sm:$0xff]  }
  0xb8   :  { %994 = vmatpush1.bf16.msra.mxu0 %v4322_v7  ;;  %1076 = vmatpush1.bf16.msra.mxu1 %v4325_v8  ;;  %v4415_v7 = vld [vmem:[#allocation6 + $0x188] ss:$16 sps:$4 sm:$0xff]   ;;  %v4420_v8 = vld [vmem:[#allocation6 + $0x1a4] ss:$16 sps:$4 sm:$0xff]  }
  0xb9   :  { %995 = vmatprep.subr.bf16.mxu0 %v4330_v10  ;;  %1077 = vmatprep.subr.bf16.mxu1 %v4333_v11  ;;  %v4423_v10 = vld [vmem:[#allocation6 + $0x1ac] ss:$16 sps:$4 sm:$0xff]   ;;  %v4418_v11 = vld [vmem:[#allocation6 + $0x1a0] ss:$16 sps:$4 sm:$0xff]  }
  0xbc   :  { %996 = vmatpush1.bf16.msra.mxu0 %v4328_v12  ;;  %1078 = vmatpush1.bf16.msra.mxu1 %v4331_v13  ;;  %v4421_v12 = vld [vmem:[#allocation6 + $0x1a8] ss:$16 sps:$4 sm:$0xff]   ;;  %v4426_v13 = vld [vmem:[#allocation6 + $0x1c4] ss:$16 sps:$4 sm:$0xff]  }
  0xbd   :  { %997 = vmatprep.subr.bf16.mxu0 %v4336_v14  ;;  %1079 = vmatprep.subr.bf16.mxu1 %v4339_v15  ;;  %v4429_v14 = vld [vmem:[#allocation6 + $0x1cc] ss:$16 sps:$4 sm:$0xff]   ;;  %v4424_v15 = vld [vmem:[#allocation6 + $0x1c0] ss:$16 sps:$4 sm:$0xff]  }
  0xc0   :  { %998 = vmatpush1.bf16.msra.mxu0 %v4334_v16  ;;  %1080 = vmatpush1.bf16.msra.mxu1 %v4337_v17  ;;  %v4427_v16 = vld [vmem:[#allocation6 + $0x1c8] ss:$16 sps:$4 sm:$0xff]   ;;  %v4432_v17 = vld [vmem:[#allocation6 + $0x1e4] ss:$16 sps:$4 sm:$0xff]  }
  0xc1   :  { %1888 = vmatprep.subr.bf16.mxu0 %v4342_v18  ;;  %1970 = vmatprep.subr.bf16.mxu1 %v4345_v19  ;;  %v4435_v18 = vld [vmem:[#allocation6 + $0x1ec] ss:$16 sps:$4 sm:$0xff]   ;;  %v4430_v19 = vld [vmem:[#allocation6 + $0x1e0] ss:$16 sps:$4 sm:$0xff]  }
  0xc3   :  { %1000 = vmatmul.mubr.bf16.vlgmr.msra.gmra.mrb[0].mxu0 %v134_v22  ;;  %1082 = vmatmul.mubr.bf16.vlgmr.msra.gmra.mrb[0].mxu1 %v134_v22  ;;  %v4441_v22 = vld [vmem:[#allocation6 + $0x20c] ss:$16 sps:$4 sm:$0xff]  }
  0xc4   :  { %1889 = vmatpush1.bf16.msra.mxu0 %v4340_v20  ;;  %1971 = vmatpush1.bf16.msra.mxu1 %v4343_v21  ;;  %v4433_v20 = vld [vmem:[#allocation6 + $0x1e8] ss:$16 sps:$4 sm:$0xff]   ;;  %v4438_v21 = vld [vmem:[#allocation6 + $0x204] ss:$16 sps:$4 sm:$0xff]  }
  0xc5   :  { %1890 = vmatprep.subr.bf16.mxu0 %v4348_v23  ;;  %1972 = vmatprep.subr.bf16.mxu1 %v4351_v24  ;;  %v4801_v23 = vsub.s32 0, %v4784_v43  ;;  %v4806_v24 = vld [vmem:[%s4992_s2] sm:$0xf] }
  0xc8   :  { %1891 = vmatpush1.bf16.msra.mxu0 %v4346_v25  ;;  %1973 = vmatpush1.bf16.msra.mxu1 %v4349_v26  ;;  %v4809_v25 = vsub.s32 1, %v4784_v43  ;;  %v4812_v26 = vsub.s32 3, %v4784_v43 }
  0xc9   :  { %1892 = vmatprep.subr.bf16.mxu0 %v4354_v27  ;;  %1974 = vmatprep.subr.bf16.mxu1 %v4357_v28  ;;  %v269_v27 = vrot.slane %v4806_v24, %v4801_v23 }
  0xca   :  { %v273_v28 = vrot.slane %v4806_v24, %v4809_v25 }
  0xcc   :  { %1893 = vmatpush1.bf16.msra.mxu0 %v4352_v29  ;;  %1975 = vmatpush1.bf16.msra.mxu1 %v4355_v30  ;;  %v281_v29 = vrot.slane %v4806_v24, %v4812_v26 }
  0xcd   :  { %1894 = vmatprep.subr.bf16.mxu0 %v4360_v31  ;;  %1976 = vmatprep.subr.bf16.mxu1 %v4363_v9 }
  0xd0   :  { %1895 = vmatpush1.bf16.msra.mxu0 %v4358_v32  ;;  %1977 = vmatpush1.bf16.msra.mxu1 %v4361_v33 }
  0xd1   :  { %1896 = vmatprep.subr.bf16.mxu0 %v4366_v34  ;;  %1978 = vmatprep.subr.bf16.mxu1 %v4369_v35 }
  0xd4   :  { %1897 = vmatpush1.bf16.msra.mxu0 %v4364_v36  ;;  %1979 = vmatpush1.bf16.msra.mxu1 %v4367_v37 }
  0xd5   :  { %1898 = vmatprep.subr.bf16.mxu0 %v4372_v38  ;;  %1980 = vmatprep.subr.bf16.mxu1 %v4375_v39 }
  0xd8   :  { %1899 = vmatpush1.bf16.msra.mxu0 %v4370_v40  ;;  %1981 = vmatpush1.bf16.msra.mxu1 %v4373_v41 }
  0xd9   :  { %1900 = vmatprep.subr.bf16.mxu0 %v4378_v42  ;;  %1982 = vmatprep.subr.bf16.mxu1 %v4381_v44 }
  0xdc   :  { %1901 = vmatpush1.bf16.msra.mxu0 %v4376_v45  ;;  %1983 = vmatpush1.bf16.msra.mxu1 %v4379_v46  ;;  %v4436_v45 = vld [vmem:[#allocation6 + $0x200] ss:$16 sps:$4 sm:$0xff]   ;;  %v4439_v46 = vld [vmem:[#allocation6 + $0x208] ss:$16 sps:$4 sm:$0xff]  }
  0xdd   :  { %1902 = vmatprep.subr.bf16.mxu0 %v4384_v47  ;;  %1984 = vmatprep.subr.bf16.mxu1 %v4387_v48  ;;  %v4444_v48 = vld [vmem:[#allocation6 + $0x224] ss:$16 sps:$4 sm:$0xff]  }
  0xe0   :  { %1903 = vmatpush1.bf16.msra.mxu0 %v4382_v50  ;;  %1985 = vmatpush1.bf16.msra.mxu1 %v4385_v51  ;;  %v4447_v50 = vld [vmem:[#allocation6 + $0x22c] ss:$16 sps:$4 sm:$0xff]  }
  0xe1   :  { %1904 = vmatprep.subr.bf16.mxu0 %v4390_v52  ;;  %1986 = vmatprep.subr.bf16.mxu1 %v4393_v53  ;;  %v4442_v52 = vld [vmem:[#allocation6 + $0x220] ss:$16 sps:$4 sm:$0xff]   ;;  %v4445_v53 = vld [vmem:[#allocation6 + $0x228] ss:$16 sps:$4 sm:$0xff]  }
  0xe4   :  { %1905 = vmatpush1.bf16.msra.mxu0 %v4388_v54  ;;  %1987 = vmatpush1.bf16.msra.mxu1 %v4391_v55  ;;  %v4450_v54 = vld [vmem:[#allocation6 + $0x244] ss:$16 sps:$4 sm:$0xff]   ;;  %v4453_v55 = vld [vmem:[#allocation6 + $0x24c] ss:$16 sps:$4 sm:$0xff]  }
  0xe5   :  { %1906 = vmatprep.subr.bf16.mxu0 %v4396_v56  ;;  %1988 = vmatprep.subr.bf16.mxu1 %v4399_v57  ;;  %v4448_v56 = vld [vmem:[#allocation6 + $0x240] ss:$16 sps:$4 sm:$0xff]   ;;  %v4451_v57 = vld [vmem:[#allocation6 + $0x248] ss:$16 sps:$4 sm:$0xff]  }
  0xe8   :  { %1907 = vmatpush1.bf16.msra.mxu0 %v4394_v58  ;;  %1989 = vmatpush1.bf16.msra.mxu1 %v4397_v59  ;;  %v4456_v58 = vld [vmem:[#allocation6 + $0x264] ss:$16 sps:$4 sm:$0xff]   ;;  %v4459_v59 = vld [vmem:[#allocation6 + $0x26c] ss:$16 sps:$4 sm:$0xff]  }
  0xe9   :  { %1908 = vmatprep.subr.bf16.mxu0 %v4402_v60  ;;  %1990 = vmatprep.subr.bf16.mxu1 %v4405_v61  ;;  %v4454_v60 = vld [vmem:[#allocation6 + $0x260] ss:$16 sps:$4 sm:$0xff]   ;;  %v4457_v61 = vld [vmem:[#allocation6 + $0x268] ss:$16 sps:$4 sm:$0xff]  }
  0xec   :  { %1909 = vmatpush1.bf16.msra.mxu0 %v4400_v62  ;;  %1991 = vmatpush1.bf16.msra.mxu1 %v4403_v63  ;;  %v4462_v62 = vld [vmem:[#allocation6 + $0x284] ss:$16 sps:$4 sm:$0xff]   ;;  %v4465_v63 = vld [vmem:[#allocation6 + $0x28c] ss:$16 sps:$4 sm:$0xff]  }
  0xed   :  { %1910 = vmatprep.subr.bf16.mxu0 %v4408_v0  ;;  %1992 = vmatprep.subr.bf16.mxu1 %v4411_v1  ;;  %v4460_v0 = vld [vmem:[#allocation6 + $0x280] ss:$16 sps:$4 sm:$0xff]   ;;  %v4463_v1 = vld [vmem:[#allocation6 + $0x288] ss:$16 sps:$4 sm:$0xff]  }
  0xf0   :  { %1911 = vmatpush1.bf16.msra.mxu0 %v4406_v2  ;;  %1993 = vmatpush1.bf16.msra.mxu1 %v4409_v3  ;;  %v4468_v2 = vld [vmem:[#allocation6 + $0x2a4] ss:$16 sps:$4 sm:$0xff]   ;;  %v4471_v3 = vld [vmem:[#allocation6 + $0x2ac] ss:$16 sps:$4 sm:$0xff]  }
  0xf1   :  { %1912 = vmatprep.subr.bf16.mxu0 %v4414_v4  ;;  %1994 = vmatprep.subr.bf16.mxu1 %v4417_v5  ;;  %v4466_v4 = vld [vmem:[#allocation6 + $0x2a0] ss:$16 sps:$4 sm:$0xff]   ;;  %v4469_v5 = vld [vmem:[#allocation6 + $0x2a8] ss:$16 sps:$4 sm:$0xff]  }
  0xf4   :  { %1913 = vmatpush1.bf16.msra.mxu0 %v4412_v6  ;;  %1995 = vmatpush1.bf16.msra.mxu1 %v4415_v7  ;;  %v4474_v6 = vld [vmem:[#allocation6 + $0x2c4] ss:$16 sps:$4 sm:$0xff]   ;;  %v4477_v7 = vld [vmem:[#allocation6 + $0x2cc] ss:$16 sps:$4 sm:$0xff]  }
  0xf5   :  { %1914 = vmatprep.subr.bf16.mxu0 %v4420_v8  ;;  %1996 = vmatprep.subr.bf16.mxu1 %v4423_v10  ;;  %v4472_v8 = vld [vmem:[#allocation6 + $0x2c0] ss:$16 sps:$4 sm:$0xff]   ;;  %v4475_v10 = vld [vmem:[#allocation6 + $0x2c8] ss:$16 sps:$4 sm:$0xff]  }
  0xf8   :  { %1915 = vmatpush1.bf16.msra.mxu0 %v4418_v11  ;;  %1997 = vmatpush1.bf16.msra.mxu1 %v4421_v12  ;;  %v4480_v11 = vld [vmem:[#allocation6 + $0x2e4] ss:$16 sps:$4 sm:$0xff]   ;;  %v4483_v12 = vld [vmem:[#allocation6 + $0x2ec] ss:$16 sps:$4 sm:$0xff]  }
  0xf9   :  { %1916 = vmatprep.subr.bf16.mxu0 %v4426_v13  ;;  %1998 = vmatprep.subr.bf16.mxu1 %v4429_v14  ;;  %v4478_v13 = vld [vmem:[#allocation6 + $0x2e0] ss:$16 sps:$4 sm:$0xff]   ;;  %v4481_v14 = vld [vmem:[#allocation6 + $0x2e8] ss:$16 sps:$4 sm:$0xff]  }
  0xfc   :  { %1917 = vmatpush1.bf16.msra.mxu0 %v4424_v15  ;;  %1999 = vmatpush1.bf16.msra.mxu1 %v4427_v16  ;;  %v4486_v15 = vld [vmem:[#allocation6 + $0x304] ss:$16 sps:$4 sm:$0xff]   ;;  %v4489_v16 = vld [vmem:[#allocation6 + $0x30c] ss:$16 sps:$4 sm:$0xff]  }
  0xfd   :  { %1918 = vmatprep.subr.bf16.mxu0 %v4432_v17  ;;  %2000 = vmatprep.subr.bf16.mxu1 %v4435_v18  ;;  %v4484_v17 = vld [vmem:[#allocation6 + $0x300] ss:$16 sps:$4 sm:$0xff]   ;;  %v4487_v18 = vld [vmem:[#allocation6 + $0x308] ss:$16 sps:$4 sm:$0xff]  }
 0x100   :  { %1919 = vmatpush1.bf16.msra.mxu0 %v4430_v19  ;;  %2001 = vmatpush1.bf16.msra.mxu1 %v4433_v20  ;;  %v4492_v19 = vld [vmem:[#allocation6 + $0x324] ss:$16 sps:$4 sm:$0xff]   ;;  %v4495_v20 = vld [vmem:[#allocation6 + $0x32c] ss:$16 sps:$4 sm:$0xff]  }
 0x101   :  { %1929 = vmatprep.subr.bf16.mxu0 %v4438_v21  ;;  %2011 = vmatprep.subr.bf16.mxu1 %v4441_v22  ;;  %v4490_v21 = vld [vmem:[#allocation6 + $0x320] ss:$16 sps:$4 sm:$0xff]   ;;  %v4493_v22 = vld [vmem:[#allocation6 + $0x328] ss:$16 sps:$4 sm:$0xff]  }
 0x196   :  { %v1001_v30 = vpop.f32.mrb[0].mxu0  ;;  %v4820_v31 = vpop.f32.mrb[0].mxu1 }
 0x197   :  { %v4079_v9 = vadd.f32 %v1001_v30, %v269_v27  ;;  %v1003_v32 = vpop.f32.mrb[1].mxu0  ;;  %v1085_v33 = vpop.f32.mrb[1].mxu1  ;;  %v4498_v27 = vld [vmem:[#allocation6 + $0x344] ss:$16 sps:$4 sm:$0xff]   ;;  %v4499_v30 = vld [vmem:[#allocation6 + $0x348] ss:$16 sps:$4 sm:$0xff]  }
 0x198   :  { %v4080_v34 = vadd.f32 %v1003_v32, %v273_v28  ;;  %v4082_v35 = vadd.f32 %v1085_v33, %v281_v29  ;;  %v1005_v36 = vpop.f32.mrb[2].mxu0  ;;  %v1087_v37 = vpop.f32.mrb[2].mxu1  ;;  %v4501_v28 = vld [vmem:[#allocation6 + $0x34c] ss:$16 sps:$4 sm:$0xff]   ;;  %v4496_v29 = vld [vmem:[#allocation6 + $0x340] ss:$16 sps:$4 sm:$0xff]  }
 0x199   :  { %v1090_v38 = vmax.f32 %v4079_v9, 0.0  ;;  %v1006_v39 = vpop.f32.mrb[3].mxu0  ;;  %v1088_v40 = vpop.f32.mrb[3].mxu1  ;;  %v4504_v9 = vld [vmem:[#allocation6 + $0x364] ss:$16 sps:$4 sm:$0xff]  }
 0x19a   :  { %v1091_v41 = vmax.f32 %v4080_v34, 0.0  ;;  %v1093_v42 = vmax.f32 %v4082_v35, 0.0  ;;  %v4507_v32 = vld [vmem:[#allocation6 + $0x36c] ss:$16 sps:$4 sm:$0xff]   ;;  %v4502_v33 = vld [vmem:[#allocation6 + $0x360] ss:$16 sps:$4 sm:$0xff]  }
 0x19b   :  { %v1094_v47 = vpack.c.bf16 %v1090_v38, %v1090_v38  ;;  %v4505_v34 = vld [vmem:[#allocation6 + $0x368] ss:$16 sps:$4 sm:$0xff]   ;;  %v4510_v35 = vld [vmem:[#allocation6 + $0x384] ss:$16 sps:$4 sm:$0xff]   ;;  %v4513_v36 = vld [vmem:[#allocation6 + $0x38c] ss:$16 sps:$4 sm:$0xff]  }
 0x19c   :  { %v1095_v44 = vpack.c.bf16 %v1091_v41, %v1091_v41  ;;  %v1097_v51 = vpack.c.bf16 %v1093_v42, %v1093_v42  ;;  %v4508_v37 = vld [vmem:[#allocation6 + $0x380] ss:$16 sps:$4 sm:$0xff]   ;;  %v4511_v38 = vld [vmem:[#allocation6 + $0x388] ss:$16 sps:$4 sm:$0xff]   ;;  %v4823_v39 = vsub.s32 2, %v4784_v43 }
 0x19d   :  { %v4516_v40 = vld [vmem:[#allocation6 + $0x3a4] ss:$16 sps:$4 sm:$0xff]   ;;  %v4519_v41 = vld [vmem:[#allocation6 + $0x3ac] ss:$16 sps:$4 sm:$0xff]   ;;  %v4514_v42 = vld [vmem:[#allocation6 + $0x3a0] ss:$16 sps:$4 sm:$0xff]  }
 0x19e   :  { %1920 = vmatprep.mubr.bf16.mxu0 %v1095_v44  ;;  %2002 = vmatprep.mubr.bf16.mxu1 %v1095_v44  ;;  %v4517_v44 = vld [vmem:[#allocation6 + $0x3a8] ss:$16 sps:$4 sm:$0xff]  }
 0x19f   :  { %1921 = vmatmul.mubr.bf16.vlgmr.msra.gmra.mrb[4].mxu0 %v1094_v47  ;;  %2003 = vmatmul.mubr.bf16.vlgmr.msra.gmra.mrb[4].mxu1 %v1094_v47  ;;  %v4525_v47 = vld [vmem:[#allocation6 + $0x3cc] ss:$16 sps:$4 sm:$0xff]  }
 0x1a0   :  { %1930 = vmatpush1.bf16.msra.mxu0 %v4436_v45  ;;  %2012 = vmatpush1.bf16.msra.mxu1 %v4439_v46  ;;  %v277_v45 = vrot.slane %v4806_v24, %v4823_v39  ;;  %v4522_v46 = vld [vmem:[#allocation6 + $0x3c4] ss:$16 sps:$4 sm:$0xff]  }
 0x1a1   :  { %1961 = vmatprep.mubr.bf16.mxu0 %v1097_v51  ;;  %2043 = vmatprep.mubr.bf16.mxu1 %v1097_v51  ;;  %v4532_v24 = vld [vmem:[#allocation8 + $0x40] sm:$0xff]  }
 0x1a2   :  { %1931 = vmatprep.subr.bf16.mxu0 %v4444_v48  ;;  %2013 = vmatprep.subr.bf16.mxu1 %v4447_v50  ;;  %v4520_v48 = vld [vmem:[#allocation6 + $0x3c0] ss:$16 sps:$4 sm:$0xff]   ;;  %v4523_v50 = vld [vmem:[#allocation6 + $0x3c8] ss:$16 sps:$4 sm:$0xff]   ;;  %v4081_v51 = vadd.f32 %v4820_v31, %v277_v45 }
 0x1a3   :  { %v4535_v31 = vld [vmem:[#allocation8 + $0x8] sm:$0xff]   ;;  %v4557_v45 = vld [vmem:[#allocation8 + $0xa0] sm:$0xff]  }
 0x1a4   :  { %1932 = vmatpush1.bf16.msra.mxu0 %v4442_v52  ;;  %2014 = vmatpush1.bf16.msra.mxu1 %v4445_v53  ;;  %v4528_v52 = vld [vmem:[#allocation6 + $0x3e4] ss:$16 sps:$4 sm:$0xff]   ;;  %v4531_v53 = vld [vmem:[#allocation6 + $0x3ec] ss:$16 sps:$4 sm:$0xff]  }
 0x1a5   :  { %1933 = vmatprep.subr.bf16.mxu0 %v4450_v54  ;;  %2015 = vmatprep.subr.bf16.mxu1 %v4453_v55  ;;  %v4526_v54 = vld [vmem:[#allocation6 + $0x3e0] ss:$16 sps:$4 sm:$0xff]   ;;  %v4529_v55 = vld [vmem:[#allocation6 + $0x3e8] ss:$16 sps:$4 sm:$0xff]  }
 0x1a8   :  { %1934 = vmatpush1.bf16.msra.mxu0 %v4448_v56  ;;  %2016 = vmatpush1.bf16.msra.mxu1 %v4451_v57  ;;  %v1092_v56 = vmax.f32 %v4081_v51, 0.0  ;;  %v4533_v57 = vld [vmem:[#allocation8] sm:$0xff]   ;;  %v4561_v51 = vld [vmem:[#allocation8 + $0xb0] sm:$0xff]  }
 0x1a9   :  { %1935 = vmatprep.subr.bf16.mxu0 %v4456_v58  ;;  %2017 = vmatprep.subr.bf16.mxu1 %v4459_v59  ;;  %v4534_v59 = vld [vmem:[#allocation8 + $0x48] sm:$0xff]  }
 0x1aa   :  { %v1096_v58 = vpack.c.bf16 %v1092_v56, %v1092_v56 }
 0x1ac   :  { %1936 = vmatpush1.bf16.msra.mxu0 %v4454_v60  ;;  %2018 = vmatpush1.bf16.msra.mxu1 %v4457_v61  ;;  %v4536_v60 = vld [vmem:[#allocation8 + $0x50] sm:$0xff]  }
 0x1ad   :  { %1937 = vmatprep.subr.bf16.mxu0 %v4462_v62  ;;  %2019 = vmatprep.subr.bf16.mxu1 %v4465_v63  ;;  %v4537_v61 = vld [vmem:[#allocation8 + $0x10] sm:$0xff]   ;;  %v4538_v62 = vld [vmem:[#allocation8 + $0x58] sm:$0xff]  }
 0x1ae   :  { %v4539_v63 = vld [vmem:[#allocation8 + $0x18] sm:$0xff]  }
 0x1b0   :  { %1938 = vmatpush1.bf16.msra.mxu0 %v4460_v0  ;;  %2020 = vmatpush1.bf16.msra.mxu1 %v4463_v1  ;;  %v4540_v0 = vld [vmem:[#allocation8 + $0x60] sm:$0xff]  }
 0x1b1   :  { %1939 = vmatprep.subr.bf16.mxu0 %v4468_v2  ;;  %2021 = vmatprep.subr.bf16.mxu1 %v4471_v3  ;;  %v4541_v1 = vld [vmem:[#allocation8 + $0x20] sm:$0xff]   ;;  %v4542_v2 = vld [vmem:[#allocation8 + $0x68] sm:$0xff]  }
 0x1b2   :  { %v4543_v3 = vld [vmem:[#allocation8 + $0x28] sm:$0xff]  }
 0x1b4   :  { %1940 = vmatpush1.bf16.msra.mxu0 %v4466_v4  ;;  %2022 = vmatpush1.bf16.msra.mxu1 %v4469_v5  ;;  %v4544_v4 = vld [vmem:[#allocation8 + $0x70] sm:$0xff]  }
 0x1b5   :  { %1941 = vmatprep.subr.bf16.mxu0 %v4474_v6  ;;  %2023 = vmatprep.subr.bf16.mxu1 %v4477_v7  ;;  %v4545_v5 = vld [vmem:[#allocation8 + $0x30] sm:$0xff]   ;;  %v4546_v6 = vld [vmem:[#allocation8 + $0x78] sm:$0xff]  }
 0x1b6   :  { %v4547_v7 = vld [vmem:[#allocation8 + $0x38] sm:$0xff]  }
 0x1b8   :  { %1942 = vmatpush1.bf16.msra.mxu0 %v4472_v8  ;;  %2024 = vmatpush1.bf16.msra.mxu1 %v4475_v10  ;;  %v4548_v8 = vld [vmem:[#allocation8 + $0xc0] sm:$0xff]  }
 0x1b9   :  { %1943 = vmatprep.subr.bf16.mxu0 %v4480_v11  ;;  %2025 = vmatprep.subr.bf16.mxu1 %v4483_v12  ;;  %v1226_v10 = vld [vmem:[%s4994_s4] sm:$0xf] }
 0x1ba   :  { %v1231_v11 = vrot.slane %v1226_v10, %v4801_v23  ;;  %v1235_v12 = vrot.slane %v1226_v10, %v4809_v25 }
 0x1bc   :  { %1944 = vmatpush1.bf16.msra.mxu0 %v4478_v13  ;;  %2026 = vmatpush1.bf16.msra.mxu1 %v4481_v14  ;;  %v1243_v13 = vrot.slane %v1226_v10, %v4812_v26 }
 0x1bd   :  { %1945 = vmatprep.subr.bf16.mxu0 %v4486_v15  ;;  %2027 = vmatprep.subr.bf16.mxu1 %v4489_v16 }
 0x1c0   :  { %1946 = vmatpush1.bf16.msra.mxu0 %v4484_v17  ;;  %2028 = vmatpush1.bf16.msra.mxu1 %v4487_v18 }
 0x1c1   :  { %1947 = vmatprep.subr.bf16.mxu0 %v4492_v19  ;;  %2029 = vmatprep.subr.bf16.mxu1 %v4495_v20 }
 0x1c4   :  { %1948 = vmatpush1.bf16.msra.mxu0 %v4490_v21  ;;  %2030 = vmatpush1.bf16.msra.mxu1 %v4493_v22 }
 0x1c5   :  { %1949 = vmatprep.subr.bf16.mxu0 %v4498_v27  ;;  %2031 = vmatprep.subr.bf16.mxu1 %v4501_v28 }
 0x1c8   :  { %1950 = vmatpush1.bf16.msra.mxu0 %v4496_v29  ;;  %2032 = vmatpush1.bf16.msra.mxu1 %v4499_v30 }
 0x1c9   :  { %1951 = vmatprep.subr.bf16.mxu0 %v4504_v9  ;;  %2033 = vmatprep.subr.bf16.mxu1 %v4507_v32 }
 0x1cc   :  { %1952 = vmatpush1.bf16.msra.mxu0 %v4502_v33  ;;  %2034 = vmatpush1.bf16.msra.mxu1 %v4505_v34  ;;  %v4549_v33 = vld [vmem:[#allocation8 + $0x80] sm:$0xff]  }
 0x1cd   :  { %1953 = vmatprep.subr.bf16.mxu0 %v4510_v35  ;;  %2035 = vmatprep.subr.bf16.mxu1 %v4513_v36  ;;  %v4550_v35 = vld [vmem:[#allocation8 + $0xc8] sm:$0xff]  }
 0x1d0   :  { %1954 = vmatpush1.bf16.msra.mxu0 %v4508_v37  ;;  %2036 = vmatpush1.bf16.msra.mxu1 %v4511_v38  ;;  %v4551_v37 = vld [vmem:[#allocation8 + $0x88] sm:$0xff]   ;;  %v4552_v38 = vld [vmem:[#allocation8 + $0xd0] sm:$0xff]  }
 0x1d1   :  { %1955 = vmatprep.subr.bf16.mxu0 %v4516_v40  ;;  %2037 = vmatprep.subr.bf16.mxu1 %v4519_v41  ;;  %v4553_v40 = vld [vmem:[#allocation8 + $0x90] sm:$0xff]   ;;  %v4554_v41 = vld [vmem:[#allocation8 + $0xd8] sm:$0xff]  }
 0x1d4   :  { %1956 = vmatpush1.bf16.msra.mxu0 %v4514_v42  ;;  %2038 = vmatpush1.bf16.msra.mxu1 %v4517_v44  ;;  %v4555_v42 = vld [vmem:[#allocation8 + $0x98] sm:$0xff]   ;;  %v4556_v44 = vld [vmem:[#allocation8 + $0xe0] sm:$0xff]  }
 0x1d5   :  { %1957 = vmatprep.subr.bf16.mxu0 %v4522_v46  ;;  %2039 = vmatprep.subr.bf16.mxu1 %v4525_v47  ;;  %v4558_v46 = vld [vmem:[#allocation8 + $0xe8] sm:$0xff]  }
 0x1d6   :  { %v4559_v47 = vld [vmem:[#allocation8 + $0xa8] sm:$0xff]  }
 0x1d8   :  { %1958 = vmatpush1.bf16.msra.mxu0 %v4520_v48  ;;  %2040 = vmatpush1.bf16.msra.mxu1 %v4523_v50  ;;  %v1239_v48 = vrot.slane %v1226_v10, %v4823_v39  ;;  %v4560_v50 = vld [vmem:[#allocation8 + $0xf0] sm:$0xff]  }
 0x1d9   :  { %1959 = vmatprep.subr.bf16.mxu0 %v4528_v52  ;;  %2041 = vmatprep.subr.bf16.mxu1 %v4531_v53  ;;  %v4562_v53 = vld [vmem:[#allocation8 + $0xf8] sm:$0xff]  }
 0x1dc   :  { %1960 = vmatpush1.bf16.msra.mxu0 %v4526_v54  ;;  %2042 = vmatpush1.bf16.msra.mxu1 %v4529_v55  ;;  %v4563_v54 = vld [vmem:[#allocation8 + $0xb8] sm:$0xff]  }
 0x1dd   :  { %4035 = vmatprep.subr.bf16.mxu1 %v4532_v24 }
 0x1df   :  { %1962 = vmatmul.mubr.bf16.vlgmr.msra.gmra.mrb[4].mxu0 %v1096_v58  ;;  %2044 = vmatmul.mubr.bf16.vlgmr.msra.gmra.mrb[4].mxu1 %v1096_v58 }
 0x1e0   :  { %4036 = vmatpush3.bf16.msra.mxu1 %v4533_v57 }
 0x1e1   :  { %4037 = vmatprep.subr.bf16.mxu1 %v4534_v59 }
 0x1e4   :  { %4038 = vmatpush3.bf16.msra.mxu1 %v4535_v31 }
 0x1e5   :  { %4039 = vmatprep.subr.bf16.mxu1 %v4536_v60  ;;  %v3980_v60 = vld [vmem:[%s4996_s6] ss:$0 sm:$0xff]  ;;  %s4666_s6 = smov 32  }
 0x1e8   :  { %4040 = vmatpush3.bf16.msra.mxu1 %v4537_v61 }
 0x1e9   :  { %4041 = vmatprep.subr.bf16.mxu1 %v4538_v62 }
 0x1ec   :  { %4042 = vmatpush3.bf16.msra.mxu1 %v4539_v63 }
 0x1ed   :  { %4043 = vmatprep.subr.bf16.mxu1 %v4540_v0 }
 0x1f0   :  { %4044 = vmatpush3.bf16.msra.mxu1 %v4541_v1 }
 0x1f1   :  { %4045 = vmatprep.subr.bf16.mxu1 %v4542_v2 }
 0x1f4   :  { %4046 = vmatpush3.bf16.msra.mxu1 %v4543_v3 }
 0x1f5   :  { %4047 = vmatprep.subr.bf16.mxu1 %v4544_v4 }
 0x1f8   :  { %4048 = vmatpush3.bf16.msra.mxu1 %v4545_v5 }
 0x1f9   :  { %4049 = vmatprep.subr.bf16.mxu1 %v4546_v6 }
 0x1fc   :  { %4050 = vmatpush3.bf16.msra.mxu1 %v4547_v7 }
 0x1fd   :  { %4057 = vmatprep.subr.bf16.mxu1 %v4548_v8 }
 0x2b2   :  { %v1963_v14 = vpop.f32.mrb[4].mxu0  ;;  %v2045_v15 = vpop.f32.mrb[4].mxu1 }
 0x2b3   :  { %v4083_v16 = vadd.f32 %v1963_v14, %v1231_v11  ;;  %v1965_v17 = vpop.f32.mrb[5].mxu0  ;;  %v2047_v18 = vpop.f32.mrb[5].mxu1  ;;  %v4085_v52 = vadd.f32 %v2045_v15, %v1239_v48 }
 0x2b4   :  { %v4084_v19 = vadd.f32 %v1965_v17, %v1235_v12  ;;  %v4086_v20 = vadd.f32 %v2047_v18, %v1243_v13  ;;  %v1967_v21 = vpop.f32.mrb[6].mxu0  ;;  %v2049_v22 = vpop.f32.mrb[6].mxu1 }
 0x2b5   :  { %v2052_v27 = vmax.f32 %v4083_v16, 0.0  ;;  %v1968_v28 = vpop.f32.mrb[7].mxu0  ;;  %v2050_v29 = vpop.f32.mrb[7].mxu1  ;;  %v2054_v55 = vmax.f32 %v4085_v52, 0.0 }
 0x2b6   :  { %v2053_v30 = vmax.f32 %v4084_v19, 0.0  ;;  %v2055_v9 = vmax.f32 %v4086_v20, 0.0 }
 0x2b7   :  { %v2056_v34 = vpack.c.bf16 %v2052_v27, %v2052_v27  ;;  %v2058_v56 = vpack.c.bf16 %v2054_v55, %v2054_v55 }
 0x2b8   :  { %v2057_v32 = vpack.c.bf16 %v2053_v30, %v2053_v30  ;;  %v2059_v36 = vpack.c.bf16 %v2055_v9, %v2055_v9  ;;  %v4662_v9 = vmov 683565275  }
 0x2ba   :  { %2355 = vmatprep.mubr.bf16.mxu1 %v2057_v32 }
 0x2bb   :  { %2356 = vmatmul.mubr.bf16.vlgmr.msra.gmra.mrb[8].mxu1 %v2056_v34 }
 0x2bc   :  { %4058 = vmatpush3.bf16.msra.mxu1 %v4549_v33  ;;  %2395 = vmatprep.mubr.bf16.mxu1 %v2059_v36  ;;  %v4663_v33 = vmov 2475754826   ;;  %v4664_v36 = vmov 2131351028  }
 0x2bd   :  { %4059 = vmatprep.subr.bf16.mxu1 %v4550_v35 }
 0x2c0   :  { %4060 = vmatpush3.bf16.msra.mxu1 %v4551_v37 }
 0x2c1   :  { %4061 = vmatprep.subr.bf16.mxu1 %v4552_v38 }
 0x2c4   :  { %4062 = vmatpush3.bf16.msra.mxu1 %v4553_v40  ;;  %v4665_v40 = vmov 2102212464  }
 0x2c5   :  { %4063 = vmatprep.subr.bf16.mxu1 %v4554_v41 }
 0x2c8   :  { %4064 = vmatpush3.bf16.msra.mxu1 %v4555_v42 }
 0x2c9   :  { %4065 = vmatprep.subr.bf16.mxu1 %v4556_v44  ;;  %v4667_v44 = vmov 920167782  }
 0x2cc   :  { %4066 = vmatpush3.bf16.msra.mxu1 %v4557_v45 }
 0x2cd   :  { %4067 = vmatprep.subr.bf16.mxu1 %v4558_v46 }
 0x2d0   :  { %4068 = vmatpush3.bf16.msra.mxu1 %v4559_v47  ;;  %v4668_v47 = vmov 1326507024  }
 0x2d1   :  { %4069 = vmatprep.subr.bf16.mxu1 %v4560_v50 }
 0x2d4   :  { %4070 = vmatpush3.bf16.msra.mxu1 %v4561_v51 }
 0x2d5   :  { %4071 = vmatprep.subr.bf16.mxu1 %v4562_v53 }
 0x2d8   :  { %4072 = vmatpush3.bf16.msra.mxu1 %v4563_v54 }
 0x2db   :  { %2396 = vmatmul.mubr.bf16.vlgmr.msra.gmra.mrb[12].mxu1 %v2058_v56 }
 0x38e   :  { %v4051_v24 = vpop.f32.mrb[8].mxu1 }
 0x38f   :  { %v4052_v57 = vpop.f32.mrb[9].mxu1 }
 0x390   :  { %v4053_v58 = vadd.f32 %v4052_v57, %v4051_v24  ;;  %v4054_v59 = vpop.f32.mrb[10].mxu1 }
 0x391   :  { %v4055_v31 = vpop.f32.mrb[11].mxu1 }
 0x392   :  { %v2358_v63 = vadd.f32 %v4053_v58, %v3980_v60 }
 0x3ae   :  { %v4073_v61 = vpop.f32.mrb[12].mxu1 }
 0x3af   :  { %v4074_v62 = vpop.f32.mrb[13].mxu1 }
 0x3b0   :  { %v4075_v0 = vadd.f32 %v4074_v62, %v4073_v61  ;;  %v4076_v1 = vpop.f32.mrb[14].mxu1 }
 0x3b1   :  { %v4077_v2 = vpop.f32.mrb[15].mxu1 }
 0x3b2   :  { %v4838_v3 = vadd.f32 %v4075_v0, %v2358_v63 }
 0x3b4   :  { %v2403_v4 = vmul.f32 %v4838_v3, %v4838_v3 }
 0x3b6   :  { %2405 = vrot.lane.b32.xlu0 %v2403_v4, %s4660_s1 }
 0x3ba   :  { %2409 = vrot.lane.b32.xlu0 %v2403_v4, %s4661_s25 }
 0x428   :  { %v2406_v5 = vpop.permute.xlu0 %2405 }
 0x429   :  { %v2408_v6 = vadd.f32 %v2406_v5, %v2403_v4 }
 0x42c   :  { %v2410_v7 = vpop.permute.xlu0 %2409 }
 0x42d   :  { %v2412_v8 = vadd.f32 %v2410_v7, %v2408_v6 }
 0x42f   :  { %v2413_v10 = vadd.f32 1e-12, %v2412_v8 }
 0x431   :  { %4564 = vrsqrt.f32 %v2413_v10  ;;  %vm2416_vm0 = vcmp.eq.f32.partialorder %v2413_v10, inf  ;;  %v2419_v13 = vand.u32 2147483648, %v2413_v10  ;;  %vm2418_vm1 = vcmp.eq.f32.partialorder %v2413_v10, 0.0 }
 0x43b   :  { %v4565_v11 = vpop.eup %4564 }
 0x43c   :  { %v2415_v12 = vmul.f32 %v4565_v11, %v2413_v10 }
 0x43e   :  { %v2417_v14 = vsel %vm2416_vm0, %v2413_v10, %v2415_v12 }
 0x43f   :  { %v4844_v15 = vsel %vm2418_vm1, %v2419_v13, %v2417_v14 }
 0x440   :  { %v2436_v16 = vand.u32 2139095040, %v4844_v15  ;;  %4566 = vrcp.f32 %v4844_v15  ;;  %v2433_v20 = vand.u32 2147483647, %v4844_v15  ;;  %vm2435_vm9 = vcmp.lt.s32.totalorder %v4844_v15, 0 }
 0x441   :  { %vm2525_vm14 = vweird.f32 %v4844_v15 }
 0x442   :  { %v2437_v17 = vshrl.u32 %v2436_v16, 23  ;;  %v2440_v28 = vand.u32 8388607, %v2433_v20  ;;  %vm2434_vm10 = vcmp.le.f32.partialorder %v2433_v20, 0.7853982 }
 0x444   :  { %v4013_v18 = vadd.s32 4294967169, %v2437_v17  ;;  %v2441_v50 = vor.u32 8388608, %v2440_v28 }
 0x446   :  { %v2443_v19 = vadd.s32 1, %v4013_v18  ;;  %v2481_v62 = vshll.u32 %v2441_v50, 8 }
 0x448   :  { %vm2444_vm2 = vcmp.gt.s32.totalorder %v2443_v19, 0 }
 0x449   :  { %v2445_v21 = vsel %vm2444_vm2, %v2443_v19, 0  ;;  %vm2708_vm2 = vcmask 130048  }
 0x44a   :  { %v4849_v22 = vpop.eup %4566  ;;  %v2447_v27 = vand.u32 31, %v2445_v21  ;;  %v2446_v30 = vshrl.u32 %v2445_v21, 5 }
 0x44b   :  { %2425 = vrot.lane.b32.xlu1 %v4849_v22, %s4647_s26  ;;  %s4669_s26 = smov 52  }
 0x44c   :  { %v2448_v29 = vsub.s32 32, %v2447_v27  ;;  %v2450_v32 = vshll.u32 %v4662_v9, %v2447_v27  ;;  %v2453_v34 = vshll.u32 %v4663_v33, %v2447_v27  ;;  %v2456_v38 = vshll.u32 %v4664_v36, %v2447_v27 }
 0x44d   :  { %v2459_v42 = vshll.u32 %v4665_v40, %v2447_v27  ;;  %v2462_v46 = vshll.u32 %v4667_v44, %v2447_v27  ;;  %vm2465_vm3 = vcmp.lt.s32.totalorder %v2446_v30, 1  ;;  %vm2468_vm4 = vcmp.lt.s32.totalorder %v2446_v30, 4 }
 0x44e   :  { %v2451_v35 = vshrl.u32 %v4663_v33, %v2448_v29  ;;  %v2454_v37 = vshrl.u32 %v4664_v36, %v2448_v29  ;;  %v2457_v41 = vshrl.u32 %v4665_v40, %v2448_v29  ;;  %v2460_v45 = vshrl.u32 %v4667_v44, %v2448_v29 }
 0x44f   :  { %2429 = vrot.lane.b32.xlu1 %v4849_v22, %s4666_s6  ;;  %v2463_v48 = vshrl.u32 %v4668_v47, %v2448_v29  ;;  %v2449_v58 = vshrl.u32 %v4662_v9, %v2448_v29  ;;  %vm2467_vm5 = vcmp.lt.s32.totalorder %v2446_v30, 3  ;;  %vm2466_vm6 = vcmp.lt.s32.totalorder %v2446_v30, 2 }
 0x450   :  { %v2452_v51 = vor.u32 %v2451_v35, %v2450_v32  ;;  %v2455_v52 = vor.u32 %v2454_v37, %v2453_v34  ;;  %v2458_v53 = vor.u32 %v2457_v41, %v2456_v38  ;;  %v2461_v54 = vor.u32 %v2460_v45, %v2459_v42 }
 0x451   :  { %v2464_v55 = vor.u32 %v2463_v48, %v2462_v46 }
 0x452   :  { %v2470_v56 = vsel %vm2468_vm4, %v2458_v53, 2102212464  ;;  %v2473_v24 = vsel %vm2465_vm3, %v2452_v51, %v2455_v52  ;;  %v2477_v57 = vsel %vm2465_vm3, %v2455_v52, %v2458_v53  ;;  %v2474_v59 = vsel %vm2468_vm4, %v2461_v54, 920167782 }
 0x453   :  { %v2478_v31 = vsel %vm2468_vm4, %v2464_v55, 1326507024  ;;  %v2475_v60 = vsel %vm2467_vm5, %v2458_v53, %v2474_v59  ;;  %v2469_v63 = vsel %vm2465_vm3, %v2449_v58, %v2452_v51  ;;  %v2471_v0 = vsel %vm2467_vm5, %v2455_v52, %v2470_v56 }
 0x454   :  { %v2479_v61 = vsel %vm2467_vm5, %v2461_v54, %v2478_v31  ;;  %v2476_v1 = vsel %vm2466_vm6, %v2473_v24, %v2475_v60  ;;  %v2472_v8 = vsel %vm2466_vm6, %v2469_v63, %v2471_v0  ;;  %v2423_v0 = vmul.f32 %v4849_v22, %v4838_v3 }
 0x455   :  { %v2480_v2 = vsel %vm2466_vm6, %v2477_v57, %v2479_v61  ;;  %v4859_v6 = vmul.u32.u64.low %v2481_v62, %v2476_v1  ;;  %v4860_v7 = vmul.u32.u64.high %v2481_v62, %v2476_v1, %v4859_v6  ;;  %v2488_v11 = vmul.u32 %v2481_v62, %v2472_v8 }
 0x456   :  { %v4856_v4 = vmul.u32.u64.low %v2481_v62, %v2480_v2  ;;  %v4857_v5 = vmul.u32.u64.high %v2481_v62, %v2480_v2, %v4856_v4  ;;  %vm2710_vm3 = vcmask 261120   ;;  %vm2712_vm4 = vcmask 392192  }
 0x457   :  { %v2491_v10 = vadd.s32 1, %v4860_v7  ;;  %vm2714_vm5 = vcmask 523264   ;;  %vm2716_vm6 = vcmask 654336  }
 0x458   :  { %vm2490_vm7 = vc.u32 %v4857_v5, %v4859_v6  ;;  %v2489_v30 = vadd.s32 %v4859_v6, %v4857_v5 }
 0x459   :  { %v2492_v12 = vsel %vm2490_vm7, %v2491_v10, %v4860_v7  ;;  %vm2718_vm7 = vcmask 785408  }
 0x45a   :  { %v2493_v13 = vadd.s32 %v2492_v12, %v2488_v11 }
 0x45c   :  { %v2494_v14 = vadd.s32 536870912, %v2493_v13 }
 0x45e   :  { %v2495_v16 = vshrl.u32 %v2494_v14, 30 }
 0x460   :  { %v2496_v17 = vshll.u32 %v2495_v16, 30  ;;  %v2519_v44 = vsub.s32 4, %v2495_v16 }
 0x462   :  { %v2497_v18 = vsub.s32 %v2493_v13, %v2496_v17  ;;  %v2520_v47 = vsel %vm2435_vm9, %v2519_v44, %v2495_v16 }
 0x463   :  { %v2522_v50 = vsel %vm2434_vm10, 0, %v2520_v47 }
 0x464   :  { %v2499_v19 = vsub.s32 0, %v2497_v18  ;;  %v2629_v51 = vadd.s32 3, %v2522_v50  ;;  %v2526_v59 = vand.u32 3, %v2522_v50 }
 0x466   :  { %v4014_v21 = vmin.u32 %v2499_v19, %v2497_v18  ;;  %v2630_v52 = vand.u32 3, %v2629_v51  ;;  %vm2528_vm15 = vcmp.eq.s32.totalorder %v2526_v59, 0  ;;  %vm2531_vm0 = vcmp.eq.s32.totalorder %v2526_v59, 2 }
 0x467   :  { %vm2527_vm1 = vcmp.lt.s32.totalorder %v2526_v59, 2 }
 0x468   :  { %v2501_v27 = vclz %v4014_v21  ;;  %vm2635_vm11 = vcmp.eq.s32.totalorder %v2630_v52, 2  ;;  %vm2632_vm12 = vcmp.eq.s32.totalorder %v2630_v52, 0  ;;  %vm2631_vm13 = vcmp.lt.s32.totalorder %v2630_v52, 2 }
 0x46a   :  { %v4015_v28 = vadd.s32 4294967294, %v2501_v27 }
 0x46c   :  { %vm4016_vm8 = vcmp.lt.s32.totalorder %v4015_v28, 0 }
 0x46d   :  { %v2504_v29 = vsel %vm4016_vm8, 0, %v4015_v28  ;;  %vm2720_vm8 = vcmask 916480  }
 0x46e   :  { %v2505_v9 = vsub.s32 32, %v2504_v29  ;;  %v2509_v32 = vsub.s32 4294967266, %v2504_v29  ;;  %v2506_v33 = vshll.u32 %v2497_v18, %v2504_v29 }
 0x470   :  { %v2507_v34 = vshrl.u32 %v2489_v30, %v2505_v9  ;;  %v2510_v35 = vadd.s32 127, %v2509_v32 }
 0x472   :  { %v2508_v36 = vor.u32 %v2507_v34, %v2506_v33  ;;  %v2511_v37 = vshll.u32 %v2510_v35, 23 }
 0x474   :  { %v2512_v38 = vor.u32 4788187, %v2511_v37  ;;  %v2515_v41 = vcvt.s32.f32 %v2508_v36 }
 0x476   :  { %v2513_v40 = vand.u32 2147483647, %v2512_v38 }
 0x478   :  { %v2516_v42 = vmul.f32 %v2515_v41, %v2513_v40 }
 0x47a   :  { %v2517_v45 = vxor.u32 2147483648, %v2516_v42 }
 0x47c   :  { %v2518_v46 = vsel %vm2435_vm9, %v2517_v45, %v2516_v42  ;;  %vm2727_vm9 = vcmask 621568  }
 0x47d   :  { %v2521_v48 = vsel %vm2434_vm10, %v4844_v15, %v2518_v46  ;;  %vm2732_vm10 = vcmask 752640  }
 0x47e   :  { %4568 = vcosq.f32 %v2521_v48 }
 0x47f   :  { %4570 = vsinq.f32 %v2521_v48 }
 0x488   :  { %v4569_v53 = vpop.eup %4568 }
 0x489   :  { %v4571_v54 = vpop.eup %4570  ;;  %v2532_v55 = vxor.u32 2147483648, %v4569_v53 }
 0x48a   :  { %v2529_v56 = vxor.u32 2147483648, %v4571_v54 }
 0x48b   :  { %v2637_v24 = vsel %vm2635_vm11, %v2532_v55, %v4571_v54  ;;  %v2533_v60 = vsel %vm2531_vm0, %v2532_v55, %v4571_v54  ;;  %vm2754_vm11 = vcmask 80896  }
 0x48c   :  { %v2634_v57 = vsel %vm2632_vm12, %v4569_v53, %v2529_v56  ;;  %v2530_v31 = vsel %vm2528_vm15, %v4569_v53, %v2529_v56  ;;  %vm2759_vm12 = vcmask 211968  }
 0x48d   :  { %v2638_v20 = vsel %vm2631_vm13, %v2634_v57, %v2637_v24  ;;  %v2534_v61 = vsel %vm2527_vm1, %v2530_v31, %v2533_v60 }
 0x48e   :  { %v2639_v58 = vsel %vm2525_vm14, nan, %v2638_v20  ;;  %v2535_v62 = vsel %vm2525_vm14, nan, %v2534_v61 }
 0x48f   :  { %v2640_v63 = vsub.f32 1.0, %v2535_v62  ;;  %v2664_v9 = vmul.f32 %v2639_v58, %v2423_v0 }
 0x491   :  { %v2641_v1 = vmul.f32 %v2640_v63, %v2423_v0 }
 0x493   :  { %v2642_v5 = vmul.f32 %v2641_v1, %v2423_v0 }
 0x495   :  { %v2643_v7 = vadd.f32 %v2642_v5, %v2535_v62 }
 0x4bd   :  { %v2426_v2 = vpop.permute.xlu1 %2425 }
 0x4be   :  { %v2428_v4 = vmul.f32 %v2426_v2, %v4838_v3 }
 0x4c0   :  { %2645 = vrot.lane.b32.xlu0 %v2428_v4, %s4660_s1 }
 0x4c1   :  { %v2430_v15 = vpop.permute.xlu1 %2429 }
 0x4c2   :  { %v2432_v6 = vmul.f32 %v2430_v15, %v4838_v3 }
 0x4c4   :  { %2650 = vrot.lane.b32.xlu1 %v2432_v6, %s4661_s25  ;;  %2674 = vrot.lane.b32.xlu0 %v2643_v7, %s4669_s26 }
 0x532   :  { %v2646_v8 = vpop.permute.xlu0 %2645 }
 0x533   :  { %v2658_v10 = vmul.f32 %v2646_v8, %v2640_v63  ;;  %v2648_v22 = vmul.f32 %v2646_v8, %v2641_v1  ;;  %v2656_v14 = vmul.f32 %v2646_v8, %v2639_v58 }
 0x535   :  { %v2661_v19 = vmul.f32 %v2658_v10, %v2646_v8  ;;  %v2659_v21 = vmul.f32 %v2658_v10, %v2423_v0 }
 0x536   :  { %v2651_v11 = vpop.permute.xlu1 %2650  ;;  %v2675_v38 = vpop.permute.xlu0 %2674 }
 0x537   :  { %v2653_v12 = vmul.f32 %v2651_v11, %v2639_v58  ;;  %v2655_v13 = vmul.f32 %v2651_v11, %v2641_v1  ;;  %v2666_v16 = vmul.f32 %v2651_v11, %v2640_v63  ;;  %v2662_v28 = vadd.f32 %v2661_v19, %v2535_v62 }
 0x538   :  { %v2663_v29 = vmul.f32 %v2658_v10, %v2651_v11 }
 0x539   :  { %v2654_v17 = vsub.f32 %v2648_v22, %v2653_v12  ;;  %v2657_v18 = vadd.f32 %v2656_v14, %v2655_v13  ;;  %v2660_v27 = vadd.f32 %v2659_v21, %v2653_v12  ;;  %v2667_v30 = vmul.f32 %v2666_v16, %v2423_v0 }
 0x53a   :  { %v2665_v32 = vsub.f32 %v2663_v29, %v2664_v9  ;;  %v2669_v34 = vmul.f32 %v2666_v16, %v2646_v8  ;;  %v2671_v35 = vmul.f32 %v2666_v16, %v2651_v11 }
 0x53b   :  { %2678 = vrot.lane.b32.xlu1 %v2654_v17, %s4670_s11  ;;  %2682 = vrot.lane.b32.xlu0 %v2657_v18, %s4671_s12  ;;  %v2668_v33 = vsub.f32 %v2667_v30, %v2656_v14 }
 0x53c   :  { %v2670_v36 = vadd.f32 %v2669_v34, %v2664_v9  ;;  %v2672_v37 = vadd.f32 %v2671_v35, %v2535_v62 }
 0x53f   :  { %2686 = vrot.lane.b32.xlu1 %v2660_v27, %s4672_s13  ;;  %2690 = vrot.lane.b32.xlu0 %v2662_v28, %s4673_s15 }
 0x543   :  { %2694 = vrot.lane.b32.xlu1 %v2665_v32, %s4650_s16  ;;  %2698 = vrot.lane.b32.xlu0 %v2668_v33, %s4674_s17  ;;  %s4676_s16 = smov 76  }
 0x547   :  { %2702 = vrot.lane.b32.xlu1 %v2670_v36, %s4675_s18  ;;  %2706 = vrot.lane.b32.xlu0 %v2672_v37, %s4669_s26 }
 0x5ad   :  { %v2679_v40 = vpop.permute.xlu1 %2678  ;;  %v2683_v41 = vpop.permute.xlu0 %2682 }
 0x5ae   :  { %v2709_v42 = vsel %vm2708_vm2, %v2675_v38, %v2679_v40 }
 0x5af   :  { %v2711_v44 = vsel %vm2710_vm3, %v2709_v42, %v2683_v41 }
 0x5b1   :  { %v2687_v45 = vpop.permute.xlu1 %2686  ;;  %v2691_v46 = vpop.permute.xlu0 %2690 }
 0x5b2   :  { %v2713_v47 = vsel %vm2712_vm4, %v2711_v44, %v2687_v45 }
 0x5b3   :  { %v2715_v48 = vsel %vm2714_vm5, %v2713_v47, %v2691_v46 }
 0x5b5   :  { %v2695_v50 = vpop.permute.xlu1 %2694  ;;  %v2699_v51 = vpop.permute.xlu0 %2698 }
 0x5b6   :  { %v2717_v52 = vsel %vm2716_vm6, %v2715_v48, %v2695_v50 }
 0x5b7   :  { %v2719_v53 = vsel %vm2718_vm7, %v2717_v52, %v2699_v51 }
 0x5b9   :  { %v2703_v54 = vpop.permute.xlu1 %2702  ;;  %v2707_v55 = vpop.permute.xlu0 %2706 }
 0x5ba   :  { %v2721_v56 = vsel %vm2720_vm8, %v2719_v53, %v2703_v54  ;;  %2725 = vrot.lane.b32.xlu0 %v2707_v55, %s4676_s16 }
 0x5bb   :  { %2723 = vrot.lane.b32.xlu1 %v2721_v56, %s4676_s16  ;;  %v4142_v24 = vpack.i.bf16 %v2707_v55, %v2721_v56 }
 0x5be   :  { %2747 = vrot.lane.b32.xlu0 %v4838_v3, %s4677_s3 }
 0x5bf   :  { %4143 = vrot.lane.b32.xlu1 %v4142_v24, %s4678_s14 }
 0x62c   :  { %v2726_v57 = vpop.permute.xlu0 %2725 }
 0x62d   :  { %v2724_v20 = vpop.permute.xlu1 %2723 }
 0x62e   :  { %v2728_v58 = vsel %vm2727_vm9, %v2724_v20, %v2726_v57  ;;  %v2731_v59 = vsel %vm2727_vm9, %v4838_v3, %v2724_v20 }
 0x62f   :  { %v2733_v31 = vsel %vm2732_vm10, %v2728_v58, 0.0 }
 0x630   :  { %v2736_v60 = vcombine.low %v2731_v59, %v2733_v31  ;;  %v2748_v0 = vpop.permute.xlu0 %2747 }
 0x631   :  { %v4144_v61 = vpop.permute.xlu1 %4143 }
 0x632   :  { %4021 = vst.sshfl [vmem:[%s4999_s9] sm:$0x33 pattern:$0x76325410] %v2736_v60  ;;  %v4146_v62 = vunpack.i.h.bf16 %v4144_v61  ;;  %v4145_v63 = vunpack.i.l.bf16 %v4144_v61 }
 0x634   :  { %v2755_v1 = vsel %vm2754_vm11, %v4145_v63, %v4146_v62  ;;  %v4886_v2 = vsel %vm2754_vm11, %v2748_v0, %v4145_v63 }
 0x635   :  { %v2760_v4 = vsel %vm2759_vm12, %v2755_v1, 0.0 }
 0x636   :  { %4642 = dma.done.wait [#allocation3], 28160 }
 0x637   :  { %4643 = vsyncadd [#allocation3], 4294939136  ;;  %v4888_v5 = vpack.c.bf16 %v2760_v4, %v2760_v4  ;;  %v2771_v3 = vld [vmem:[#allocation2 + $0x8] sm:$0xff]  ;;  %v2773_v15 = vld [vmem:[#allocation2 + $0x18] sm:$0xff]  ;;  %v4896_v56 = vpack.c.bf16 %v4886_v2, %v4886_v2 }
 0x638   :  { %v2770_v6 = vld [vmem:[#allocation2] sm:$0xff]  ;;  %2993 = vmatprep.subr.bf16.mxu0 %v2771_v3  ;;  %3034 = vmatprep.subr.bf16.mxu1 %v2773_v15  ;;  %v2772_v7 = vld [vmem:[#allocation2 + $0x10] sm:$0xff]  ;;  %v2793_v8 = vld [vmem:[#allocation2 + $0xb8] sm:$0xff] }
 0x639   :  { %4022 = vmatprep.mubr.msk.bf16.mxu0 %vm2710_vm3, %v4888_v5  ;;  %4023 = vmatprep.mubr.msk.bf16.mxu1 %vm2710_vm3, %v4888_v5  ;;  %v2795_v10 = vld [vmem:[#allocation2 + $0xc8] sm:$0xff]  ;;  %v2792_v11 = vld [vmem:[#allocation2 + $0xb0] sm:$0xff]  ;;  %v2794_v22 = vld [vmem:[#allocation2 + $0xc0] sm:$0xff] }
 0x63a   :  { %2994 = vmatpush1.bf16.msra.mxu0 %v2770_v6  ;;  %3035 = vmatpush1.bf16.msra.mxu1 %v2772_v7  ;;  %v2815_v12 = vld [vmem:[#allocation2 + $0x168] sm:$0xff]  ;;  %v2817_v13 = vld [vmem:[#allocation2 + $0x178] sm:$0xff]  ;;  %v2814_v14 = vld [vmem:[#allocation2 + $0x160] sm:$0xff] }
 0x63b   :  { %2995 = vmatprep.subr.bf16.mxu0 %v2793_v8  ;;  %3036 = vmatprep.subr.bf16.mxu1 %v2795_v10  ;;  %v2816_v16 = vld [vmem:[#allocation2 + $0x170] sm:$0xff]  ;;  %v2837_v17 = vld [vmem:[#allocation2 + $0x218] sm:$0xff]  ;;  %v2839_v18 = vld [vmem:[#allocation2 + $0x228] sm:$0xff] }
 0x63c   :  { %v2836_v19 = vld [vmem:[#allocation2 + $0x210] sm:$0xff]  ;;  %v2838_v21 = vld [vmem:[#allocation2 + $0x220] sm:$0xff]  ;;  %v2859_v27 = vld [vmem:[#allocation2 + $0x2c8] sm:$0xff] }
 0x63d   :  { %v2861_v28 = vld [vmem:[#allocation2 + $0x2d8] sm:$0xff]  ;;  %v2858_v29 = vld [vmem:[#allocation2 + $0x2c0] sm:$0xff]  ;;  %v2860_v30 = vld [vmem:[#allocation2 + $0x2d0] sm:$0xff] }
 0x63e   :  { %2996 = vmatpush1.bf16.msra.mxu0 %v2792_v11  ;;  %3037 = vmatpush1.bf16.msra.mxu1 %v2794_v22  ;;  %v2881_v9 = vld [vmem:[#allocation2 + $0x378] sm:$0xff]  ;;  %v2883_v32 = vld [vmem:[#allocation2 + $0x388] sm:$0xff]  ;;  %v2880_v33 = vld [vmem:[#allocation2 + $0x370] sm:$0xff] }
 0x63f   :  { %2997 = vmatprep.subr.bf16.mxu0 %v2815_v12  ;;  %3038 = vmatprep.subr.bf16.mxu1 %v2817_v13  ;;  %v2882_v34 = vld [vmem:[#allocation2 + $0x380] sm:$0xff]  ;;  %v2903_v35 = vld [vmem:[#allocation2 + $0x428] sm:$0xff]  ;;  %v2905_v36 = vld [vmem:[#allocation2 + $0x438] sm:$0xff] }
 0x640   :  { %v2902_v37 = vld [vmem:[#allocation2 + $0x420] sm:$0xff]  ;;  %v2904_v38 = vld [vmem:[#allocation2 + $0x430] sm:$0xff]  ;;  %v2925_v40 = vld [vmem:[#allocation2 + $0x4d8] sm:$0xff] }
 0x641   :  { %v2927_v41 = vld [vmem:[#allocation2 + $0x4e8] sm:$0xff]  ;;  %v2924_v42 = vld [vmem:[#allocation2 + $0x4d0] sm:$0xff]  ;;  %v2926_v44 = vld [vmem:[#allocation2 + $0x4e0] sm:$0xff] }
 0x642   :  { %2998 = vmatpush1.bf16.msra.mxu0 %v2814_v14  ;;  %3039 = vmatpush1.bf16.msra.mxu1 %v2816_v16  ;;  %v2947_v45 = vld [vmem:[#allocation2 + $0x588] sm:$0xff]  ;;  %v2949_v46 = vld [vmem:[#allocation2 + $0x598] sm:$0xff]  ;;  %v2946_v47 = vld [vmem:[#allocation2 + $0x580] sm:$0xff] }
 0x643   :  { %2999 = vmatprep.subr.bf16.mxu0 %v2837_v17  ;;  %3040 = vmatprep.subr.bf16.mxu1 %v2839_v18  ;;  %v2948_v48 = vld [vmem:[#allocation2 + $0x590] sm:$0xff]  ;;  %v2969_v50 = vld [vmem:[#allocation2 + $0x638] sm:$0xff]  ;;  %v2971_v51 = vld [vmem:[#allocation2 + $0x648] sm:$0xff] }
 0x644   :  { %v2968_v52 = vld [vmem:[#allocation2 + $0x630] sm:$0xff]  ;;  %v2970_v53 = vld [vmem:[#allocation2 + $0x640] sm:$0xff]  ;;  %v2775_v54 = vld [vmem:[#allocation2 + $0x28] sm:$0xff] }
 0x645   :  { %v2777_v55 = vld [vmem:[#allocation2 + $0x38] sm:$0xff]  ;;  %v2774_v24 = vld [vmem:[#allocation2 + $0x20] sm:$0xff]  ;;  %v2776_v57 = vld [vmem:[#allocation2 + $0x30] sm:$0xff] }
 0x646   :  { %3000 = vmatpush1.bf16.msra.mxu0 %v2836_v19  ;;  %3041 = vmatpush1.bf16.msra.mxu1 %v2838_v21  ;;  %v2797_v20 = vld [vmem:[#allocation2 + $0xd8] sm:$0xff]  ;;  %v2799_v58 = vld [vmem:[#allocation2 + $0xe8] sm:$0xff]  ;;  %v2796_v59 = vld [vmem:[#allocation2 + $0xd0] sm:$0xff] }
 0x647   :  { %3001 = vmatprep.subr.bf16.mxu0 %v2859_v27  ;;  %3042 = vmatprep.subr.bf16.mxu1 %v2861_v28  ;;  %v2798_v31 = vld [vmem:[#allocation2 + $0xe0] sm:$0xff]  ;;  %v2819_v60 = vld [vmem:[#allocation2 + $0x188] sm:$0xff]  ;;  %v2821_v61 = vld [vmem:[#allocation2 + $0x198] sm:$0xff] }
 0x648   :  { %v2818_v62 = vld [vmem:[#allocation2 + $0x180] sm:$0xff]  ;;  %v2820_v63 = vld [vmem:[#allocation2 + $0x190] sm:$0xff]  ;;  %v2841_v0 = vld [vmem:[#allocation2 + $0x238] sm:$0xff] }
 0x649   :  { %v2843_v1 = vld [vmem:[#allocation2 + $0x248] sm:$0xff]  ;;  %v2840_v2 = vld [vmem:[#allocation2 + $0x230] sm:$0xff]  ;;  %v2842_v4 = vld [vmem:[#allocation2 + $0x240] sm:$0xff] }
 0x64a   :  { %3002 = vmatpush1.bf16.msra.mxu0 %v2858_v29  ;;  %3043 = vmatpush1.bf16.msra.mxu1 %v2860_v30  ;;  %v2863_v3 = vld [vmem:[#allocation2 + $0x2e8] sm:$0xff]  ;;  %v2865_v15 = vld [vmem:[#allocation2 + $0x2f8] sm:$0xff]  ;;  %v2862_v6 = vld [vmem:[#allocation2 + $0x2e0] sm:$0xff] }
 0x64b   :  { %3003 = vmatprep.subr.bf16.mxu0 %v2881_v9  ;;  %3044 = vmatprep.subr.bf16.mxu1 %v2883_v32  ;;  %v2864_v7 = vld [vmem:[#allocation2 + $0x2f0] sm:$0xff]  ;;  %v2885_v8 = vld [vmem:[#allocation2 + $0x398] sm:$0xff]  ;;  %v2887_v10 = vld [vmem:[#allocation2 + $0x3a8] sm:$0xff] }
 0x64c   :  { %v2884_v11 = vld [vmem:[#allocation2 + $0x390] sm:$0xff]  ;;  %v2886_v22 = vld [vmem:[#allocation2 + $0x3a0] sm:$0xff]  ;;  %v2907_v12 = vld [vmem:[#allocation2 + $0x448] sm:$0xff] }
 0x64d   :  { %v2909_v13 = vld [vmem:[#allocation2 + $0x458] sm:$0xff]  ;;  %v2906_v14 = vld [vmem:[#allocation2 + $0x440] sm:$0xff]  ;;  %v2908_v16 = vld [vmem:[#allocation2 + $0x450] sm:$0xff] }
 0x64e   :  { %3004 = vmatpush1.bf16.msra.mxu0 %v2880_v33  ;;  %3045 = vmatpush1.bf16.msra.mxu1 %v2882_v34  ;;  %v2929_v17 = vld [vmem:[#allocation2 + $0x4f8] sm:$0xff]  ;;  %v2931_v18 = vld [vmem:[#allocation2 + $0x508] sm:$0xff]  ;;  %v2928_v19 = vld [vmem:[#allocation2 + $0x4f0] sm:$0xff] }
 0x64f   :  { %3005 = vmatprep.subr.bf16.mxu0 %v2903_v35  ;;  %3046 = vmatprep.subr.bf16.mxu1 %v2905_v36  ;;  %v2930_v21 = vld [vmem:[#allocation2 + $0x500] sm:$0xff]  ;;  %v2951_v27 = vld [vmem:[#allocation2 + $0x5a8] sm:$0xff]  ;;  %v2953_v28 = vld [vmem:[#allocation2 + $0x5b8] sm:$0xff] }
 0x650   :  { %v2950_v29 = vld [vmem:[#allocation2 + $0x5a0] sm:$0xff]  ;;  %v2952_v30 = vld [vmem:[#allocation2 + $0x5b0] sm:$0xff]  ;;  %v2973_v9 = vld [vmem:[#allocation2 + $0x658] sm:$0xff] }
 0x651   :  { %v2975_v32 = vld [vmem:[#allocation2 + $0x668] sm:$0xff]  ;;  %v2972_v33 = vld [vmem:[#allocation2 + $0x650] sm:$0xff]  ;;  %v2974_v34 = vld [vmem:[#allocation2 + $0x660] sm:$0xff] }
 0x652   :  { %3006 = vmatpush1.bf16.msra.mxu0 %v2902_v37  ;;  %3047 = vmatpush1.bf16.msra.mxu1 %v2904_v38  ;;  %v2779_v35 = vld [vmem:[#allocation2 + $0x48] sm:$0xff]  ;;  %v2781_v36 = vld [vmem:[#allocation2 + $0x58] sm:$0xff]  ;;  %v2778_v37 = vld [vmem:[#allocation2 + $0x40] sm:$0xff] }
 0x653   :  { %3007 = vmatprep.subr.bf16.mxu0 %v2925_v40  ;;  %3048 = vmatprep.subr.bf16.mxu1 %v2927_v41  ;;  %v2780_v38 = vld [vmem:[#allocation2 + $0x50] sm:$0xff]  ;;  %v2801_v40 = vld [vmem:[#allocation2 + $0xf8] sm:$0xff]  ;;  %v2803_v41 = vld [vmem:[#allocation2 + $0x108] sm:$0xff] }
 0x656   :  { %3008 = vmatpush1.bf16.msra.mxu0 %v2924_v42  ;;  %3049 = vmatpush1.bf16.msra.mxu1 %v2926_v44  ;;  %v2800_v42 = vld [vmem:[#allocation2 + $0xf0] sm:$0xff]  ;;  %v2802_v44 = vld [vmem:[#allocation2 + $0x100] sm:$0xff] }
 0x657   :  { %3009 = vmatprep.subr.bf16.mxu0 %v2947_v45  ;;  %3050 = vmatprep.subr.bf16.mxu1 %v2949_v46  ;;  %v2823_v45 = vld [vmem:[#allocation2 + $0x1a8] sm:$0xff]  ;;  %v2825_v46 = vld [vmem:[#allocation2 + $0x1b8] sm:$0xff] }
 0x65a   :  { %3010 = vmatpush1.bf16.msra.mxu0 %v2946_v47  ;;  %3051 = vmatpush1.bf16.msra.mxu1 %v2948_v48  ;;  %v2822_v47 = vld [vmem:[#allocation2 + $0x1a0] sm:$0xff]  ;;  %v2824_v48 = vld [vmem:[#allocation2 + $0x1b0] sm:$0xff] }
 0x65b   :  { %3011 = vmatprep.subr.bf16.mxu0 %v2969_v50  ;;  %3052 = vmatprep.subr.bf16.mxu1 %v2971_v51  ;;  %v2845_v50 = vld [vmem:[#allocation2 + $0x258] sm:$0xff]  ;;  %v2847_v51 = vld [vmem:[#allocation2 + $0x268] sm:$0xff] }
 0x65e   :  { %3012 = vmatpush1.bf16.msra.mxu0 %v2968_v52  ;;  %3053 = vmatpush1.bf16.msra.mxu1 %v2970_v53  ;;  %v2844_v52 = vld [vmem:[#allocation2 + $0x250] sm:$0xff]  ;;  %v2846_v53 = vld [vmem:[#allocation2 + $0x260] sm:$0xff] }
 0x65f   :  { %3075 = vmatprep.subr.bf16.mxu0 %v2775_v54  ;;  %3116 = vmatprep.subr.bf16.mxu1 %v2777_v55  ;;  %v2867_v54 = vld [vmem:[#allocation2 + $0x308] sm:$0xff]  ;;  %v2869_v55 = vld [vmem:[#allocation2 + $0x318] sm:$0xff] }
 0x661   :  { %3026 = vmatmul.mubr.bf16.vlgmr.msra.gmra.mrb[8].mxu0 %v4896_v56  ;;  %3067 = vmatmul.mubr.bf16.vlgmr.msra.gmra.mrb[16].mxu1 %v4896_v56 }
 0x662   :  { %3076 = vmatpush1.bf16.msra.mxu0 %v2774_v24  ;;  %3117 = vmatpush1.bf16.msra.mxu1 %v2776_v57  ;;  %v2866_v24 = vld [vmem:[#allocation2 + $0x300] sm:$0xff]  ;;  %v2868_v57 = vld [vmem:[#allocation2 + $0x310] sm:$0xff] }
 0x663   :  { %3077 = vmatprep.subr.bf16.mxu0 %v2797_v20  ;;  %3118 = vmatprep.subr.bf16.mxu1 %v2799_v58  ;;  %v2889_v20 = vld [vmem:[#allocation2 + $0x3b8] sm:$0xff]  ;;  %v2891_v58 = vld [vmem:[#allocation2 + $0x3c8] sm:$0xff] }
 0x664   :  { %4024 = vmatprep.mubr.msk.bf16.mxu0 %vm2710_vm3, %v4888_v5  ;;  %4025 = vmatprep.mubr.msk.bf16.mxu1 %vm2710_vm3, %v4888_v5 }
 0x666   :  { %3078 = vmatpush1.bf16.msra.mxu0 %v2796_v59  ;;  %3119 = vmatpush1.bf16.msra.mxu1 %v2798_v31  ;;  %v2888_v59 = vld [vmem:[#allocation2 + $0x3b0] sm:$0xff]  ;;  %v2890_v31 = vld [vmem:[#allocation2 + $0x3c0] sm:$0xff] }
 0x667   :  { %3079 = vmatprep.subr.bf16.mxu0 %v2819_v60  ;;  %3120 = vmatprep.subr.bf16.mxu1 %v2821_v61  ;;  %v2911_v60 = vld [vmem:[#allocation2 + $0x468] sm:$0xff]  ;;  %v2913_v61 = vld [vmem:[#allocation2 + $0x478] sm:$0xff] }
 0x66a   :  { %3080 = vmatpush1.bf16.msra.mxu0 %v2818_v62  ;;  %3121 = vmatpush1.bf16.msra.mxu1 %v2820_v63  ;;  %v2910_v62 = vld [vmem:[#allocation2 + $0x460] sm:$0xff]  ;;  %v2912_v63 = vld [vmem:[#allocation2 + $0x470] sm:$0xff] }
 0x66b   :  { %3081 = vmatprep.subr.bf16.mxu0 %v2841_v0  ;;  %3122 = vmatprep.subr.bf16.mxu1 %v2843_v1  ;;  %v2933_v0 = vld [vmem:[#allocation2 + $0x518] sm:$0xff]  ;;  %v2935_v1 = vld [vmem:[#allocation2 + $0x528] sm:$0xff] }
 0x66e   :  { %3082 = vmatpush1.bf16.msra.mxu0 %v2840_v2  ;;  %3123 = vmatpush1.bf16.msra.mxu1 %v2842_v4  ;;  %v2932_v2 = vld [vmem:[#allocation2 + $0x510] sm:$0xff]  ;;  %v2934_v4 = vld [vmem:[#allocation2 + $0x520] sm:$0xff] }
 0x66f   :  { %3083 = vmatprep.subr.bf16.mxu0 %v2863_v3  ;;  %3124 = vmatprep.subr.bf16.mxu1 %v2865_v15  ;;  %v2955_v3 = vld [vmem:[#allocation2 + $0x5c8] sm:$0xff]  ;;  %v2957_v15 = vld [vmem:[#allocation2 + $0x5d8] sm:$0xff] }
 0x672   :  { %3084 = vmatpush1.bf16.msra.mxu0 %v2862_v6  ;;  %3125 = vmatpush1.bf16.msra.mxu1 %v2864_v7  ;;  %v2954_v6 = vld [vmem:[#allocation2 + $0x5c0] sm:$0xff]  ;;  %v2956_v7 = vld [vmem:[#allocation2 + $0x5d0] sm:$0xff] }
 0x673   :  { %3085 = vmatprep.subr.bf16.mxu0 %v2885_v8  ;;  %3126 = vmatprep.subr.bf16.mxu1 %v2887_v10  ;;  %v2977_v8 = vld [vmem:[#allocation2 + $0x678] sm:$0xff]  ;;  %v2979_v10 = vld [vmem:[#allocation2 + $0x688] sm:$0xff] }
 0x676   :  { %3086 = vmatpush1.bf16.msra.mxu0 %v2884_v11  ;;  %3127 = vmatpush1.bf16.msra.mxu1 %v2886_v22  ;;  %v2976_v11 = vld [vmem:[#allocation2 + $0x670] sm:$0xff]  ;;  %v2978_v22 = vld [vmem:[#allocation2 + $0x680] sm:$0xff] }
 0x677   :  { %3087 = vmatprep.subr.bf16.mxu0 %v2907_v12  ;;  %3128 = vmatprep.subr.bf16.mxu1 %v2909_v13  ;;  %v2783_v12 = vld [vmem:[#allocation2 + $0x68] sm:$0xff]  ;;  %v2785_v13 = vld [vmem:[#allocation2 + $0x78] sm:$0xff] }
 0x67a   :  { %3088 = vmatpush1.bf16.msra.mxu0 %v2906_v14  ;;  %3129 = vmatpush1.bf16.msra.mxu1 %v2908_v16  ;;  %v2782_v14 = vld [vmem:[#allocation2 + $0x60] sm:$0xff]  ;;  %v2784_v16 = vld [vmem:[#allocation2 + $0x70] sm:$0xff] }
 0x67b   :  { %3089 = vmatprep.subr.bf16.mxu0 %v2929_v17  ;;  %3130 = vmatprep.subr.bf16.mxu1 %v2931_v18  ;;  %v2805_v17 = vld [vmem:[#allocation2 + $0x118] sm:$0xff]  ;;  %v2807_v18 = vld [vmem:[#allocation2 + $0x128] sm:$0xff] }
 0x67e   :  { %3090 = vmatpush1.bf16.msra.mxu0 %v2928_v19  ;;  %3131 = vmatpush1.bf16.msra.mxu1 %v2930_v21  ;;  %v2804_v19 = vld [vmem:[#allocation2 + $0x110] sm:$0xff]  ;;  %v2806_v21 = vld [vmem:[#allocation2 + $0x120] sm:$0xff] }
 0x67f   :  { %3091 = vmatprep.subr.bf16.mxu0 %v2951_v27  ;;  %3132 = vmatprep.subr.bf16.mxu1 %v2953_v28  ;;  %v2827_v27 = vld [vmem:[#allocation2 + $0x1c8] sm:$0xff]  ;;  %v2829_v28 = vld [vmem:[#allocation2 + $0x1d8] sm:$0xff] }
 0x682   :  { %3092 = vmatpush1.bf16.msra.mxu0 %v2950_v29  ;;  %3133 = vmatpush1.bf16.msra.mxu1 %v2952_v30  ;;  %v2826_v29 = vld [vmem:[#allocation2 + $0x1c0] sm:$0xff]  ;;  %v2828_v30 = vld [vmem:[#allocation2 + $0x1d0] sm:$0xff] }
 0x683   :  { %3093 = vmatprep.subr.bf16.mxu0 %v2973_v9  ;;  %3134 = vmatprep.subr.bf16.mxu1 %v2975_v32  ;;  %v2849_v9 = vld [vmem:[#allocation2 + $0x278] sm:$0xff]  ;;  %v2851_v32 = vld [vmem:[#allocation2 + $0x288] sm:$0xff] }
 0x686   :  { %3094 = vmatpush1.bf16.msra.mxu0 %v2972_v33  ;;  %3135 = vmatpush1.bf16.msra.mxu1 %v2974_v34  ;;  %v2848_v33 = vld [vmem:[#allocation2 + $0x270] sm:$0xff]  ;;  %v2850_v34 = vld [vmem:[#allocation2 + $0x280] sm:$0xff] }
 0x687   :  { %3157 = vmatprep.subr.bf16.mxu0 %v2779_v35  ;;  %3198 = vmatprep.subr.bf16.mxu1 %v2781_v36  ;;  %v2871_v35 = vld [vmem:[#allocation2 + $0x328] sm:$0xff]  ;;  %v2873_v36 = vld [vmem:[#allocation2 + $0x338] sm:$0xff] }
 0x689   :  { %3108 = vmatmul.mubr.bf16.vlgmr.msra.gmra.mrb[12].mxu0 %v4896_v56  ;;  %3149 = vmatmul.mubr.bf16.vlgmr.msra.gmra.mrb[20].mxu1 %v4896_v56 }
 0x68a   :  { %3158 = vmatpush1.bf16.msra.mxu0 %v2778_v37  ;;  %3199 = vmatpush1.bf16.msra.mxu1 %v2780_v38  ;;  %v2870_v37 = vld [vmem:[#allocation2 + $0x320] sm:$0xff]  ;;  %v2872_v38 = vld [vmem:[#allocation2 + $0x330] sm:$0xff] }
 0x68b   :  { %3159 = vmatprep.subr.bf16.mxu0 %v2801_v40  ;;  %3200 = vmatprep.subr.bf16.mxu1 %v2803_v41  ;;  %v2893_v40 = vld [vmem:[#allocation2 + $0x3d8] sm:$0xff]  ;;  %v2895_v41 = vld [vmem:[#allocation2 + $0x3e8] sm:$0xff] }
 0x68c   :  { %4026 = vmatprep.mubr.msk.bf16.mxu0 %vm2710_vm3, %v4888_v5  ;;  %4027 = vmatprep.mubr.msk.bf16.mxu1 %vm2710_vm3, %v4888_v5 }
 0x68e   :  { %3160 = vmatpush1.bf16.msra.mxu0 %v2800_v42  ;;  %3201 = vmatpush1.bf16.msra.mxu1 %v2802_v44  ;;  %v2892_v42 = vld [vmem:[#allocation2 + $0x3d0] sm:$0xff]  ;;  %v2894_v44 = vld [vmem:[#allocation2 + $0x3e0] sm:$0xff] }
 0x68f   :  { %3161 = vmatprep.subr.bf16.mxu0 %v2823_v45  ;;  %3202 = vmatprep.subr.bf16.mxu1 %v2825_v46  ;;  %v2915_v45 = vld [vmem:[#allocation2 + $0x488] sm:$0xff]  ;;  %v2917_v46 = vld [vmem:[#allocation2 + $0x498] sm:$0xff] }
 0x692   :  { %3162 = vmatpush1.bf16.msra.mxu0 %v2822_v47  ;;  %3203 = vmatpush1.bf16.msra.mxu1 %v2824_v48  ;;  %v2914_v47 = vld [vmem:[#allocation2 + $0x480] sm:$0xff]  ;;  %v2916_v48 = vld [vmem:[#allocation2 + $0x490] sm:$0xff] }
 0x693   :  { %3163 = vmatprep.subr.bf16.mxu0 %v2845_v50  ;;  %3204 = vmatprep.subr.bf16.mxu1 %v2847_v51  ;;  %v2937_v50 = vld [vmem:[#allocation2 + $0x538] sm:$0xff]  ;;  %v2939_v51 = vld [vmem:[#allocation2 + $0x548] sm:$0xff] }
 0x696   :  { %3164 = vmatpush1.bf16.msra.mxu0 %v2844_v52  ;;  %3205 = vmatpush1.bf16.msra.mxu1 %v2846_v53  ;;  %v2936_v52 = vld [vmem:[#allocation2 + $0x530] sm:$0xff]  ;;  %v2938_v53 = vld [vmem:[#allocation2 + $0x540] sm:$0xff] }
 0x697   :  { %3165 = vmatprep.subr.bf16.mxu0 %v2867_v54  ;;  %3206 = vmatprep.subr.bf16.mxu1 %v2869_v55  ;;  %v2959_v54 = vld [vmem:[#allocation2 + $0x5e8] sm:$0xff]  ;;  %v2961_v55 = vld [vmem:[#allocation2 + $0x5f8] sm:$0xff] }
 0x69a   :  { %3166 = vmatpush1.bf16.msra.mxu0 %v2866_v24  ;;  %3207 = vmatpush1.bf16.msra.mxu1 %v2868_v57  ;;  %v2958_v24 = vld [vmem:[#allocation2 + $0x5e0] sm:$0xff]  ;;  %v2960_v57 = vld [vmem:[#allocation2 + $0x5f0] sm:$0xff] }
 0x69b   :  { %3167 = vmatprep.subr.bf16.mxu0 %v2889_v20  ;;  %3208 = vmatprep.subr.bf16.mxu1 %v2891_v58  ;;  %v2981_v20 = vld [vmem:[#allocation2 + $0x698] sm:$0xff]  ;;  %v2983_v58 = vld [vmem:[#allocation2 + $0x6a8] sm:$0xff] }
 0x69e   :  { %3168 = vmatpush1.bf16.msra.mxu0 %v2888_v59  ;;  %3209 = vmatpush1.bf16.msra.mxu1 %v2890_v31  ;;  %v2980_v59 = vld [vmem:[#allocation2 + $0x690] sm:$0xff]  ;;  %v2982_v31 = vld [vmem:[#allocation2 + $0x6a0] sm:$0xff] }
 0x69f   :  { %3169 = vmatprep.subr.bf16.mxu0 %v2911_v60  ;;  %3210 = vmatprep.subr.bf16.mxu1 %v2913_v61  ;;  %v2787_v60 = vld [vmem:[#allocation2 + $0x88] sm:$0xff]  ;;  %v2789_v61 = vld [vmem:[#allocation2 + $0x98] sm:$0xff] }
 0x6a2   :  { %3170 = vmatpush1.bf16.msra.mxu0 %v2910_v62  ;;  %3211 = vmatpush1.bf16.msra.mxu1 %v2912_v63  ;;  %v2786_v62 = vld [vmem:[#allocation2 + $0x80] sm:$0xff]  ;;  %v2788_v63 = vld [vmem:[#allocation2 + $0x90] sm:$0xff] }
 0x6a3   :  { %3171 = vmatprep.subr.bf16.mxu0 %v2933_v0  ;;  %3212 = vmatprep.subr.bf16.mxu1 %v2935_v1  ;;  %v2809_v0 = vld [vmem:[#allocation2 + $0x138] sm:$0xff]  ;;  %v2811_v1 = vld [vmem:[#allocation2 + $0x148] sm:$0xff] }
 0x6a6   :  { %3172 = vmatpush1.bf16.msra.mxu0 %v2932_v2  ;;  %3213 = vmatpush1.bf16.msra.mxu1 %v2934_v4  ;;  %v2808_v2 = vld [vmem:[#allocation2 + $0x130] sm:$0xff]  ;;  %v2810_v4 = vld [vmem:[#allocation2 + $0x140] sm:$0xff] }
 0x6a7   :  { %3173 = vmatprep.subr.bf16.mxu0 %v2955_v3  ;;  %3214 = vmatprep.subr.bf16.mxu1 %v2957_v15  ;;  %v2831_v3 = vld [vmem:[#allocation2 + $0x1e8] sm:$0xff]  ;;  %v2833_v15 = vld [vmem:[#allocation2 + $0x1f8] sm:$0xff] }
 0x6aa   :  { %3174 = vmatpush1.bf16.msra.mxu0 %v2954_v6  ;;  %3215 = vmatpush1.bf16.msra.mxu1 %v2956_v7  ;;  %v2830_v6 = vld [vmem:[#allocation2 + $0x1e0] sm:$0xff]  ;;  %v2832_v7 = vld [vmem:[#allocation2 + $0x1f0] sm:$0xff] }
 0x6ab   :  { %3175 = vmatprep.subr.bf16.mxu0 %v2977_v8  ;;  %3216 = vmatprep.subr.bf16.mxu1 %v2979_v10  ;;  %v2853_v8 = vld [vmem:[#allocation2 + $0x298] sm:$0xff]  ;;  %v2855_v10 = vld [vmem:[#allocation2 + $0x2a8] sm:$0xff] }
 0x6ae   :  { %3176 = vmatpush1.bf16.msra.mxu0 %v2976_v11  ;;  %3217 = vmatpush1.bf16.msra.mxu1 %v2978_v22  ;;  %v2852_v11 = vld [vmem:[#allocation2 + $0x290] sm:$0xff]  ;;  %v2854_v22 = vld [vmem:[#allocation2 + $0x2a0] sm:$0xff] }
 0x6af   :  { %3239 = vmatprep.subr.bf16.mxu0 %v2783_v12  ;;  %3280 = vmatprep.subr.bf16.mxu1 %v2785_v13  ;;  %v2875_v12 = vld [vmem:[#allocation2 + $0x348] sm:$0xff]  ;;  %v2877_v13 = vld [vmem:[#allocation2 + $0x358] sm:$0xff] }
 0x6b1   :  { %3190 = vmatmul.mubr.bf16.vlgmr.msra.gmra.mrb[16].mxu0 %v4896_v56  ;;  %3231 = vmatmul.mubr.bf16.vlgmr.msra.gmra.mrb[24].mxu1 %v4896_v56 }
 0x6b2   :  { %3240 = vmatpush1.bf16.msra.mxu0 %v2782_v14  ;;  %3281 = vmatpush1.bf16.msra.mxu1 %v2784_v16  ;;  %v2874_v14 = vld [vmem:[#allocation2 + $0x340] sm:$0xff]  ;;  %v2876_v16 = vld [vmem:[#allocation2 + $0x350] sm:$0xff] }
 0x6b3   :  { %3241 = vmatprep.subr.bf16.mxu0 %v2805_v17  ;;  %3282 = vmatprep.subr.bf16.mxu1 %v2807_v18  ;;  %v2897_v17 = vld [vmem:[#allocation2 + $0x3f8] sm:$0xff]  ;;  %v2899_v18 = vld [vmem:[#allocation2 + $0x408] sm:$0xff] }
 0x6b4   :  { %4028 = vmatprep.mubr.msk.bf16.mxu0 %vm2710_vm3, %v4888_v5  ;;  %4029 = vmatprep.mubr.msk.bf16.mxu1 %vm2710_vm3, %v4888_v5 }
 0x6b6   :  { %3242 = vmatpush1.bf16.msra.mxu0 %v2804_v19  ;;  %3283 = vmatpush1.bf16.msra.mxu1 %v2806_v21  ;;  %v2896_v19 = vld [vmem:[#allocation2 + $0x3f0] sm:$0xff]  ;;  %v2898_v21 = vld [vmem:[#allocation2 + $0x400] sm:$0xff] }
 0x6b7   :  { %3243 = vmatprep.subr.bf16.mxu0 %v2827_v27  ;;  %3284 = vmatprep.subr.bf16.mxu1 %v2829_v28  ;;  %v2919_v27 = vld [vmem:[#allocation2 + $0x4a8] sm:$0xff]  ;;  %v2921_v28 = vld [vmem:[#allocation2 + $0x4b8] sm:$0xff] }
 0x6ba   :  { %3244 = vmatpush1.bf16.msra.mxu0 %v2826_v29  ;;  %3285 = vmatpush1.bf16.msra.mxu1 %v2828_v30  ;;  %v2918_v29 = vld [vmem:[#allocation2 + $0x4a0] sm:$0xff]  ;;  %v2920_v30 = vld [vmem:[#allocation2 + $0x4b0] sm:$0xff] }
 0x6bb   :  { %3245 = vmatprep.subr.bf16.mxu0 %v2849_v9  ;;  %3286 = vmatprep.subr.bf16.mxu1 %v2851_v32  ;;  %v2941_v9 = vld [vmem:[#allocation2 + $0x558] sm:$0xff]  ;;  %v2943_v32 = vld [vmem:[#allocation2 + $0x568] sm:$0xff] }
 0x6be   :  { %3246 = vmatpush1.bf16.msra.mxu0 %v2848_v33  ;;  %3287 = vmatpush1.bf16.msra.mxu1 %v2850_v34  ;;  %v2940_v33 = vld [vmem:[#allocation2 + $0x550] sm:$0xff]  ;;  %v2942_v34 = vld [vmem:[#allocation2 + $0x560] sm:$0xff] }
 0x6bf   :  { %3247 = vmatprep.subr.bf16.mxu0 %v2871_v35  ;;  %3288 = vmatprep.subr.bf16.mxu1 %v2873_v36  ;;  %v2963_v35 = vld [vmem:[#allocation2 + $0x608] sm:$0xff]  ;;  %v2965_v36 = vld [vmem:[#allocation2 + $0x618] sm:$0xff] }
 0x6c2   :  { %3248 = vmatpush1.bf16.msra.mxu0 %v2870_v37  ;;  %3289 = vmatpush1.bf16.msra.mxu1 %v2872_v38  ;;  %v2962_v37 = vld [vmem:[#allocation2 + $0x600] sm:$0xff]  ;;  %v2964_v38 = vld [vmem:[#allocation2 + $0x610] sm:$0xff] }
 0x6c3   :  { %3249 = vmatprep.subr.bf16.mxu0 %v2893_v40  ;;  %3290 = vmatprep.subr.bf16.mxu1 %v2895_v41  ;;  %v2985_v40 = vld [vmem:[#allocation2 + $0x6b8] sm:$0xff]  ;;  %v2987_v41 = vld [vmem:[#allocation2 + $0x6c8] sm:$0xff] }
 0x6c6   :  { %3250 = vmatpush1.bf16.msra.mxu0 %v2892_v42  ;;  %3291 = vmatpush1.bf16.msra.mxu1 %v2894_v44  ;;  %v2984_v42 = vld [vmem:[#allocation2 + $0x6b0] sm:$0xff]  ;;  %v2986_v44 = vld [vmem:[#allocation2 + $0x6c0] sm:$0xff] }
 0x6c7   :  { %3251 = vmatprep.subr.bf16.mxu0 %v2915_v45  ;;  %3292 = vmatprep.subr.bf16.mxu1 %v2917_v46  ;;  %v2791_v45 = vld [vmem:[#allocation2 + $0xa8] sm:$0xff]  ;;  %v2790_v46 = vld [vmem:[#allocation2 + $0xa0] sm:$0xff] }
 0x6ca   :  { %3252 = vmatpush1.bf16.msra.mxu0 %v2914_v47  ;;  %3293 = vmatpush1.bf16.msra.mxu1 %v2916_v48  ;;  %v2813_v47 = vld [vmem:[#allocation2 + $0x158] sm:$0xff]  ;;  %v2812_v48 = vld [vmem:[#allocation2 + $0x150] sm:$0xff] }
 0x6cb   :  { %3253 = vmatprep.subr.bf16.mxu0 %v2937_v50  ;;  %3294 = vmatprep.subr.bf16.mxu1 %v2939_v51  ;;  %v2835_v50 = vld [vmem:[#allocation2 + $0x208] sm:$0xff]  ;;  %v2834_v51 = vld [vmem:[#allocation2 + $0x200] sm:$0xff] }
 0x6ce   :  { %3254 = vmatpush1.bf16.msra.mxu0 %v2936_v52  ;;  %3295 = vmatpush1.bf16.msra.mxu1 %v2938_v53  ;;  %v2857_v52 = vld [vmem:[#allocation2 + $0x2b8] sm:$0xff]  ;;  %v2856_v53 = vld [vmem:[#allocation2 + $0x2b0] sm:$0xff] }
 0x6cf   :  { %3255 = vmatprep.subr.bf16.mxu0 %v2959_v54  ;;  %3296 = vmatprep.subr.bf16.mxu1 %v2961_v55  ;;  %v2879_v54 = vld [vmem:[#allocation2 + $0x368] sm:$0xff]  ;;  %v2878_v55 = vld [vmem:[#allocation2 + $0x360] sm:$0xff] }
 0x6d2   :  { %3256 = vmatpush1.bf16.msra.mxu0 %v2958_v24  ;;  %3297 = vmatpush1.bf16.msra.mxu1 %v2960_v57  ;;  %v2901_v24 = vld [vmem:[#allocation2 + $0x418] sm:$0xff]  ;;  %v2900_v57 = vld [vmem:[#allocation2 + $0x410] sm:$0xff] }
 0x6d3   :  { %3257 = vmatprep.subr.bf16.mxu0 %v2981_v20  ;;  %3298 = vmatprep.subr.bf16.mxu1 %v2983_v58  ;;  %v2923_v20 = vld [vmem:[#allocation2 + $0x4c8] sm:$0xff]  ;;  %v2945_v58 = vld [vmem:[#allocation2 + $0x578] sm:$0xff] }
 0x6d6   :  { %3258 = vmatpush1.bf16.msra.mxu0 %v2980_v59  ;;  %3299 = vmatpush1.bf16.msra.mxu1 %v2982_v31  ;;  %v2944_v59 = vld [vmem:[#allocation2 + $0x570] sm:$0xff]  ;;  %v2967_v31 = vld [vmem:[#allocation2 + $0x628] sm:$0xff] }
 0x6d7   :  { %3321 = vmatprep.subr.bf16.mxu0 %v2787_v60  ;;  %3362 = vmatprep.subr.bf16.mxu1 %v2789_v61  ;;  %v2966_v60 = vld [vmem:[#allocation2 + $0x620] sm:$0xff]  ;;  %v2989_v61 = vld [vmem:[#allocation2 + $0x6d8] sm:$0xff] }
 0x6d9   :  { %3272 = vmatmul.mubr.bf16.vlgmr.msra.gmra.mrb[20].mxu0 %v4896_v56  ;;  %3313 = vmatmul.mubr.bf16.vlgmr.msra.gmra.mrb[28].mxu1 %v4896_v56 }
 0x6da   :  { %3322 = vmatpush1.bf16.msra.mxu0 %v2786_v62  ;;  %3363 = vmatpush1.bf16.msra.mxu1 %v2788_v63  ;;  %v2988_v62 = vld [vmem:[#allocation2 + $0x6d0] sm:$0xff]  ;;  %v2765_v63 = vld [vmem:[%s4997_s7] sm:$0xff] }
 0x6db   :  { %3323 = vmatprep.subr.bf16.mxu0 %v2809_v0  ;;  %3364 = vmatprep.subr.bf16.mxu1 %v2811_v1  ;;  %v3450_v0 = vrot.slane %v2765_v63, %v4801_v23  ;;  %v3458_v1 = vrot.slane %v2765_v63, %v4823_v39 }
 0x6dc   :  { %4030 = vmatprep.mubr.msk.bf16.mxu0 %vm2710_vm3, %v4888_v5  ;;  %4031 = vmatprep.mubr.msk.bf16.mxu1 %vm2710_vm3, %v4888_v5 }
 0x6de   :  { %3324 = vmatpush1.bf16.msra.mxu0 %v2808_v2  ;;  %3365 = vmatpush1.bf16.msra.mxu1 %v2810_v4  ;;  %v3454_v2 = vrot.slane %v2765_v63, %v4809_v25  ;;  %v3462_v4 = vrot.slane %v2765_v63, %v4812_v26 }
 0x6df   :  { %3325 = vmatprep.subr.bf16.mxu0 %v2831_v3  ;;  %3366 = vmatprep.subr.bf16.mxu1 %v2833_v15 }
 0x6e2   :  { %3326 = vmatpush1.bf16.msra.mxu0 %v2830_v6  ;;  %3367 = vmatpush1.bf16.msra.mxu1 %v2832_v7 }
 0x6e3   :  { %3327 = vmatprep.subr.bf16.mxu0 %v2853_v8  ;;  %3368 = vmatprep.subr.bf16.mxu1 %v2855_v10 }
 0x6e6   :  { %3328 = vmatpush1.bf16.msra.mxu0 %v2852_v11  ;;  %3369 = vmatpush1.bf16.msra.mxu1 %v2854_v22 }
 0x6e7   :  { %3329 = vmatprep.subr.bf16.mxu0 %v2875_v12  ;;  %3370 = vmatprep.subr.bf16.mxu1 %v2877_v13 }
 0x6ea   :  { %3330 = vmatpush1.bf16.msra.mxu0 %v2874_v14  ;;  %3371 = vmatpush1.bf16.msra.mxu1 %v2876_v16 }
 0x6eb   :  { %3331 = vmatprep.subr.bf16.mxu0 %v2897_v17  ;;  %3372 = vmatprep.subr.bf16.mxu1 %v2899_v18 }
 0x6ee   :  { %3332 = vmatpush1.bf16.msra.mxu0 %v2896_v19  ;;  %3373 = vmatpush1.bf16.msra.mxu1 %v2898_v21 }
 0x6ef   :  { %3333 = vmatprep.subr.bf16.mxu0 %v2919_v27  ;;  %3374 = vmatprep.subr.bf16.mxu1 %v2921_v28  ;;  %v4940_v27 = vsub.s32 4, %v4784_v43  ;;  %v3473_v28 = vsub.s32 6, %v4784_v43 }
 0x6f2   :  { %3334 = vmatpush1.bf16.msra.mxu0 %v2918_v29  ;;  %3375 = vmatpush1.bf16.msra.mxu1 %v2920_v30  ;;  %v4944_v29 = vsub.s32 5, %v4784_v43  ;;  %v3477_v30 = vsub.s32 7, %v4784_v43 }
 0x6f3   :  { %3335 = vmatprep.subr.bf16.mxu0 %v2941_v9  ;;  %3376 = vmatprep.subr.bf16.mxu1 %v2943_v32  ;;  %v3466_v9 = vrot.slane %v2765_v63, %v4940_v27  ;;  %v3474_v32 = vrot.slane %v2765_v63, %v3473_v28 }
 0x6f6   :  { %3336 = vmatpush1.bf16.msra.mxu0 %v2940_v33  ;;  %3377 = vmatpush1.bf16.msra.mxu1 %v2942_v34  ;;  %v3470_v33 = vrot.slane %v2765_v63, %v4944_v29  ;;  %v3478_v34 = vrot.slane %v2765_v63, %v3477_v30 }
 0x6f7   :  { %3337 = vmatprep.subr.bf16.mxu0 %v2963_v35  ;;  %3378 = vmatprep.subr.bf16.mxu1 %v2965_v36 }
 0x6fa   :  { %3338 = vmatpush1.bf16.msra.mxu0 %v2962_v37  ;;  %3379 = vmatpush1.bf16.msra.mxu1 %v2964_v38 }
 0x6fb   :  { %3339 = vmatprep.subr.bf16.mxu0 %v2985_v40  ;;  %3380 = vmatprep.subr.bf16.mxu1 %v2987_v41 }
 0x6fe   :  { %3340 = vmatpush1.bf16.msra.mxu0 %v2984_v42  ;;  %3381 = vmatpush1.bf16.msra.mxu1 %v2986_v44 }
 0x6ff   :  { %3403 = vmatprep.subr.bf16.mxu0 %v2791_v45 }
 0x701   :  { %3354 = vmatmul.mubr.bf16.vlgmr.msra.gmra.mrb[24].mxu0 %v4896_v56  ;;  %3395 = vmatmul.mubr.bf16.vlgmr.msra.gmra.mrb[32].mxu1 %v4896_v56 }
 0x702   :  { %3404 = vmatpush1.bf16.msra.mxu0 %v2790_v46  ;;  %4032 = vmatprep.mubr.msk.bf16.mxu0 %vm2710_vm3, %v4888_v5  ;;  %v2922_v5 = vld [vmem:[#allocation2 + $0x4c0] sm:$0xff] }
 0x703   :  { %3405 = vmatprep.subr.bf16.mxu0 %v2813_v47 }
 0x706   :  { %3406 = vmatpush1.bf16.msra.mxu0 %v2812_v48 }
 0x707   :  { %3407 = vmatprep.subr.bf16.mxu0 %v2835_v50 }
 0x70a   :  { %3408 = vmatpush1.bf16.msra.mxu0 %v2834_v51 }
 0x70b   :  { %3409 = vmatprep.subr.bf16.mxu0 %v2857_v52 }
 0x70e   :  { %3410 = vmatpush1.bf16.msra.mxu0 %v2856_v53 }
 0x70f   :  { %3411 = vmatprep.subr.bf16.mxu0 %v2879_v54  ;;  %v2766_v54 = vld [vmem:[%s4997_s7 + $0x8] sm:$0xff] }
 0x712   :  { %3412 = vmatpush1.bf16.msra.mxu0 %v2878_v55  ;;  %v3482_v55 = vrot.slane %v2766_v54, %v4801_v23 }
 0x713   :  { %3413 = vmatprep.subr.bf16.mxu0 %v2901_v24  ;;  %v3490_v24 = vrot.slane %v2766_v54, %v4823_v39 }
 0x716   :  { %3414 = vmatpush1.bf16.msra.mxu0 %v2900_v57  ;;  %v3486_v57 = vrot.slane %v2766_v54, %v4809_v25 }
 0x717   :  { %3415 = vmatprep.subr.bf16.mxu0 %v2923_v20  ;;  %v3494_v20 = vrot.slane %v2766_v54, %v4812_v26 }
 0x71a   :  { %3416 = vmatpush1.bf16.msra.mxu0 %v2922_v5 }
 0x71b   :  { %3417 = vmatprep.subr.bf16.mxu0 %v2945_v58 }
 0x71e   :  { %3418 = vmatpush1.bf16.msra.mxu0 %v2944_v59 }
 0x71f   :  { %3419 = vmatprep.subr.bf16.mxu0 %v2967_v31 }
 0x722   :  { %3420 = vmatpush1.bf16.msra.mxu0 %v2966_v60 }
 0x723   :  { %3421 = vmatprep.subr.bf16.mxu0 %v2989_v61 }
 0x726   :  { %3422 = vmatpush1.bf16.msra.mxu0 %v2988_v62 }
 0x729   :  { %3436 = vmatmul.mubr.bf16.vlgmr.msra.gmra.mrb[28].mxu0 %v4896_v56 }
 0x734   :  { %v3027_v3 = vpop.f32.mrb[8].mxu0  ;;  %v3068_v15 = vpop.f32.mrb[16].mxu1 }
 0x735   :  { %v3557_v6 = vadd.f32 %v3450_v0, %v3027_v3  ;;  %v3559_v7 = vadd.f32 %v3458_v1, %v3068_v15  ;;  %v3029_v8 = vpop.f32.mrb[9].mxu0  ;;  %v3070_v10 = vpop.f32.mrb[17].mxu1 }
 0x736   :  { %v3558_v11 = vadd.f32 %v3454_v2, %v3029_v8  ;;  %v3560_v56 = vadd.f32 %v3462_v4, %v3070_v10  ;;  %v3031_v22 = vpop.f32.mrb[10].mxu0  ;;  %v3072_v12 = vpop.f32.mrb[18].mxu1  ;;  %v3498_v10 = vrot.slane %v2766_v54, %v4940_v27 }
 0x737   :  { %v3032_v13 = vpop.f32.mrb[11].mxu0  ;;  %v3073_v14 = vpop.f32.mrb[19].mxu1  ;;  %v3510_v22 = vrot.slane %v2766_v54, %v3477_v30  ;;  %v2767_v30 = vld [vmem:[%s4997_s7 + $0x10] sm:$0x3f] }
 0x738   :  { %v3601_v16 = vcombine.low %v3557_v6, %v3558_v11  ;;  %v3602_v17 = vcombine.low %v3559_v7, %v3560_v56  ;;  %v3506_v11 = vrot.slane %v2766_v54, %v3473_v28  ;;  %v3502_v56 = vrot.slane %v2766_v54, %v4944_v29 }
 0x73a   :  { %v3609_v18 = vrot.slane %v3601_v16, %v4787_v49  ;;  %v3616_v19 = vrot.slane %v3602_v17, %v4787_v49 }
 0x73c   :  { %v3617_v21 = vcombine.low %v3609_v18, %v3616_v19 }
 0x73e   :  { %3700 = vst [vmem:[%s5000_s10] sm:$0xff] %v3617_v21 }
 0x75c   :  { %v3109_v35 = vpop.f32.mrb[12].mxu0  ;;  %v3150_v36 = vpop.f32.mrb[20].mxu1 }
 0x75d   :  { %v3561_v37 = vadd.f32 %v3466_v9, %v3109_v35  ;;  %v3563_v38 = vadd.f32 %v3474_v32, %v3150_v36  ;;  %v3111_v40 = vpop.f32.mrb[13].mxu0  ;;  %v3152_v41 = vpop.f32.mrb[21].mxu1 }
 0x75e   :  { %v3562_v42 = vadd.f32 %v3470_v33, %v3111_v40  ;;  %v3564_v44 = vadd.f32 %v3478_v34, %v3152_v41  ;;  %v3113_v45 = vpop.f32.mrb[14].mxu0  ;;  %v3154_v46 = vpop.f32.mrb[22].mxu1  ;;  %v3514_v40 = vrot.slane %v2767_v30, %v4801_v23  ;;  %v3522_v41 = vrot.slane %v2767_v30, %v4823_v39 }
 0x75f   :  { %v3114_v47 = vpop.f32.mrb[15].mxu0  ;;  %v3155_v48 = vpop.f32.mrb[23].mxu1 }
 0x760   :  { %v3618_v50 = vcombine.low %v3561_v37, %v3562_v42  ;;  %v3619_v43 = vcombine.low %v3563_v38, %v3564_v44  ;;  %v3518_v42 = vrot.slane %v2767_v30, %v4809_v25  ;;  %v3526_v44 = vrot.slane %v2767_v30, %v4812_v26 }
 0x761   :  { %v3530_v26 = vrot.slane %v2767_v30, %v4940_v27 }
 0x762   :  { %v3626_v51 = vrot.slane %v3618_v50, %v4787_v49  ;;  %v3633_v52 = vrot.slane %v3619_v43, %v4787_v49 }
 0x764   :  { %v3634_v53 = vcombine.low %v3626_v51, %v3633_v52 }
 0x766   :  { %3701 = vst [vmem:[%s5000_s10 + $0x8] sm:$0xff] %v3634_v53 }
 0x784   :  { %v3191_v5 = vpop.f32.mrb[16].mxu0  ;;  %v3232_v58 = vpop.f32.mrb[24].mxu1 }
 0x785   :  { %v3565_v59 = vadd.f32 %v3482_v55, %v3191_v5  ;;  %v3567_v31 = vadd.f32 %v3490_v24, %v3232_v58  ;;  %v3193_v60 = vpop.f32.mrb[17].mxu0  ;;  %v3234_v61 = vpop.f32.mrb[25].mxu1  ;;  %v3534_v5 = vrot.slane %v2767_v30, %v4944_v29 }
 0x786   :  { %v3566_v62 = vadd.f32 %v3486_v57, %v3193_v60  ;;  %v3568_v63 = vadd.f32 %v3494_v20, %v3234_v61  ;;  %v3195_v0 = vpop.f32.mrb[18].mxu0  ;;  %v3236_v1 = vpop.f32.mrb[26].mxu1 }
 0x787   :  { %v3196_v2 = vpop.f32.mrb[19].mxu0  ;;  %v3237_v4 = vpop.f32.mrb[27].mxu1 }
 0x788   :  { %v3635_v3 = vcombine.low %v3565_v59, %v3566_v62  ;;  %v3636_v15 = vcombine.low %v3567_v31, %v3568_v63 }
 0x78a   :  { %v3643_v6 = vrot.slane %v3635_v3, %v4787_v49  ;;  %v3650_v7 = vrot.slane %v3636_v15, %v4787_v49 }
 0x78c   :  { %v3651_v8 = vcombine.low %v3643_v6, %v3650_v7 }
 0x78e   :  { %3702 = vst [vmem:[%s5000_s10 + $0x10] sm:$0xff] %v3651_v8 }
 0x7ac   :  { %v3273_v12 = vpop.f32.mrb[20].mxu0  ;;  %v3314_v13 = vpop.f32.mrb[28].mxu1 }
 0x7ad   :  { %v3569_v14 = vadd.f32 %v3498_v10, %v3273_v12  ;;  %v3571_v16 = vadd.f32 %v3506_v11, %v3314_v13  ;;  %v3275_v17 = vpop.f32.mrb[21].mxu0  ;;  %v3316_v18 = vpop.f32.mrb[29].mxu1 }
 0x7ae   :  { %v3570_v19 = vadd.f32 %v3502_v56, %v3275_v17  ;;  %v3572_v21 = vadd.f32 %v3510_v22, %v3316_v18  ;;  %v3277_v9 = vpop.f32.mrb[22].mxu0  ;;  %v3318_v32 = vpop.f32.mrb[30].mxu1 }
 0x7af   :  { %v3278_v33 = vpop.f32.mrb[23].mxu0  ;;  %v3319_v34 = vpop.f32.mrb[31].mxu1 }
 0x7b0   :  { %v3652_v35 = vcombine.low %v3569_v14, %v3570_v19  ;;  %v3653_v36 = vcombine.low %v3571_v16, %v3572_v21 }
 0x7b2   :  { %v3660_v37 = vrot.slane %v3652_v35, %v4787_v49  ;;  %v3667_v28 = vrot.slane %v3653_v36, %v4787_v49 }
 0x7b4   :  { %v3668_v38 = vcombine.low %v3660_v37, %v3667_v28 }
 0x7b6   :  { %3703 = vst [vmem:[%s5000_s10 + $0x18] sm:$0xff] %v3668_v38 }
 0x7d4   :  { %v3355_v45 = vpop.f32.mrb[24].mxu0  ;;  %v3396_v46 = vpop.f32.mrb[32].mxu1 }
 0x7d5   :  { %v3573_v47 = vadd.f32 %v3514_v40, %v3355_v45  ;;  %v3575_v48 = vadd.f32 %v3522_v41, %v3396_v46  ;;  %v3357_v50 = vpop.f32.mrb[25].mxu0  ;;  %v3398_v43 = vpop.f32.mrb[33].mxu1 }
 0x7d6   :  { %v3574_v51 = vadd.f32 %v3518_v42, %v3357_v50  ;;  %v3576_v52 = vadd.f32 %v3526_v44, %v3398_v43  ;;  %v3359_v53 = vpop.f32.mrb[26].mxu0  ;;  %v3400_v54 = vpop.f32.mrb[34].mxu1 }
 0x7d7   :  { %v3360_v55 = vpop.f32.mrb[27].mxu0  ;;  %v3401_v24 = vpop.f32.mrb[35].mxu1 }
 0x7d8   :  { %v3669_v57 = vcombine.low %v3573_v47, %v3574_v51  ;;  %v3670_v23 = vcombine.low %v3575_v48, %v3576_v52 }
 0x7da   :  { %v3677_v39 = vrot.slane %v3669_v57, %v4787_v49  ;;  %v3684_v25 = vrot.slane %v3670_v23, %v4787_v49 }
 0x7dc   :  { %v3685_v20 = vcombine.low %v3677_v39, %v3684_v25 }
 0x7de   :  { %3704 = vst [vmem:[%s5000_s10 + $0x20] sm:$0xff] %v3685_v20 }
 0x7fc   :  { %v3437_v58 = vpop.f32.mrb[28].mxu0 }
 0x7fd   :  { %v3577_v59 = vadd.f32 %v3530_v26, %v3437_v58  ;;  %v3439_v31 = vpop.f32.mrb[29].mxu0 }
 0x7fe   :  { %v3578_v60 = vadd.f32 %v3534_v5, %v3439_v31  ;;  %v3441_v61 = vpop.f32.mrb[30].mxu0 }
 0x7ff   :  { %v3442_v62 = vpop.f32.mrb[31].mxu0 }
 0x800   :  { %v3686_v63 = vcombine.low %v3577_v59, %v3578_v60 }
 0x802   :  { %4033 = vst.sshfl [vmem:[%s5000_s10 + $0x28] sm:$0x33 pattern:$0x76325410] %v3686_v63 }
 0x803   :  { %3714 = vsyncpa [#allocation5], 1 }
 0x804   :  { %3715 = vsyncpa [#allocation7], 1 }
 0x805   :  { %3716 = vsyncmov [#allocation3] }
 0x808   :  { %s3717_s26 = vpop.sfrf %3716 }
 0x809   :  { %p4034_p10 = scmp.ne.s32.totalorder %s3717_s26, 0 }
 0x80b   :  { %3721 = shalt.err (%p4034_p10)  }

// kernel: mano_head_forward.3
= control target key start
LH: loop header
LB: loop body
LE: loop exit
PB: predicated region body
PF: predicated region fallthrough
CT: control target
= control target key end

     0   :  { %s957_s12 = smov 0   ;;  %s1212_s0 = inlined_call_operand.vmem [shape: f32[2,3,64], index: 0, kind: input, shape index: {}]   ;;  %s1213_s1 = inlined_call_operand.vmem [shape: f32[2,3,896], index: 1, kind: input, shape index: {}]   ;;  %s1214_s2 = inlined_call_operand.vmem [shape: f32[16,896], index: 2, kind: input, shape index: {}]   ;;  %s1215_s3 = inlined_call_operand.vmem [shape: f32[2,3,896], index: 3, kind: output, shape index: {}]  }
   0x1 LB: > { %s812_s13 = sadd.s32 4294967295, %s932_s12   ;;  %p816_p0 = scmp.ge.s32.totalorder %s932_s12, 1  ;;  %s932_s12 = sphi %s957_s12, %s13_s12  }
   0x2   : > { %p146_p1 = scmp.lt.s32.totalorder %s932_s12, 3 }
   0x4   : > { %p147_p2 = pnand %p816_p0, %p146_p1 }
   0x5   : > { %p174_p3 = scmp.lt.s32.totalorder (!%p147_p2), %s812_s13, 1  ;;  %v211_v0 = vlaneseq (!%p147_p2)  ;;  %v934_v1 = vmov (!%p147_p2), 0.0   ;;  %v973_v3 = vld [vmem:[%s1214_s2 + $0x8] sm:$0xff] (!%p147_p2)  ;;  %v978_v4 = vld [vmem:[%s1214_s2 + $0x40] sm:$0xff] (!%p147_p2)  ;;  %v994_v9 = vld [vmem:[%s1214_s2 + $0x38] sm:$0xff] (!%p147_p2)  ;;  %vm442_vm0 = vcmask (!%p147_p2), 523264  }
   0x6   : > { %150 = sbr.rel (%p147_p2) target bundleno = 275 (0x113), region = 32  ;;  %510 = vmatprep.mubr.f32.mxu0 (!%p147_p2), %v934_v1  ;;  %581 = vmatprep.mubr.f32.mxu1 (!%p147_p2), %v934_v1  ;;  %v989_v8 = vld [vmem:[%s1214_s2] sm:$0xff] (!%p147_p2)  ;;  %v999_v10 = vld [vmem:[%s1214_s2 + $0x18] sm:$0xff] (!%p147_p2)  ;;  %v1013_v12 = vld [vmem:[%s1214_s2 + $0x50] sm:$0xff] (!%p147_p2)  ;;  %v866_v15 = vpack.c.bf16 (!%p147_p2), %v978_v4, %v973_v3  ;;  %vm936_vm1 = vmmov (!%p147_p2), 0  }
   0x7   : > { %v212_v2 = vshrl.u32 (!%p147_p2), %v211_v0, 7  ;;  %v1018_v13 = vld [vmem:[%s1214_s2 + $0x10] sm:$0xff] (!%p147_p2)  ;;  %v1023_v14 = vld [vmem:[%s1214_s2 + $0x48] sm:$0xff] (!%p147_p2)  ;;  %v868_v16 = vpack.c.bf16 (!%p147_p2), %v994_v9, %v989_v8  ;;  %v882_v21 = vpack.c.bf16 (!%p147_p2), %v1013_v12, %v999_v10 }
   0x8   : > { %v884_v22 = vpack.c.bf16 (!%p147_p2), %v1023_v14, %v1018_v13 }
   0x9   : > { %v980_v5 = vsub.s32 (!%p147_p2), 0, %v212_v2  ;;  %v982_v6 = vsub.s32 (!%p147_p2), 4, %v212_v2  ;;  %v984_v7 = vsub.s32 (!%p147_p2), 1, %v212_v2  ;;  %v1001_v11 = vsub.s32 (!%p147_p2), 5, %v212_v2 }
   0xa   : > { %v1030_v18 = vsub.s32 (!%p147_p2), 2, %v212_v2  ;;  %v1035_v20 = vsub.s32 (!%p147_p2), 6, %v212_v2 }
   0xd   : > { %s1217_s13 = smov (!%p174_p3, %s812_s13), 1 }
   0xe   : > { %s914_s14 = smul.u32 28, %s1217_s13  ;;  %s817_s18 = sshll.u32 %s1217_s13, 2 }
   0xf   : > { %s177_s25 = scalar_lea.vmem %s1212_s0, %s817_s18 }
  0x10   : > { %s1008_s27 = scalar_lea.vmem %s1213_s1, %s914_s14  ;;  %s187_s28 = scalar_lea.vmem %s1215_s3, %s914_s14 }
  0x11   : > { %v202_v17 = vld [vmem:[%s1008_s27] sm:$0x77]  ;;  %v1033_v19 = vld [vmem:[%s1008_s27 + $0x8] sm:$0x77]  ;;  %v1077_v59 = vld [vmem:[%s1008_s27 + $0x10] sm:$0x77] }
  0x12   : > { %v218_v23 = vrot.slane %v202_v17, %v982_v6  ;;  %v214_v24 = vrot.slane %v202_v17, %v980_v5  ;;  %v226_v25 = vrot.slane %v1033_v19, %v982_v6  ;;  %v222_v26 = vrot.slane %v1033_v19, %v980_v5  ;;  %v1082_v63 = vld [vmem:[%s1008_s27 + $0x18] sm:$0x7] }
  0x13   : > { %v295_v27 = vrot.slane %v202_v17, %v1001_v11  ;;  %v291_v28 = vrot.slane %v202_v17, %v984_v7  ;;  %v303_v29 = vrot.slane %v1033_v19, %v1001_v11  ;;  %v299_v30 = vrot.slane %v1033_v19, %v984_v7 }
  0x14   : > { %v253_v31 = vrot.slane %v218_v23, %v980_v5  ;;  %v249_v32 = vrot.slane %v214_v24, %v980_v5  ;;  %v261_v33 = vrot.slane %v226_v25, %v980_v5  ;;  %v257_v34 = vrot.slane %v222_v26, %v980_v5 }
  0x15   : > { %v330_v35 = vrot.slane %v295_v27, %v984_v7  ;;  %v326_v36 = vrot.slane %v291_v28, %v984_v7  ;;  %v338_v37 = vrot.slane %v303_v29, %v984_v7  ;;  %v334_v38 = vrot.slane %v299_v30, %v984_v7 }
  0x16   : > { %v275_v39 = vmul.f32 %v253_v31, %v973_v3  ;;  %v282_v40 = vmul.f32 %v253_v31, %v978_v4  ;;  %v274_v41 = vmul.f32 %v249_v32, %v989_v8  ;;  %v281_v42 = vmul.f32 %v249_v32, %v994_v9 }
  0x17   : > { %v277_v43 = vmul.f32 %v261_v33, %v999_v10  ;;  %v284_v44 = vmul.f32 %v261_v33, %v1013_v12  ;;  %v276_v45 = vmul.f32 %v257_v34, %v1018_v13  ;;  %v283_v46 = vmul.f32 %v257_v34, %v1023_v14  ;;  %v1109_v33 = vld [vmem:[%s1214_s2 + $0x60] sm:$0xff] }
  0x18   : > { %v854_v47 = vpack.c.bf16 %v282_v40, %v275_v39  ;;  %v856_v48 = vpack.c.bf16 %v281_v42, %v274_v41  ;;  %v352_v49 = vmul.f32 %v330_v35, %v973_v3  ;;  %v359_v50 = vmul.f32 %v330_v35, %v978_v4 }
  0x19   : > { %v870_v51 = vpack.c.bf16 %v284_v44, %v277_v43  ;;  %v872_v52 = vpack.c.bf16 %v283_v46, %v276_v45  ;;  %v351_v53 = vmul.f32 %v326_v36, %v989_v8  ;;  %v358_v54 = vmul.f32 %v326_v36, %v994_v9  ;;  %v1122_v43 = vld [vmem:[%s1214_s2 + $0x20] sm:$0xff]  ;;  %v1127_v44 = vld [vmem:[%s1214_s2 + $0x58] sm:$0xff] }
  0x1a   : > { %855 = vmatprep.subr.bf16.mxu0 %v854_v47  ;;  %v858_v55 = vpack.c.bf16 %v359_v50, %v352_v49  ;;  %v354_v56 = vmul.f32 %v338_v37, %v999_v10  ;;  %v361_v57 = vmul.f32 %v338_v37, %v1013_v12  ;;  %v353_v58 = vmul.f32 %v334_v38, %v1018_v13  ;;  %v1135_v49 = vld [vmem:[%s1214_s2 + $0x30] sm:$0xff]  ;;  %v1140_v50 = vld [vmem:[%s1214_s2 + $0x68] sm:$0xff] }
  0x1b   : > { %857 = vmatpush1.bf16.msra.mxu0 %v856_v48  ;;  %871 = vmatprep.subr.bf16.mxu1 %v870_v51  ;;  %v860_v60 = vpack.c.bf16 %v358_v54, %v351_v53  ;;  %v360_v61 = vmul.f32 %v334_v38, %v1023_v14  ;;  %v372_v62 = vrot.slane %v202_v17, %v1035_v20 }
  0x1c   : > { %873 = vmatpush1.bf16.msra.mxu1 %v872_v52  ;;  %859 = vmatprep.subr.bf16.mxu0 %v858_v55  ;;  %v874_v0 = vpack.c.bf16 %v361_v57, %v354_v56  ;;  %v368_v2 = vrot.slane %v202_v17, %v1030_v18  ;;  %v380_v23 = vrot.slane %v1033_v19, %v1035_v20  ;;  %v1097_v17 = vld [vmem:[%s1214_s2 + $0x28] sm:$0xff] }
  0x1d   : > { %v876_v24 = vpack.c.bf16 %v360_v61, %v353_v58  ;;  %v407_v25 = vrot.slane %v372_v62, %v1030_v18  ;;  %v376_v26 = vrot.slane %v1033_v19, %v1030_v18  ;;  %v234_v27 = vrot.slane %v1077_v59, %v982_v6 }
  0x1e   : > { %875 = vmatprep.subr.bf16.mxu1 %v874_v0  ;;  %v403_v28 = vrot.slane %v368_v2, %v1030_v18  ;;  %v415_v29 = vrot.slane %v380_v23, %v1030_v18  ;;  %v230_v30 = vrot.slane %v1077_v59, %v980_v5  ;;  %v238_v31 = vrot.slane %v1082_v63, %v980_v5 }
  0x1f   : > { %861 = vmatpush1.bf16.msra.mxu0 %v860_v60  ;;  %v429_v19 = vmul.f32 %v407_v25, %v973_v3  ;;  %v436_v6 = vmul.f32 %v407_v25, %v978_v4  ;;  %v411_v32 = vrot.slane %v376_v26, %v1030_v18  ;;  %v269_v34 = vrot.slane %v234_v27, %v980_v5 }
  0x20   : > { %877 = vmatpush1.bf16.msra.mxu1 %v876_v24  ;;  %v428_v35 = vmul.f32 %v403_v28, %v989_v8  ;;  %v435_v36 = vmul.f32 %v403_v28, %v994_v9  ;;  %v431_v37 = vmul.f32 %v415_v29, %v999_v10  ;;  %v438_v38 = vmul.f32 %v415_v29, %v1013_v12  ;;  %v206_v10 = vld [vmem:[%s177_s25] sm:$0x7] }
  0x21   : > { %v862_v39 = vpack.c.bf16 %v436_v6, %v429_v19  ;;  %v430_v40 = vmul.f32 %v411_v32, %v1018_v13  ;;  %v437_v41 = vmul.f32 %v411_v32, %v1023_v14  ;;  %v279_v42 = vmul.f32 %v269_v34, %v1097_v17 }
  0x22   : > { %v864_v45 = vpack.c.bf16 %v435_v36, %v428_v35  ;;  %v878_v46 = vpack.c.bf16 %v438_v38, %v431_v37  ;;  %v286_v47 = vmul.f32 %v269_v34, %v1109_v33  ;;  %v265_v48 = vrot.slane %v230_v30, %v980_v5 }
  0x23   : > { %863 = vmatprep.subr.bf16.mxu0 %v862_v39  ;;  %v880_v51 = vpack.c.bf16 %v437_v41, %v430_v40  ;;  %v273_v52 = vrot.slane %v238_v31, %v980_v5  ;;  %v311_v53 = vrot.slane %v1077_v59, %v1001_v11  ;;  %v307_v54 = vrot.slane %v1077_v59, %v984_v7 }
  0x24   : > { %865 = vmatpush1.bf16.msra.mxu0 %v864_v45  ;;  %879 = vmatprep.subr.bf16.mxu1 %v878_v46  ;;  %v886_v55 = vpack.c.bf16 %v286_v47, %v279_v42  ;;  %v278_v56 = vmul.f32 %v265_v48, %v1122_v43  ;;  %v285_v57 = vmul.f32 %v265_v48, %v1127_v44  ;;  %v935_v9 = vmov 0.0|0.0  }
  0x25   : > { %881 = vmatpush1.bf16.msra.mxu1 %v880_v51  ;;  %867 = vmatprep.subr.bf16.mxu0 %v866_v15  ;;  %v280_v5 = vmul.f32 %v273_v52, %v1135_v49  ;;  %v287_v11 = vmul.f32 %v273_v52, %v1140_v50  ;;  %v346_v58 = vrot.slane %v311_v53, %v984_v7 }
  0x26   : > { %883 = vmatprep.subr.bf16.mxu1 %v882_v21  ;;  %v888_v60 = vpack.c.bf16 %v285_v57, %v278_v56  ;;  %v342_v61 = vrot.slane %v307_v54, %v984_v7  ;;  %v315_v3 = vrot.slane %v1082_v63, %v984_v7  ;;  %v388_v4 = vrot.slane %v1077_v59, %v1035_v20 }
  0x27   : > { %v903_v15 = vpack.c.bf16 %v287_v11, %v280_v5  ;;  %v356_v62 = vmul.f32 %v346_v58, %v1097_v17  ;;  %v363_v0 = vmul.f32 %v346_v58, %v1109_v33  ;;  %v384_v2 = vrot.slane %v1077_v59, %v1030_v18 }
  0x28   : > { %869 = vmatpush1.bf16.msra.mxu0 %v868_v16  ;;  %v355_v12 = vmul.f32 %v342_v61, %v1122_v43  ;;  %v362_v21 = vmul.f32 %v342_v61, %v1127_v44  ;;  %v350_v23 = vrot.slane %v315_v3, %v984_v7  ;;  %v423_v20 = vrot.slane %v388_v4, %v1030_v18 }
  0x29   : > { %885 = vmatpush1.bf16.msra.mxu1 %v884_v22  ;;  %887 = vmatprep.subr.bf16.mxu0 %v886_v55  ;;  %v890_v24 = vpack.c.bf16 %v363_v0, %v356_v62  ;;  %v419_v59 = vrot.slane %v384_v2, %v1030_v18  ;;  %v392_v8 = vrot.slane %v1082_v63, %v1030_v18 }
  0x2a   : > { %902 = vmatprep.subr.bf16.mxu1 %v935_v9  ;;  %v357_v16 = vmul.f32 %v350_v23, %v1135_v49  ;;  %v364_v25 = vmul.f32 %v350_v23, %v1140_v50  ;;  %v433_v7 = vmul.f32 %v423_v20, %v1097_v17  ;;  %v440_v13 = vmul.f32 %v423_v20, %v1109_v33 }
  0x2b   : > { %820 = vmatmul.mubr.msk.f32.vlgmr.msra.gmra.mrb[0].mxu0 %vm442_vm0, %v206_v10  ;;  %v427_v14 = vrot.slane %v392_v8, %v1030_v18  ;;  %v892_v22 = vpack.c.bf16 %v362_v21, %v355_v12  ;;  %v432_v63 = vmul.f32 %v419_v59, %v1122_v43  ;;  %v439_v26 = vmul.f32 %v419_v59, %v1127_v44 }
  0x2c   : > { %889 = vmatpush1.bf16.msra.mxu0 %v888_v60  ;;  %821 = vmatmul.mubr.msk.f32.vlgmr.msra.gmra.mrb[0].mxu1 %vm442_vm0, %v206_v10  ;;  %v906_v27 = vpack.c.bf16 %v364_v25, %v357_v16  ;;  %v894_v28 = vpack.c.bf16 %v440_v13, %v433_v7  ;;  %v898_v19 = vpack.c.bf16 %v1109_v33, %v1097_v17 }
  0x2d   : > { %904 = vmatpush3.bf16.msra.mxu1 %v903_v15  ;;  %891 = vmatprep.subr.bf16.mxu0 %v890_v24  ;;  %v434_v29 = vmul.f32 %v427_v14, %v1135_v49  ;;  %v441_v30 = vmul.f32 %v427_v14, %v1140_v50  ;;  %v896_v18 = vpack.c.bf16 %v439_v26, %v432_v63 }
  0x2e   : > { %905 = vmatprep.subr.bf16.mxu1 %v935_v9  ;;  %652 = vmatprep.mubr.f32.mxu0 %v934_v1  ;;  %v900_v6 = vpack.c.bf16 %v1127_v44, %v1122_v43  ;;  %v912_v32 = vpack.c.bf16 %v1140_v50, %v1135_v49 }
  0x2f   : > { %851 = vmatprep.mubr.msk.f32.mxu1 %vm936_vm1, %v934_v1  ;;  %v909_v31 = vpack.c.bf16 %v441_v30, %v434_v29 }
  0x30   : > { %893 = vmatpush1.bf16.msra.mxu0 %v892_v22 }
  0x31   : > { %907 = vmatpush3.bf16.msra.mxu1 %v906_v27  ;;  %895 = vmatprep.subr.bf16.mxu0 %v894_v28 }
  0x32   : > { %908 = vmatprep.subr.bf16.mxu1 %v935_v9 }
  0x34   : > { %897 = vmatpush1.bf16.msra.mxu0 %v896_v18 }
  0x35   : > { %910 = vmatpush3.bf16.msra.mxu1 %v909_v31  ;;  %899 = vmatprep.subr.bf16.mxu0 %v898_v19 }
  0x36   : > { %911 = vmatprep.subr.bf16.mxu1 %v935_v9 }
  0x38   : > { %901 = vmatpush1.bf16.msra.mxu0 %v900_v6 }
  0x39   : > { %913 = vmatpush3.bf16.msra.mxu1 %v912_v32 }
  0x3b   : > { %822 = vmatmul.mubr.msk.f32.vlgmr.msra.gmra.mrb[2].mxu0 %vm442_vm0, %v206_v10 }
  0x3c   : > { %852 = vmatmul.mubr.msk.f32.vlgmr.msra.gmra.mrb[2].mxu1 %vm442_vm0, %v206_v10 }
  0xfe   : > { %v512_v1 = vpop.f32.mrb[0].mxu0 }
  0xff   : > { %v514_v17 = vpop.f32.mrb[1].mxu0  ;;  %v583_v33 = vpop.f32.mrb[0].mxu1 }
 0x100   : > { %v735_v34 = vcombine.low %v512_v1, %v514_v17  ;;  %v585_v35 = vpop.f32.mrb[1].mxu1 }
 0x101   : > { %v736_v36 = vcombine.low %v583_v33, %v585_v35 }
 0x102   : > { %741 = vst [vmem:[%s187_s28] sm:$0x77] %v735_v34 }
 0x103   : > { %742 = vst [vmem:[%s187_s28 + $0x8] sm:$0x77] %v736_v36 }
 0x10e   : > { %v654_v37 = vpop.f32.mrb[2].mxu0 }
 0x10f   : > { %v656_v38 = vpop.f32.mrb[3].mxu0  ;;  %v725_v39 = vpop.f32.mrb[2].mxu1 }
 0x110   : > { %v737_v40 = vcombine.low %v654_v37, %v656_v38  ;;  %744 = vst [vmem:[%s187_s28 + $0x18] sm:$0x7] %v725_v39  ;;  %v853_v41 = vpop.f32.mrb[3].mxu1 }
 0x112   : > { %743 = vst [vmem:[%s187_s28 + $0x10] sm:$0x77] %v737_v40 }
 0x113 PF: > { %s13_s12 = sadd.s32 1, %s932_s12  }
 0x114   : > { %p10_p4 = scmp.ge.s32.totalorder %s13_s12, 4  }
 0x116   :  { %12 = sbr.rel (!%p10_p4) target bundleno = 1 (0x1), region = 65 }

</bundles_post_ra>
